<compile_context>
chip_gen: v7x
topology: tpu7x:2x2x1
jax: 0.10.0
libtpu: 0.0.40
codegen_flags: <defaults>
</compile_context>

<pallas_src>
import jax
import jax.numpy as jnp
from jax.experimental import pallas as pl
from jax.experimental.pallas import tpu as pltpu

EMBED_DIM = 512
K1, P1, C1 = 64, 31, 16      # conv1: Conv1d(1, 16, kernel=64, stride=2, pad=31)
K2, P2, C2 = 32, 15, 32      # conv2: Conv1d(16, 32, kernel=32, stride=2, pad=15)
K3, P3, C3 = 16, 7, 64       # conv3: Conv1d(32, 64, kernel=16, stride=2, pad=7)
BN_EPS = 1e-5


# ------------------------------ fused Pallas kernel ------------------------------

def vib_encoder_kernel(p1_ref, w1_ref, pc1_ref, w2_ref, pc2_ref, w3_ref, pc3_ref,
                       fcw_ref, fcb_ref, o_ref,
                       c1_ref, a1_ref, c2_ref, a2_ref):
    """Whole VibrationEncoder forward for one batch element (grid axis = batch)."""
    f32 = jnp.float32
    L1 = c1_ref.shape[0]                     # conv1 output length
    L2 = c2_ref.shape[0]                     # conv2 output length
    nk2, nk3 = w2_ref.shape[0], w3_ref.shape[0]
    L1h, L2h = L1 // 2, L2 // 2              # lengths after maxpool1 / maxpool2
    pad2 = (a1_ref.shape[0] - L1h) // 2      # conv2 zero padding
    pad3 = (a2_ref.shape[0] - L2h) // 2      # conv3 zero padding
    L3 = (a2_ref.shape[0] - nk3) // 2 + 1    # conv3 output length

    def relu_bn(h, pc_ref):
        # conv bias -> ReLU -> eval-mode BatchNorm affine; pc rows = [bias, scale, shift]
        pc = pc_ref[...]
        return jnp.maximum(h + pc[0:1, :], 0.0) * pc[1:2, :] + pc[2:3, :]

    # ---- conv1 (single im2col matmul) + ReLU + BN -> VMEM ------------------------
    c1_ref[...] = relu_bn(
        jnp.dot(p1_ref[0], w1_ref[...], preferred_element_type=f32), pc1_ref)

    # ---- maxpool1 (k=2, s=2) into zero-padded conv2 input ------------------------
    a1_ref[...] = jnp.zeros_like(a1_ref)
    a1_ref[pl.ds(pad2, L1h), :] = jnp.maximum(c1_ref[pl.ds(0, L1h, 2), :],
                                              c1_ref[pl.ds(1, L1h, 2), :])

    # ---- conv2: stride-2 tap accumulation (strided VMEM reads + MXU matmuls) -----
    acc2 = jnp.dot(a1_ref[pl.ds(0, L2, 2), :], w2_ref[0], preferred_element_type=f32)
    for k in range(1, nk2):
        acc2 = acc2 + jnp.dot(a1_ref[pl.ds(k, L2, 2), :], w2_ref[k],
                              preferred_element_type=f32)
    c2_ref[...] = relu_bn(acc2, pc2_ref)

    # ---- maxpool2 into zero-padded conv3 input -----------------------------------
    a2_ref[...] = jnp.zeros_like(a2_ref)
    a2_ref[pl.ds(pad3, L2h), :] = jnp.maximum(c2_ref[pl.ds(0, L2h, 2), :],
                                              c2_ref[pl.ds(1, L2h, 2), :])

    # ---- conv3 + ReLU + BN + AdaptiveAvgPool1d(1) + fc (never materialized) ------
    acc3 = jnp.dot(a2_ref[pl.ds(0, L3, 2), :], w3_ref[0], preferred_element_type=f32)
    for k in range(1, nk3):
        acc3 = acc3 + jnp.dot(a2_ref[pl.ds(k, L3, 2), :], w3_ref[k],
                              preferred_element_type=f32)
    h3 = relu_bn(acc3, pc3_ref)                              # [L3, 64]
    pooled = jnp.mean(h3, axis=0, keepdims=True)             # [1, 64]
    o_ref[0] = jnp.dot(pooled, fcw_ref[...], preferred_element_type=f32) + fcb_ref[...]


# ----------------------------------- wrapper --------------------------------------

def vibration_encoder(x, p):
    """x: [B, 1, L] float32 -> [B, EMBED_DIM]; matches VibrationEncoder.forward (eval BN)."""
    B, _, L = x.shape
    assert L % 32 == 0 and L >= K1, "input length must be a multiple of 32 and >= 64"
    L1 = (L + 2 * P1 - K1) // 2 + 1          # conv1 out length
    L1h = L1 // 2                            # after maxpool1
    L2 = (L1h + 2 * P2 - K2) // 2 + 1        # conv2 out length
    L2h = L2 // 2                            # after maxpool2

    # Glue: im2col for the FIRST conv only (this is the unavoidable HBM input read);
    # everything downstream stays inside the single fused kernel.
    xp = jnp.pad(x[:, 0, :], ((0, 0), (P1, P1)))                     # [B, L + 62]
    idx = jnp.arange(L1)[:, None] * 2 + jnp.arange(K1)[None, :]      # [L1, K1]
    patches1 = xp[:, idx]                                            # [B, L1, K1]

    out = pl.pallas_call(
        vib_encoder_kernel,
        out_shape=jax.ShapeDtypeStruct((B, 1, EMBED_DIM), jnp.float32),
        grid=(B,),
        in_specs=[
            pl.BlockSpec((1, L1, K1), lambda b: (b, 0, 0)),    # conv1 patches (per batch)
            pl.BlockSpec((K1, C1), lambda b: (0, 0)),          # conv1 weight [K1, C1]
            pl.BlockSpec((3, C1), lambda b: (0, 0)),           # bias / BN scale / BN shift
            pl.BlockSpec((K2, C1, C2), lambda b: (0, 0, 0)),   # conv2 per-tap weights
            pl.BlockSpec((3, C2), lambda b: (0, 0)),
            pl.BlockSpec((K3, C2, C3), lambda b: (0, 0, 0)),   # conv3 per-tap weights
            pl.BlockSpec((3, C3), lambda b: (0, 0)),
            pl.BlockSpec((C3, EMBED_DIM), lambda b: (0, 0)),   # fc weight (transposed)
            pl.BlockSpec((1, EMBED_DIM), lambda b: (0, 0)),    # fc bias
        ],
        out_specs=pl.BlockSpec((1, 1, EMBED_DIM), lambda b: (b, 0, 0)),
        scratch_shapes=[
            pltpu.VMEM((L1, C1), jnp.float32),             # conv1 output
            pltpu.VMEM((L1h + 2 * P2, C1), jnp.float32),   # pooled1, zero-padded for conv2
            pltpu.VMEM((L2, C2), jnp.float32),             # conv2 output
            pltpu.VMEM((L2h + 2 * P3, C2), jnp.float32),   # pooled2, zero-padded for conv3
        ],
        compiler_params=pltpu.CompilerParams(dimension_semantics=("parallel",)),
    )(patches1, p['w1m'], p['pc1'], p['w2t'], p['pc2'], p['w3t'], p['pc3'],
      p['fcw'], p['fcb'])
    return out[:, 0, :]


# ------------------------------- parameter handling --------------------------------

def init_params(key):
    """Raw parameters mirroring the PyTorch module (Conv1d / BatchNorm1d / Linear)."""
    ks = jax.random.split(key, 12)

    def rnd(k, shape, s=0.05):
        return jax.random.normal(k, shape, jnp.float32) * s

    def bn(k, c):
        kg, kb, km, kv = jax.random.split(k, 4)
        return (1.0 + rnd(kg, (c,)), rnd(kb, (c,)),             # gamma, beta
                rnd(km, (c,)), 1.0 + jnp.abs(rnd(kv, (c,))))    # running_mean, running_var

    return {
        'w1': rnd(ks[0], (C1, 1, K1)),  'b1': rnd(ks[1], (C1,)), 'bn1': bn(ks[2], C1),
        'w2': rnd(ks[3], (C2, C1, K2)), 'b2': rnd(ks[4], (C2,)), 'bn2': bn(ks[5], C2),
        'w3': rnd(ks[6], (C3, C2, K3)), 'b3': rnd(ks[7], (C3,)), 'bn3': bn(ks[8], C3),
        'fc_w': rnd(ks[9], (EMBED_DIM, C3)), 'fc_b': rnd(ks[10], (EMBED_DIM,)),
    }


def prepare_params(p):
    """Fold conv weights / eval-mode BN into kernel-ready constants (done once)."""
    def bn_affine(bn):
        gamma, beta, mean, var = bn
        scale = gamma / jnp.sqrt(var + BN_EPS)
        return scale, beta - mean * scale

    s1, t1 = bn_affine(p['bn1'])
    s2, t2 = bn_affine(p['bn2'])
    s3, t3 = bn_affine(p['bn3'])
    return {
        'w1m': p['w1'].reshape(C1, K1).T,             # [K1, C1]
        'pc1': jnp.stack([p['b1'], s1, t1]),          # [3, C1] = bias, scale, shift
        'w2t': jnp.transpose(p['w2'], (2, 1, 0)),     # [K2, C1, C2], w2t[k] = W_k
        'pc2': jnp.stack([p['b2'], s2, t2]),
        'w3t': jnp.transpose(p['w3'], (2, 1, 0)),     # [K3, C2, C3]
        'pc3': jnp.stack([p['b3'], s3, t3]),
        'fcw': p['fc_w'].T,                           # [C3, EMBED_DIM]
        'fcb': p['fc_b'][None, :],                    # [1, EMBED_DIM]
    }


# -------------------------------------- main ---------------------------------------

if __name__ == "__main__":
    key = jax.random.PRNGKey(0)
    k_param, k_x = jax.random.split(key)
    params = prepare_params(init_params(k_param))

    B, L = 2, 1024
    x = jax.random.normal(k_x, (B, 1, L), jnp.float32)    # PyTorch NCL conv layout

    fwd = jax.jit(vibration_encoder)
    out = fwd(x, params)
    jax.block_until_ready(out)

    assert out.shape == (B, EMBED_DIM)
    assert bool(jnp.all(jnp.isfinite(out)))
    print("KERNEL_OK")
</pallas_src>

<mosaic_0001>
module attributes {stable_mosaic.version = 11 : i64} {
  func.func @vib_encoder_kernel(%arg0: i32, %arg1: memref<1x512x64xf32, #tpu.memory_space<vmem>>, %arg2: memref<64x16xf32, #tpu.memory_space<vmem>>, %arg3: memref<3x16xf32, #tpu.memory_space<vmem>>, %arg4: memref<32x16x32xf32, #tpu.memory_space<vmem>>, %arg5: memref<3x32xf32, #tpu.memory_space<vmem>>, %arg6: memref<16x32x64xf32, #tpu.memory_space<vmem>>, %arg7: memref<3x64xf32, #tpu.memory_space<vmem>>, %arg8: memref<64x512xf32, #tpu.memory_space<vmem>>, %arg9: memref<1x512xf32, #tpu.memory_space<vmem>>, %arg10: memref<1x1x512xf32, #tpu.memory_space<vmem>>, %arg11: memref<512x16xf32, #tpu.memory_space<vmem>>, %arg12: memref<286x16xf32, #tpu.memory_space<vmem>>, %arg13: memref<128x32xf32, #tpu.memory_space<vmem>>, %arg14: memref<78x32xf32, #tpu.memory_space<vmem>>) attributes {dimension_semantics = [#tpu.dimension_semantics<parallel>], iteration_bounds = array<i64: 2>, scalar_prefetch = 0 : i64, scratch_operands = 4 : i64, tpu.core_type = #tpu.core_type<tc>, window_params = [{transform_indices = @transform_0, window_bounds = array<i64: 1, 512, 64>}, {pipeline_mode = #tpu.pipeline_mode<synchronous>, transform_indices = @transform_1, window_bounds = array<i64: 64, 16>}, {pipeline_mode = #tpu.pipeline_mode<synchronous>, transform_indices = @transform_2, window_bounds = array<i64: 3, 16>}, {pipeline_mode = #tpu.pipeline_mode<synchronous>, transform_indices = @transform_3, window_bounds = array<i64: 32, 16, 32>}, {pipeline_mode = #tpu.pipeline_mode<synchronous>, transform_indices = @transform_4, window_bounds = array<i64: 3, 32>}, {pipeline_mode = #tpu.pipeline_mode<synchronous>, transform_indices = @transform_5, window_bounds = array<i64: 16, 32, 64>}, {pipeline_mode = #tpu.pipeline_mode<synchronous>, transform_indices = @transform_6, window_bounds = array<i64: 3, 64>}, {pipeline_mode = #tpu.pipeline_mode<synchronous>, transform_indices = @transform_7, window_bounds = array<i64: 64, 512>}, {pipeline_mode = #tpu.pipeline_mode<synchronous>, transform_indices = @transform_8, window_bounds = array<i64: 1, 512>}, {transform_indices = @transform_9, window_bounds = array<i64: 1, 1, 512>}]} {
    %c0 = arith.constant 0 : index
    %c0_0 = arith.constant 0 : index
    %c0_1 = arith.constant 0 : index
    %0 = vector.load %arg1[%c0, %c0_0, %c0_1] : memref<1x512x64xf32, #tpu.memory_space<vmem>>, vector<1x512x64xf32>
    %1 = vector.shape_cast %0 : vector<1x512x64xf32> to vector<512x64xf32>
    %c0_2 = arith.constant 0 : index
    %c0_3 = arith.constant 0 : index
    %2 = vector.load %arg2[%c0_2, %c0_3] : memref<64x16xf32, #tpu.memory_space<vmem>>, vector<64x16xf32>
    %cst = arith.constant dense<0.000000e+00> : vector<512x16xf32>
    %3 = tpu.matmul %1, %2, %cst {dimension_numbers = #tpu.dot_dimension_numbers<[1], [0], [0], [1], [0, 0, 1, 1], [], []>} : vector<512x64xf32>, vector<64x16xf32>, vector<512x16xf32> -> vector<512x16xf32>
    %c0_4 = arith.constant 0 : index
    %c0_5 = arith.constant 0 : index
    %4 = vector.load %arg3[%c0_4, %c0_5] : memref<3x16xf32, #tpu.memory_space<vmem>>, vector<3x16xf32>
    %5 = vector.extract_strided_slice %4 {offsets = [0, 0], sizes = [1, 16], strides = [1, 1]} : vector<3x16xf32> to vector<1x16xf32>
    %6 = vector.broadcast %5 : vector<1x16xf32> to vector<512x16xf32>
    %7 = arith.addf %3, %6 : vector<512x16xf32>
    %cst_6 = arith.constant 0.000000e+00 : f32
    %8 = vector.broadcast %cst_6 : f32 to vector<512x16xf32>
    %9 = arith.maximumf %7, %8 : vector<512x16xf32>
    %10 = vector.extract_strided_slice %4 {offsets = [1, 0], sizes = [1, 16], strides = [1, 1]} : vector<3x16xf32> to vector<1x16xf32>
    %11 = vector.broadcast %10 : vector<1x16xf32> to vector<512x16xf32>
    %12 = arith.mulf %9, %11 : vector<512x16xf32>
    %13 = vector.extract_strided_slice %4 {offsets = [2, 0], sizes = [1, 16], strides = [1, 1]} : vector<3x16xf32> to vector<1x16xf32>
    %14 = vector.broadcast %13 : vector<1x16xf32> to vector<512x16xf32>
    %15 = arith.addf %12, %14 : vector<512x16xf32>
    %c0_7 = arith.constant 0 : index
    %c0_8 = arith.constant 0 : index
    %16 = vector.load %arg11[%c0_7, %c0_8] : memref<512x16xf32, #tpu.memory_space<vmem>>, vector<512x16xf32>
    tpu.vector_store %arg11[%c0_7, %c0_8], %15 {strides = array<i32>} : memref<512x16xf32, #tpu.memory_space<vmem>>, vector<512x16xf32>,
    %cst_9 = arith.constant 0.000000e+00 : f32
    %17 = vector.broadcast %cst_9 : f32 to vector<286x16xf32>
    %c0_10 = arith.constant 0 : index
    %c0_11 = arith.constant 0 : index
    %18 = vector.load %arg12[%c0_10, %c0_11] : memref<286x16xf32, #tpu.memory_space<vmem>>, vector<286x16xf32>
    tpu.vector_store %arg12[%c0_10, %c0_11], %17 {strides = array<i32>} : memref<286x16xf32, #tpu.memory_space<vmem>>, vector<286x16xf32>,
    %c0_12 = arith.constant 0 : index
    %c0_13 = arith.constant 0 : index
    %19 = tpu.strided_load %arg11[%c0_12, %c0_13] {strides = array<i32: 2, 1>} : memref<512x16xf32, #tpu.memory_space<vmem>>, vector<256x16xf32>
    %c1 = arith.constant 1 : index
    %c0_14 = arith.constant 0 : index
    %20 = tpu.strided_load %arg11[%c1, %c0_14] {strides = array<i32: 2, 1>} : memref<512x16xf32, #tpu.memory_space<vmem>>, vector<256x16xf32>
    %21 = arith.maximumf %19, %20 : vector<256x16xf32>
    %c15 = arith.constant 15 : index
    %c0_15 = arith.constant 0 : index
    %22 = vector.load %arg12[%c15, %c0_15] : memref<286x16xf32, #tpu.memory_space<vmem>>, vector<256x16xf32>
    tpu.vector_store %arg12[%c15, %c0_15], %21 {strides = array<i32>} : memref<286x16xf32, #tpu.memory_space<vmem>>, vector<256x16xf32>,
    %c0_16 = arith.constant 0 : index
    %c0_17 = arith.constant 0 : index
    %23 = tpu.strided_load %arg12[%c0_16, %c0_17] {strides = array<i32: 2, 1>} : memref<286x16xf32, #tpu.memory_space<vmem>>, vector<128x16xf32>
    %c0_18 = arith.constant 0 : index
    %c0_19 = arith.constant 0 : index
    %c0_20 = arith.constant 0 : index
    %24 = vector.load %arg4[%c0_18, %c0_19, %c0_20] : memref<32x16x32xf32, #tpu.memory_space<vmem>>, vector<1x16x32xf32>
    %25 = vector.shape_cast %24 : vector<1x16x32xf32> to vector<16x32xf32>
    %cst_21 = arith.constant dense<0.000000e+00> : vector<128x32xf32>
    %26 = tpu.matmul %23, %25, %cst_21 {dimension_numbers = #tpu.dot_dimension_numbers<[1], [0], [0], [1], [0, 0, 1, 1], [], []>} : vector<128x16xf32>, vector<16x32xf32>, vector<128x32xf32> -> vector<128x32xf32>
    %c1_22 = arith.constant 1 : index
    %c0_23 = arith.constant 0 : index
    %27 = tpu.strided_load %arg12[%c1_22, %c0_23] {strides = array<i32: 2, 1>} : memref<286x16xf32, #tpu.memory_space<vmem>>, vector<128x16xf32>
    %c1_24 = arith.constant 1 : index
    %c0_25 = arith.constant 0 : index
    %c0_26 = arith.constant 0 : index
    %28 = vector.load %arg4[%c1_24, %c0_25, %c0_26] : memref<32x16x32xf32, #tpu.memory_space<vmem>>, vector<1x16x32xf32>
    %29 = vector.shape_cast %28 : vector<1x16x32xf32> to vector<16x32xf32>
    %cst_27 = arith.constant dense<0.000000e+00> : vector<128x32xf32>
    %30 = tpu.matmul %27, %29, %cst_27 {dimension_numbers = #tpu.dot_dimension_numbers<[1], [0], [0], [1], [0, 0, 1, 1], [], []>} : vector<128x16xf32>, vector<16x32xf32>, vector<128x32xf32> -> vector<128x32xf32>
    %31 = arith.addf %26, %30 : vector<128x32xf32>
    %c2 = arith.constant 2 : index
    %c0_28 = arith.constant 0 : index
    %32 = tpu.strided_load %arg12[%c2, %c0_28] {strides = array<i32: 2, 1>} : memref<286x16xf32, #tpu.memory_space<vmem>>, vector<128x16xf32>
    %c2_29 = arith.constant 2 : index
    %c0_30 = arith.constant 0 : index
    %c0_31 = arith.constant 0 : index
    %33 = vector.load %arg4[%c2_29, %c0_30, %c0_31] : memref<32x16x32xf32, #tpu.memory_space<vmem>>, vector<1x16x32xf32>
    %34 = vector.shape_cast %33 : vector<1x16x32xf32> to vector<16x32xf32>
    %cst_32 = arith.constant dense<0.000000e+00> : vector<128x32xf32>
    %35 = tpu.matmul %32, %34, %cst_32 {dimension_numbers = #tpu.dot_dimension_numbers<[1], [0], [0], [1], [0, 0, 1, 1], [], []>} : vector<128x16xf32>, vector<16x32xf32>, vector<128x32xf32> -> vector<128x32xf32>
    %36 = arith.addf %31, %35 : vector<128x32xf32>
    %c3 = arith.constant 3 : index
    %c0_33 = arith.constant 0 : index
    %37 = tpu.strided_load %arg12[%c3, %c0_33] {strides = array<i32: 2, 1>} : memref<286x16xf32, #tpu.memory_space<vmem>>, vector<128x16xf32>
    %c3_34 = arith.constant 3 : index
    %c0_35 = arith.constant 0 : index
    %c0_36 = arith.constant 0 : index
    %38 = vector.load %arg4[%c3_34, %c0_35, %c0_36] : memref<32x16x32xf32, #tpu.memory_space<vmem>>, vector<1x16x32xf32>
    %39 = vector.shape_cast %38 : vector<1x16x32xf32> to vector<16x32xf32>
    %cst_37 = arith.constant dense<0.000000e+00> : vector<128x32xf32>
    %40 = tpu.matmul %37, %39, %cst_37 {dimension_numbers = #tpu.dot_dimension_numbers<[1], [0], [0], [1], [0, 0, 1, 1], [], []>} : vector<128x16xf32>, vector<16x32xf32>, vector<128x32xf32> -> vector<128x32xf32>
    %41 = arith.addf %36, %40 : vector<128x32xf32>
    %c4 = arith.constant 4 : index
    %c0_38 = arith.constant 0 : index
    %42 = tpu.strided_load %arg12[%c4, %c0_38] {strides = array<i32: 2, 1>} : memref<286x16xf32, #tpu.memory_space<vmem>>, vector<128x16xf32>
    %c4_39 = arith.constant 4 : index
    %c0_40 = arith.constant 0 : index
    %c0_41 = arith.constant 0 : index
    %43 = vector.load %arg4[%c4_39, %c0_40, %c0_41] : memref<32x16x32xf32, #tpu.memory_space<vmem>>, vector<1x16x32xf32>
    %44 = vector.shape_cast %43 : vector<1x16x32xf32> to vector<16x32xf32>
    %cst_42 = arith.constant dense<0.000000e+00> : vector<128x32xf32>
    %45 = tpu.matmul %42, %44, %cst_42 {dimension_numbers = #tpu.dot_dimension_numbers<[1], [0], [0], [1], [0, 0, 1, 1], [], []>} : vector<128x16xf32>, vector<16x32xf32>, vector<128x32xf32> -> vector<128x32xf32>
    %46 = arith.addf %41, %45 : vector<128x32xf32>
    %c5 = arith.constant 5 : index
    %c0_43 = arith.constant 0 : index
    %47 = tpu.strided_load %arg12[%c5, %c0_43] {strides = array<i32: 2, 1>} : memref<286x16xf32, #tpu.memory_space<vmem>>, vector<128x16xf32>
    %c5_44 = arith.constant 5 : index
    %c0_45 = arith.constant 0 : index
    %c0_46 = arith.constant 0 : index
    %48 = vector.load %arg4[%c5_44, %c0_45, %c0_46] : memref<32x16x32xf32, #tpu.memory_space<vmem>>, vector<1x16x32xf32>
    %49 = vector.shape_cast %48 : vector<1x16x32xf32> to vector<16x32xf32>
    %cst_47 = arith.constant dense<0.000000e+00> : vector<128x32xf32>
    %50 = tpu.matmul %47, %49, %cst_47 {dimension_numbers = #tpu.dot_dimension_numbers<[1], [0], [0], [1], [0, 0, 1, 1], [], []>} : vector<128x16xf32>, vector<16x32xf32>, vector<128x32xf32> -> vector<128x32xf32>
    %51 = arith.addf %46, %50 : vector<128x32xf32>
    %c6 = arith.constant 6 : index
    %c0_48 = arith.constant 0 : index
    %52 = tpu.strided_load %arg12[%c6, %c0_48] {strides = array<i32: 2, 1>} : memref<286x16xf32, #tpu.memory_space<vmem>>, vector<128x16xf32>
    %c6_49 = arith.constant 6 : index
    %c0_50 = arith.constant 0 : index
    %c0_51 = arith.constant 0 : index
    %53 = vector.load %arg4[%c6_49, %c0_50, %c0_51] : memref<32x16x32xf32, #tpu.memory_space<vmem>>, vector<1x16x32xf32>
    %54 = vector.shape_cast %53 : vector<1x16x32xf32> to vector<16x32xf32>
    %cst_52 = arith.constant dense<0.000000e+00> : vector<128x32xf32>
    %55 = tpu.matmul %52, %54, %cst_52 {dimension_numbers = #tpu.dot_dimension_numbers<[1], [0], [0], [1], [0, 0, 1, 1], [], []>} : vector<128x16xf32>, vector<16x32xf32>, vector<128x32xf32> -> vector<128x32xf32>
    %56 = arith.addf %51, %55 : vector<128x32xf32>
    %c7 = arith.constant 7 : index
    %c0_53 = arith.constant 0 : index
    %57 = tpu.strided_load %arg12[%c7, %c0_53] {strides = array<i32: 2, 1>} : memref<286x16xf32, #tpu.memory_space<vmem>>, vector<128x16xf32>
    %c7_54 = arith.constant 7 : index
    %c0_55 = arith.constant 0 : index
    %c0_56 = arith.constant 0 : index
    %58 = vector.load %arg4[%c7_54, %c0_55, %c0_56] : memref<32x16x32xf32, #tpu.memory_space<vmem>>, vector<1x16x32xf32>
    %59 = vector.shape_cast %58 : vector<1x16x32xf32> to vector<16x32xf32>
    %cst_57 = arith.constant dense<0.000000e+00> : vector<128x32xf32>
    %60 = tpu.matmul %57, %59, %cst_57 {dimension_numbers = #tpu.dot_dimension_numbers<[1], [0], [0], [1], [0, 0, 1, 1], [], []>} : vector<128x16xf32>, vector<16x32xf32>, vector<128x32xf32> -> vector<128x32xf32>
    %61 = arith.addf %56, %60 : vector<128x32xf32>
    %c8 = arith.constant 8 : index
    %c0_58 = arith.constant 0 : index
    %62 = tpu.strided_load %arg12[%c8, %c0_58] {strides = array<i32: 2, 1>} : memref<286x16xf32, #tpu.memory_space<vmem>>, vector<128x16xf32>
    %c8_59 = arith.constant 8 : index
    %c0_60 = arith.constant 0 : index
    %c0_61 = arith.constant 0 : index
    %63 = vector.load %arg4[%c8_59, %c0_60, %c0_61] : memref<32x16x32xf32, #tpu.memory_space<vmem>>, vector<1x16x32xf32>
    %64 = vector.shape_cast %63 : vector<1x16x32xf32> to vector<16x32xf32>
    %cst_62 = arith.constant dense<0.000000e+00> : vector<128x32xf32>
    %65 = tpu.matmul %62, %64, %cst_62 {dimension_numbers = #tpu.dot_dimension_numbers<[1], [0], [0], [1], [0, 0, 1, 1], [], []>} : vector<128x16xf32>, vector<16x32xf32>, vector<128x32xf32> -> vector<128x32xf32>
    %66 = arith.addf %61, %65 : vector<128x32xf32>
    %c9 = arith.constant 9 : index
    %c0_63 = arith.constant 0 : index
    %67 = tpu.strided_load %arg12[%c9, %c0_63] {strides = array<i32: 2, 1>} : memref<286x16xf32, #tpu.memory_space<vmem>>, vector<128x16xf32>
    %c9_64 = arith.constant 9 : index
    %c0_65 = arith.constant 0 : index
    %c0_66 = arith.constant 0 : index
    %68 = vector.load %arg4[%c9_64, %c0_65, %c0_66] : memref<32x16x32xf32, #tpu.memory_space<vmem>>, vector<1x16x32xf32>
    %69 = vector.shape_cast %68 : vector<1x16x32xf32> to vector<16x32xf32>
    %cst_67 = arith.constant dense<0.000000e+00> : vector<128x32xf32>
    %70 = tpu.matmul %67, %69, %cst_67 {dimension_numbers = #tpu.dot_dimension_numbers<[1], [0], [0], [1], [0, 0, 1, 1], [], []>} : vector<128x16xf32>, vector<16x32xf32>, vector<128x32xf32> -> vector<128x32xf32>
    %71 = arith.addf %66, %70 : vector<128x32xf32>
    %c10 = arith.constant 10 : index
    %c0_68 = arith.constant 0 : index
    %72 = tpu.strided_load %arg12[%c10, %c0_68] {strides = array<i32: 2, 1>} : memref<286x16xf32, #tpu.memory_space<vmem>>, vector<128x16xf32>
    %c10_69 = arith.constant 10 : index
    %c0_70 = arith.constant 0 : index
    %c0_71 = arith.constant 0 : index
    %73 = vector.load %arg4[%c10_69, %c0_70, %c0_71] : memref<32x16x32xf32, #tpu.memory_space<vmem>>, vector<1x16x32xf32>
    %74 = vector.shape_cast %73 : vector<1x16x32xf32> to vector<16x32xf32>
    %cst_72 = arith.constant dense<0.000000e+00> : vector<128x32xf32>
    %75 = tpu.matmul %72, %74, %cst_72 {dimension_numbers = #tpu.dot_dimension_numbers<[1], [0], [0], [1], [0, 0, 1, 1], [], []>} : vector<128x16xf32>, vector<16x32xf32>, vector<128x32xf32> -> vector<128x32xf32>
    %76 = arith.addf %71, %75 : vector<128x32xf32>
    %c11 = arith.constant 11 : index
    %c0_73 = arith.constant 0 : index
    %77 = tpu.strided_load %arg12[%c11, %c0_73] {strides = array<i32: 2, 1>} : memref<286x16xf32, #tpu.memory_space<vmem>>, vector<128x16xf32>
    %c11_74 = arith.constant 11 : index
    %c0_75 = arith.constant 0 : index
    %c0_76 = arith.constant 0 : index
    %78 = vector.load %arg4[%c11_74, %c0_75, %c0_76] : memref<32x16x32xf32, #tpu.memory_space<vmem>>, vector<1x16x32xf32>
    %79 = vector.shape_cast %78 : vector<1x16x32xf32> to vector<16x32xf32>
    %cst_77 = arith.constant dense<0.000000e+00> : vector<128x32xf32>
    %80 = tpu.matmul %77, %79, %cst_77 {dimension_numbers = #tpu.dot_dimension_numbers<[1], [0], [0], [1], [0, 0, 1, 1], [], []>} : vector<128x16xf32>, vector<16x32xf32>, vector<128x32xf32> -> vector<128x32xf32>
    %81 = arith.addf %76, %80 : vector<128x32xf32>
    %c12 = arith.constant 12 : index
    %c0_78 = arith.constant 0 : index
    %82 = tpu.strided_load %arg12[%c12, %c0_78] {strides = array<i32: 2, 1>} : memref<286x16xf32, #tpu.memory_space<vmem>>, vector<128x16xf32>
    %c12_79 = arith.constant 12 : index
    %c0_80 = arith.constant 0 : index
    %c0_81 = arith.constant 0 : index
    %83 = vector.load %arg4[%c12_79, %c0_80, %c0_81] : memref<32x16x32xf32, #tpu.memory_space<vmem>>, vector<1x16x32xf32>
    %84 = vector.shape_cast %83 : vector<1x16x32xf32> to vector<16x32xf32>
    %cst_82 = arith.constant dense<0.000000e+00> : vector<128x32xf32>
    %85 = tpu.matmul %82, %84, %cst_82 {dimension_numbers = #tpu.dot_dimension_numbers<[1], [0], [0], [1], [0, 0, 1, 1], [], []>} : vector<128x16xf32>, vector<16x32xf32>, vector<128x32xf32> -> vector<128x32xf32>
    %86 = arith.addf %81, %85 : vector<128x32xf32>
    %c13 = arith.constant 13 : index
    %c0_83 = arith.constant 0 : index
    %87 = tpu.strided_load %arg12[%c13, %c0_83] {strides = array<i32: 2, 1>} : memref<286x16xf32, #tpu.memory_space<vmem>>, vector<128x16xf32>
    %c13_84 = arith.constant 13 : index
    %c0_85 = arith.constant 0 : index
    %c0_86 = arith.constant 0 : index
    %88 = vector.load %arg4[%c13_84, %c0_85, %c0_86] : memref<32x16x32xf32, #tpu.memory_space<vmem>>, vector<1x16x32xf32>
    %89 = vector.shape_cast %88 : vector<1x16x32xf32> to vector<16x32xf32>
    %cst_87 = arith.constant dense<0.000000e+00> : vector<128x32xf32>
    %90 = tpu.matmul %87, %89, %cst_87 {dimension_numbers = #tpu.dot_dimension_numbers<[1], [0], [0], [1], [0, 0, 1, 1], [], []>} : vector<128x16xf32>, vector<16x32xf32>, vector<128x32xf32> -> vector<128x32xf32>
    %91 = arith.addf %86, %90 : vector<128x32xf32>
    %c14 = arith.constant 14 : index
    %c0_88 = arith.constant 0 : index
    %92 = tpu.strided_load %arg12[%c14, %c0_88] {strides = array<i32: 2, 1>} : memref<286x16xf32, #tpu.memory_space<vmem>>, vector<128x16xf32>
    %c14_89 = arith.constant 14 : index
    %c0_90 = arith.constant 0 : index
    %c0_91 = arith.constant 0 : index
    %93 = vector.load %arg4[%c14_89, %c0_90, %c0_91] : memref<32x16x32xf32, #tpu.memory_space<vmem>>, vector<1x16x32xf32>
    %94 = vector.shape_cast %93 : vector<1x16x32xf32> to vector<16x32xf32>
    %cst_92 = arith.constant dense<0.000000e+00> : vector<128x32xf32>
    %95 = tpu.matmul %92, %94, %cst_92 {dimension_numbers = #tpu.dot_dimension_numbers<[1], [0], [0], [1], [0, 0, 1, 1], [], []>} : vector<128x16xf32>, vector<16x32xf32>, vector<128x32xf32> -> vector<128x32xf32>
    %96 = arith.addf %91, %95 : vector<128x32xf32>
    %c15_93 = arith.constant 15 : index
    %c0_94 = arith.constant 0 : index
    %97 = tpu.strided_load %arg12[%c15_93, %c0_94] {strides = array<i32: 2, 1>} : memref<286x16xf32, #tpu.memory_space<vmem>>, vector<128x16xf32>
    %c15_95 = arith.constant 15 : index
    %c0_96 = arith.constant 0 : index
    %c0_97 = arith.constant 0 : index
    %98 = vector.load %arg4[%c15_95, %c0_96, %c0_97] : memref<32x16x32xf32, #tpu.memory_space<vmem>>, vector<1x16x32xf32>
    %99 = vector.shape_cast %98 : vector<1x16x32xf32> to vector<16x32xf32>
    %cst_98 = arith.constant dense<0.000000e+00> : vector<128x32xf32>
    %100 = tpu.matmul %97, %99, %cst_98 {dimension_numbers = #tpu.dot_dimension_numbers<[1], [0], [0], [1], [0, 0, 1, 1], [], []>} : vector<128x16xf32>, vector<16x32xf32>, vector<128x32xf32> -> vector<128x32xf32>
    %101 = arith.addf %96, %100 : vector<128x32xf32>
    %c16 = arith.constant 16 : index
    %c0_99 = arith.constant 0 : index
    %102 = tpu.strided_load %arg12[%c16, %c0_99] {strides = array<i32: 2, 1>} : memref<286x16xf32, #tpu.memory_space<vmem>>, vector<128x16xf32>
    %c16_100 = arith.constant 16 : index
    %c0_101 = arith.constant 0 : index
    %c0_102 = arith.constant 0 : index
    %103 = vector.load %arg4[%c16_100, %c0_101, %c0_102] : memref<32x16x32xf32, #tpu.memory_space<vmem>>, vector<1x16x32xf32>
    %104 = vector.shape_cast %103 : vector<1x16x32xf32> to vector<16x32xf32>
    %cst_103 = arith.constant dense<0.000000e+00> : vector<128x32xf32>
    %105 = tpu.matmul %102, %104, %cst_103 {dimension_numbers = #tpu.dot_dimension_numbers<[1], [0], [0], [1], [0, 0, 1, 1], [], []>} : vector<128x16xf32>, vector<16x32xf32>, vector<128x32xf32> -> vector<128x32xf32>
    %106 = arith.addf %101, %105 : vector<128x32xf32>
    %c17 = arith.constant 17 : index
    %c0_104 = arith.constant 0 : index
    %107 = tpu.strided_load %arg12[%c17, %c0_104] {strides = array<i32: 2, 1>} : memref<286x16xf32, #tpu.memory_space<vmem>>, vector<128x16xf32>
    %c17_105 = arith.constant 17 : index
    %c0_106 = arith.constant 0 : index
    %c0_107 = arith.constant 0 : index
    %108 = vector.load %arg4[%c17_105, %c0_106, %c0_107] : memref<32x16x32xf32, #tpu.memory_space<vmem>>, vector<1x16x32xf32>
    %109 = vector.shape_cast %108 : vector<1x16x32xf32> to vector<16x32xf32>
    %cst_108 = arith.constant dense<0.000000e+00> : vector<128x32xf32>
    %110 = tpu.matmul %107, %109, %cst_108 {dimension_numbers = #tpu.dot_dimension_numbers<[1], [0], [0], [1], [0, 0, 1, 1], [], []>} : vector<128x16xf32>, vector<16x32xf32>, vector<128x32xf32> -> vector<128x32xf32>
    %111 = arith.addf %106, %110 : vector<128x32xf32>
    %c18 = arith.constant 18 : index
    %c0_109 = arith.constant 0 : index
    %112 = tpu.strided_load %arg12[%c18, %c0_109] {strides = array<i32: 2, 1>} : memref<286x16xf32, #tpu.memory_space<vmem>>, vector<128x16xf32>
    %c18_110 = arith.constant 18 : index
    %c0_111 = arith.constant 0 : index
    %c0_112 = arith.constant 0 : index
    %113 = vector.load %arg4[%c18_110, %c0_111, %c0_112] : memref<32x16x32xf32, #tpu.memory_space<vmem>>, vector<1x16x32xf32>
    %114 = vector.shape_cast %113 : vector<1x16x32xf32> to vector<16x32xf32>
    %cst_113 = arith.constant dense<0.000000e+00> : vector<128x32xf32>
    %115 = tpu.matmul %112, %114, %cst_113 {dimension_numbers = #tpu.dot_dimension_numbers<[1], [0], [0], [1], [0, 0, 1, 1], [], []>} : vector<128x16xf32>, vector<16x32xf32>, vector<128x32xf32> -> vector<128x32xf32>
    %116 = arith.addf %111, %115 : vector<128x32xf32>
    %c19 = arith.constant 19 : index
    %c0_114 = arith.constant 0 : index
    %117 = tpu.strided_load %arg12[%c19, %c0_114] {strides = array<i32: 2, 1>} : memref<286x16xf32, #tpu.memory_space<vmem>>, vector<128x16xf32>
    %c19_115 = arith.constant 19 : index
    %c0_116 = arith.constant 0 : index
    %c0_117 = arith.constant 0 : index
    %118 = vector.load %arg4[%c19_115, %c0_116, %c0_117] : memref<32x16x32xf32, #tpu.memory_space<vmem>>, vector<1x16x32xf32>
    %119 = vector.shape_cast %118 : vector<1x16x32xf32> to vector<16x32xf32>
    %cst_118 = arith.constant dense<0.000000e+00> : vector<128x32xf32>
    %120 = tpu.matmul %117, %119, %cst_118 {dimension_numbers = #tpu.dot_dimension_numbers<[1], [0], [0], [1], [0, 0, 1, 1], [], []>} : vector<128x16xf32>, vector<16x32xf32>, vector<128x32xf32> -> vector<128x32xf32>
    %121 = arith.addf %116, %120 : vector<128x32xf32>
    %c20 = arith.constant 20 : index
    %c0_119 = arith.constant 0 : index
    %122 = tpu.strided_load %arg12[%c20, %c0_119] {strides = array<i32: 2, 1>} : memref<286x16xf32, #tpu.memory_space<vmem>>, vector<128x16xf32>
    %c20_120 = arith.constant 20 : index
    %c0_121 = arith.constant 0 : index
    %c0_122 = arith.constant 0 : index
    %123 = vector.load %arg4[%c20_120, %c0_121, %c0_122] : memref<32x16x32xf32, #tpu.memory_space<vmem>>, vector<1x16x32xf32>
    %124 = vector.shape_cast %123 : vector<1x16x32xf32> to vector<16x32xf32>
    %cst_123 = arith.constant dense<0.000000e+00> : vector<128x32xf32>
    %125 = tpu.matmul %122, %124, %cst_123 {dimension_numbers = #tpu.dot_dimension_numbers<[1], [0], [0], [1], [0, 0, 1, 1], [], []>} : vector<128x16xf32>, vector<16x32xf32>, vector<128x32xf32> -> vector<128x32xf32>
    %126 = arith.addf %121, %125 : vector<128x32xf32>
    %c21 = arith.constant 21 : index
    %c0_124 = arith.constant 0 : index
    %127 = tpu.strided_load %arg12[%c21, %c0_124] {strides = array<i32: 2, 1>} : memref<286x16xf32, #tpu.memory_space<vmem>>, vector<128x16xf32>
    %c21_125 = arith.constant 21 : index
    %c0_126 = arith.constant 0 : index
    %c0_127 = arith.constant 0 : index
    %128 = vector.load %arg4[%c21_125, %c0_126, %c0_127] : memref<32x16x32xf32, #tpu.memory_space<vmem>>, vector<1x16x32xf32>
    %129 = vector.shape_cast %128 : vector<1x16x32xf32> to vector<16x32xf32>
    %cst_128 = arith.constant dense<0.000000e+00> : vector<128x32xf32>
    %130 = tpu.matmul %127, %129, %cst_128 {dimension_numbers = #tpu.dot_dimension_numbers<[1], [0], [0], [1], [0, 0, 1, 1], [], []>} : vector<128x16xf32>, vector<16x32xf32>, vector<128x32xf32> -> vector<128x32xf32>
    %131 = arith.addf %126, %130 : vector<128x32xf32>
    %c22 = arith.constant 22 : index
    %c0_129 = arith.constant 0 : index
    %132 = tpu.strided_load %arg12[%c22, %c0_129] {strides = array<i32: 2, 1>} : memref<286x16xf32, #tpu.memory_space<vmem>>, vector<128x16xf32>
    %c22_130 = arith.constant 22 : index
    %c0_131 = arith.constant 0 : index
    %c0_132 = arith.constant 0 : index
    %133 = vector.load %arg4[%c22_130, %c0_131, %c0_132] : memref<32x16x32xf32, #tpu.memory_space<vmem>>, vector<1x16x32xf32>
    %134 = vector.shape_cast %133 : vector<1x16x32xf32> to vector<16x32xf32>
    %cst_133 = arith.constant dense<0.000000e+00> : vector<128x32xf32>
    %135 = tpu.matmul %132, %134, %cst_133 {dimension_numbers = #tpu.dot_dimension_numbers<[1], [0], [0], [1], [0, 0, 1, 1], [], []>} : vector<128x16xf32>, vector<16x32xf32>, vector<128x32xf32> -> vector<128x32xf32>
    %136 = arith.addf %131, %135 : vector<128x32xf32>
    %c23 = arith.constant 23 : index
    %c0_134 = arith.constant 0 : index
    %137 = tpu.strided_load %arg12[%c23, %c0_134] {strides = array<i32: 2, 1>} : memref<286x16xf32, #tpu.memory_space<vmem>>, vector<128x16xf32>
    %c23_135 = arith.constant 23 : index
    %c0_136 = arith.constant 0 : index
    %c0_137 = arith.constant 0 : index
    %138 = vector.load %arg4[%c23_135, %c0_136, %c0_137] : memref<32x16x32xf32, #tpu.memory_space<vmem>>, vector<1x16x32xf32>
    %139 = vector.shape_cast %138 : vector<1x16x32xf32> to vector<16x32xf32>
    %cst_138 = arith.constant dense<0.000000e+00> : vector<128x32xf32>
    %140 = tpu.matmul %137, %139, %cst_138 {dimension_numbers = #tpu.dot_dimension_numbers<[1], [0], [0], [1], [0, 0, 1, 1], [], []>} : vector<128x16xf32>, vector<16x32xf32>, vector<128x32xf32> -> vector<128x32xf32>
    %141 = arith.addf %136, %140 : vector<128x32xf32>
    %c24 = arith.constant 24 : index
    %c0_139 = arith.constant 0 : index
    %142 = tpu.strided_load %arg12[%c24, %c0_139] {strides = array<i32: 2, 1>} : memref<286x16xf32, #tpu.memory_space<vmem>>, vector<128x16xf32>
    %c24_140 = arith.constant 24 : index
    %c0_141 = arith.constant 0 : index
    %c0_142 = arith.constant 0 : index
    %143 = vector.load %arg4[%c24_140, %c0_141, %c0_142] : memref<32x16x32xf32, #tpu.memory_space<vmem>>, vector<1x16x32xf32>
    %144 = vector.shape_cast %143 : vector<1x16x32xf32> to vector<16x32xf32>
    %cst_143 = arith.constant dense<0.000000e+00> : vector<128x32xf32>
    %145 = tpu.matmul %142, %144, %cst_143 {dimension_numbers = #tpu.dot_dimension_numbers<[1], [0], [0], [1], [0, 0, 1, 1], [], []>} : vector<128x16xf32>, vector<16x32xf32>, vector<128x32xf32> -> vector<128x32xf32>
    %146 = arith.addf %141, %145 : vector<128x32xf32>
    %c25 = arith.constant 25 : index
    %c0_144 = arith.constant 0 : index
    %147 = tpu.strided_load %arg12[%c25, %c0_144] {strides = array<i32: 2, 1>} : memref<286x16xf32, #tpu.memory_space<vmem>>, vector<128x16xf32>
    %c25_145 = arith.constant 25 : index
    %c0_146 = arith.constant 0 : index
    %c0_147 = arith.constant 0 : index
    %148 = vector.load %arg4[%c25_145, %c0_146, %c0_147] : memref<32x16x32xf32, #tpu.memory_space<vmem>>, vector<1x16x32xf32>
    %149 = vector.shape_cast %148 : vector<1x16x32xf32> to vector<16x32xf32>
    %cst_148 = arith.constant dense<0.000000e+00> : vector<128x32xf32>
    %150 = tpu.matmul %147, %149, %cst_148 {dimension_numbers = #tpu.dot_dimension_numbers<[1], [0], [0], [1], [0, 0, 1, 1], [], []>} : vector<128x16xf32>, vector<16x32xf32>, vector<128x32xf32> -> vector<128x32xf32>
    %151 = arith.addf %146, %150 : vector<128x32xf32>
    %c26 = arith.constant 26 : index
    %c0_149 = arith.constant 0 : index
    %152 = tpu.strided_load %arg12[%c26, %c0_149] {strides = array<i32: 2, 1>} : memref<286x16xf32, #tpu.memory_space<vmem>>, vector<128x16xf32>
    %c26_150 = arith.constant 26 : index
    %c0_151 = arith.constant 0 : index
    %c0_152 = arith.constant 0 : index
    %153 = vector.load %arg4[%c26_150, %c0_151, %c0_152] : memref<32x16x32xf32, #tpu.memory_space<vmem>>, vector<1x16x32xf32>
    %154 = vector.shape_cast %153 : vector<1x16x32xf32> to vector<16x32xf32>
    %cst_153 = arith.constant dense<0.000000e+00> : vector<128x32xf32>
    %155 = tpu.matmul %152, %154, %cst_153 {dimension_numbers = #tpu.dot_dimension_numbers<[1], [0], [0], [1], [0, 0, 1, 1], [], []>} : vector<128x16xf32>, vector<16x32xf32>, vector<128x32xf32> -> vector<128x32xf32>
    %156 = arith.addf %151, %155 : vector<128x32xf32>
    %c27 = arith.constant 27 : index
    %c0_154 = arith.constant 0 : index
    %157 = tpu.strided_load %arg12[%c27, %c0_154] {strides = array<i32: 2, 1>} : memref<286x16xf32, #tpu.memory_space<vmem>>, vector<128x16xf32>
    %c27_155 = arith.constant 27 : index
    %c0_156 = arith.constant 0 : index
    %c0_157 = arith.constant 0 : index
    %158 = vector.load %arg4[%c27_155, %c0_156, %c0_157] : memref<32x16x32xf32, #tpu.memory_space<vmem>>, vector<1x16x32xf32>
    %159 = vector.shape_cast %158 : vector<1x16x32xf32> to vector<16x32xf32>
    %cst_158 = arith.constant dense<0.000000e+00> : vector<128x32xf32>
    %160 = tpu.matmul %157, %159, %cst_158 {dimension_numbers = #tpu.dot_dimension_numbers<[1], [0], [0], [1], [0, 0, 1, 1], [], []>} : vector<128x16xf32>, vector<16x32xf32>, vector<128x32xf32> -> vector<128x32xf32>
    %161 = arith.addf %156, %160 : vector<128x32xf32>
    %c28 = arith.constant 28 : index
    %c0_159 = arith.constant 0 : index
    %162 = tpu.strided_load %arg12[%c28, %c0_159] {strides = array<i32: 2, 1>} : memref<286x16xf32, #tpu.memory_space<vmem>>, vector<128x16xf32>
    %c28_160 = arith.constant 28 : index
    %c0_161 = arith.constant 0 : index
    %c0_162 = arith.constant 0 : index
    %163 = vector.load %arg4[%c28_160, %c0_161, %c0_162] : memref<32x16x32xf32, #tpu.memory_space<vmem>>, vector<1x16x32xf32>
    %164 = vector.shape_cast %163 : vector<1x16x32xf32> to vector<16x32xf32>
    %cst_163 = arith.constant dense<0.000000e+00> : vector<128x32xf32>
    %165 = tpu.matmul %162, %164, %cst_163 {dimension_numbers = #tpu.dot_dimension_numbers<[1], [0], [0], [1], [0, 0, 1, 1], [], []>} : vector<128x16xf32>, vector<16x32xf32>, vector<128x32xf32> -> vector<128x32xf32>
    %166 = arith.addf %161, %165 : vector<128x32xf32>
    %c29 = arith.constant 29 : index
    %c0_164 = arith.constant 0 : index
    %167 = tpu.strided_load %arg12[%c29, %c0_164] {strides = array<i32: 2, 1>} : memref<286x16xf32, #tpu.memory_space<vmem>>, vector<128x16xf32>
    %c29_165 = arith.constant 29 : index
    %c0_166 = arith.constant 0 : index
    %c0_167 = arith.constant 0 : index
    %168 = vector.load %arg4[%c29_165, %c0_166, %c0_167] : memref<32x16x32xf32, #tpu.memory_space<vmem>>, vector<1x16x32xf32>
    %169 = vector.shape_cast %168 : vector<1x16x32xf32> to vector<16x32xf32>
    %cst_168 = arith.constant dense<0.000000e+00> : vector<128x32xf32>
    %170 = tpu.matmul %167, %169, %cst_168 {dimension_numbers = #tpu.dot_dimension_numbers<[1], [0], [0], [1], [0, 0, 1, 1], [], []>} : vector<128x16xf32>, vector<16x32xf32>, vector<128x32xf32> -> vector<128x32xf32>
    %171 = arith.addf %166, %170 : vector<128x32xf32>
    %c30 = arith.constant 30 : index
    %c0_169 = arith.constant 0 : index
    %172 = tpu.strided_load %arg12[%c30, %c0_169] {strides = array<i32: 2, 1>} : memref<286x16xf32, #tpu.memory_space<vmem>>, vector<128x16xf32>
    %c30_170 = arith.constant 30 : index
    %c0_171 = arith.constant 0 : index
    %c0_172 = arith.constant 0 : index
    %173 = vector.load %arg4[%c30_170, %c0_171, %c0_172] : memref<32x16x32xf32, #tpu.memory_space<vmem>>, vector<1x16x32xf32>
    %174 = vector.shape_cast %173 : vector<1x16x32xf32> to vector<16x32xf32>
    %cst_173 = arith.constant dense<0.000000e+00> : vector<128x32xf32>
    %175 = tpu.matmul %172, %174, %cst_173 {dimension_numbers = #tpu.dot_dimension_numbers<[1], [0], [0], [1], [0, 0, 1, 1], [], []>} : vector<128x16xf32>, vector<16x32xf32>, vector<128x32xf32> -> vector<128x32xf32>
    %176 = arith.addf %171, %175 : vector<128x32xf32>
    %c31 = arith.constant 31 : index
    %c0_174 = arith.constant 0 : index
    %177 = tpu.strided_load %arg12[%c31, %c0_174] {strides = array<i32: 2, 1>} : memref<286x16xf32, #tpu.memory_space<vmem>>, vector<128x16xf32>
    %c31_175 = arith.constant 31 : index
    %c0_176 = arith.constant 0 : index
    %c0_177 = arith.constant 0 : index
    %178 = vector.load %arg4[%c31_175, %c0_176, %c0_177] : memref<32x16x32xf32, #tpu.memory_space<vmem>>, vector<1x16x32xf32>
    %179 = vector.shape_cast %178 : vector<1x16x32xf32> to vector<16x32xf32>
    %cst_178 = arith.constant dense<0.000000e+00> : vector<128x32xf32>
    %180 = tpu.matmul %177, %179, %cst_178 {dimension_numbers = #tpu.dot_dimension_numbers<[1], [0], [0], [1], [0, 0, 1, 1], [], []>} : vector<128x16xf32>, vector<16x32xf32>, vector<128x32xf32> -> vector<128x32xf32>
    %181 = arith.addf %176, %180 : vector<128x32xf32>
    %c0_179 = arith.constant 0 : index
    %c0_180 = arith.constant 0 : index
    %182 = vector.load %arg5[%c0_179, %c0_180] : memref<3x32xf32, #tpu.memory_space<vmem>>, vector<3x32xf32>
    %183 = vector.extract_strided_slice %182 {offsets = [0, 0], sizes = [1, 32], strides = [1, 1]} : vector<3x32xf32> to vector<1x32xf32>
    %184 = vector.broadcast %183 : vector<1x32xf32> to vector<128x32xf32>
    %185 = arith.addf %181, %184 : vector<128x32xf32>
    %cst_181 = arith.constant 0.000000e+00 : f32
    %186 = vector.broadcast %cst_181 : f32 to vector<128x32xf32>
    %187 = arith.maximumf %185, %186 : vector<128x32xf32>
    %188 = vector.extract_strided_slice %182 {offsets = [1, 0], sizes = [1, 32], strides = [1, 1]} : vector<3x32xf32> to vector<1x32xf32>
    %189 = vector.broadcast %188 : vector<1x32xf32> to vector<128x32xf32>
    %190 = arith.mulf %187, %189 : vector<128x32xf32>
    %191 = vector.extract_strided_slice %182 {offsets = [2, 0], sizes = [1, 32], strides = [1, 1]} : vector<3x32xf32> to vector<1x32xf32>
    %192 = vector.broadcast %191 : vector<1x32xf32> to vector<128x32xf32>
    %193 = arith.addf %190, %192 : vector<128x32xf32>
    %c0_182 = arith.constant 0 : index
    %c0_183 = arith.constant 0 : index
    %194 = vector.load %arg13[%c0_182, %c0_183] : memref<128x32xf32, #tpu.memory_space<vmem>>, vector<128x32xf32>
    tpu.vector_store %arg13[%c0_182, %c0_183], %193 {strides = array<i32>} : memref<128x32xf32, #tpu.memory_space<vmem>>, vector<128x32xf32>,
    %cst_184 = arith.constant 0.000000e+00 : f32
    %195 = vector.broadcast %cst_184 : f32 to vector<78x32xf32>
    %c0_185 = arith.constant 0 : index
    %c0_186 = arith.constant 0 : index
    %196 = vector.load %arg14[%c0_185, %c0_186] : memref<78x32xf32, #tpu.memory_space<vmem>>, vector<78x32xf32>
    tpu.vector_store %arg14[%c0_185, %c0_186], %195 {strides = array<i32>} : memref<78x32xf32, #tpu.memory_space<vmem>>, vector<78x32xf32>,
    %c0_187 = arith.constant 0 : index
    %c0_188 = arith.constant 0 : index
    %197 = tpu.strided_load %arg13[%c0_187, %c0_188] {strides = array<i32: 2, 1>} : memref<128x32xf32, #tpu.memory_space<vmem>>, vector<64x32xf32>
    %c1_189 = arith.constant 1 : index
    %c0_190 = arith.constant 0 : index
    %198 = tpu.strided_load %arg13[%c1_189, %c0_190] {strides = array<i32: 2, 1>} : memref<128x32xf32, #tpu.memory_space<vmem>>, vector<64x32xf32>
    %199 = arith.maximumf %197, %198 : vector<64x32xf32>
    %c7_191 = arith.constant 7 : index
    %c0_192 = arith.constant 0 : index
    %200 = vector.load %arg14[%c7_191, %c0_192] : memref<78x32xf32, #tpu.memory_space<vmem>>, vector<64x32xf32>
    tpu.vector_store %arg14[%c7_191, %c0_192], %199 {strides = array<i32>} : memref<78x32xf32, #tpu.memory_space<vmem>>, vector<64x32xf32>,
    %c0_193 = arith.constant 0 : index
    %c0_194 = arith.constant 0 : index
    %201 = tpu.strided_load %arg14[%c0_193, %c0_194] {strides = array<i32: 2, 1>} : memref<78x32xf32, #tpu.memory_space<vmem>>, vector<32x32xf32>
    %c0_195 = arith.constant 0 : index
    %c0_196 = arith.constant 0 : index
    %c0_197 = arith.constant 0 : index
    %202 = vector.load %arg6[%c0_195, %c0_196, %c0_197] : memref<16x32x64xf32, #tpu.memory_space<vmem>>, vector<1x32x64xf32>
    %203 = vector.shape_cast %202 : vector<1x32x64xf32> to vector<32x64xf32>
    %cst_198 = arith.constant dense<0.000000e+00> : vector<32x64xf32>
    %204 = tpu.matmul %201, %203, %cst_198 {dimension_numbers = #tpu.dot_dimension_numbers<[1], [0], [0], [1], [0, 0, 1, 1], [], []>} : vector<32x32xf32>, vector<32x64xf32>, vector<32x64xf32> -> vector<32x64xf32>
    %c1_199 = arith.constant 1 : index
    %c0_200 = arith.constant 0 : index
    %205 = tpu.strided_load %arg14[%c1_199, %c0_200] {strides = array<i32: 2, 1>} : memref<78x32xf32, #tpu.memory_space<vmem>>, vector<32x32xf32>
    %c1_201 = arith.constant 1 : index
    %c0_202 = arith.constant 0 : index
    %c0_203 = arith.constant 0 : index
    %206 = vector.load %arg6[%c1_201, %c0_202, %c0_203] : memref<16x32x64xf32, #tpu.memory_space<vmem>>, vector<1x32x64xf32>
    %207 = vector.shape_cast %206 : vector<1x32x64xf32> to vector<32x64xf32>
    %cst_204 = arith.constant dense<0.000000e+00> : vector<32x64xf32>
    %208 = tpu.matmul %205, %207, %cst_204 {dimension_numbers = #tpu.dot_dimension_numbers<[1], [0], [0], [1], [0, 0, 1, 1], [], []>} : vector<32x32xf32>, vector<32x64xf32>, vector<32x64xf32> -> vector<32x64xf32>
    %209 = arith.addf %204, %208 : vector<32x64xf32>
    %c2_205 = arith.constant 2 : index
    %c0_206 = arith.constant 0 : index
    %210 = tpu.strided_load %arg14[%c2_205, %c0_206] {strides = array<i32: 2, 1>} : memref<78x32xf32, #tpu.memory_space<vmem>>, vector<32x32xf32>
    %c2_207 = arith.constant 2 : index
    %c0_208 = arith.constant 0 : index
    %c0_209 = arith.constant 0 : index
    %211 = vector.load %arg6[%c2_207, %c0_208, %c0_209] : memref<16x32x64xf32, #tpu.memory_space<vmem>>, vector<1x32x64xf32>
    %212 = vector.shape_cast %211 : vector<1x32x64xf32> to vector<32x64xf32>
    %cst_210 = arith.constant dense<0.000000e+00> : vector<32x64xf32>
    %213 = tpu.matmul %210, %212, %cst_210 {dimension_numbers = #tpu.dot_dimension_numbers<[1], [0], [0], [1], [0, 0, 1, 1], [], []>} : vector<32x32xf32>, vector<32x64xf32>, vector<32x64xf32> -> vector<32x64xf32>
    %214 = arith.addf %209, %213 : vector<32x64xf32>
    %c3_211 = arith.constant 3 : index
    %c0_212 = arith.constant 0 : index
    %215 = tpu.strided_load %arg14[%c3_211, %c0_212] {strides = array<i32: 2, 1>} : memref<78x32xf32, #tpu.memory_space<vmem>>, vector<32x32xf32>
    %c3_213 = arith.constant 3 : index
    %c0_214 = arith.constant 0 : index
    %c0_215 = arith.constant 0 : index
    %216 = vector.load %arg6[%c3_213, %c0_214, %c0_215] : memref<16x32x64xf32, #tpu.memory_space<vmem>>, vector<1x32x64xf32>
    %217 = vector.shape_cast %216 : vector<1x32x64xf32> to vector<32x64xf32>
    %cst_216 = arith.constant dense<0.000000e+00> : vector<32x64xf32>
    %218 = tpu.matmul %215, %217, %cst_216 {dimension_numbers = #tpu.dot_dimension_numbers<[1], [0], [0], [1], [0, 0, 1, 1], [], []>} : vector<32x32xf32>, vector<32x64xf32>, vector<32x64xf32> -> vector<32x64xf32>
    %219 = arith.addf %214, %218 : vector<32x64xf32>
    %c4_217 = arith.constant 4 : index
    %c0_218 = arith.constant 0 : index
    %220 = tpu.strided_load %arg14[%c4_217, %c0_218] {strides = array<i32: 2, 1>} : memref<78x32xf32, #tpu.memory_space<vmem>>, vector<32x32xf32>
    %c4_219 = arith.constant 4 : index
    %c0_220 = arith.constant 0 : index
    %c0_221 = arith.constant 0 : index
    %221 = vector.load %arg6[%c4_219, %c0_220, %c0_221] : memref<16x32x64xf32, #tpu.memory_space<vmem>>, vector<1x32x64xf32>
    %222 = vector.shape_cast %221 : vector<1x32x64xf32> to vector<32x64xf32>
    %cst_222 = arith.constant dense<0.000000e+00> : vector<32x64xf32>
    %223 = tpu.matmul %220, %222, %cst_222 {dimension_numbers = #tpu.dot_dimension_numbers<[1], [0], [0], [1], [0, 0, 1, 1], [], []>} : vector<32x32xf32>, vector<32x64xf32>, vector<32x64xf32> -> vector<32x64xf32>
    %224 = arith.addf %219, %223 : vector<32x64xf32>
    %c5_223 = arith.constant 5 : index
    %c0_224 = arith.constant 0 : index
    %225 = tpu.strided_load %arg14[%c5_223, %c0_224] {strides = array<i32: 2, 1>} : memref<78x32xf32, #tpu.memory_space<vmem>>, vector<32x32xf32>
    %c5_225 = arith.constant 5 : index
    %c0_226 = arith.constant 0 : index
    %c0_227 = arith.constant 0 : index
    %226 = vector.load %arg6[%c5_225, %c0_226, %c0_227] : memref<16x32x64xf32, #tpu.memory_space<vmem>>, vector<1x32x64xf32>
    %227 = vector.shape_cast %226 : vector<1x32x64xf32> to vector<32x64xf32>
    %cst_228 = arith.constant dense<0.000000e+00> : vector<32x64xf32>
    %228 = tpu.matmul %225, %227, %cst_228 {dimension_numbers = #tpu.dot_dimension_numbers<[1], [0], [0], [1], [0, 0, 1, 1], [], []>} : vector<32x32xf32>, vector<32x64xf32>, vector<32x64xf32> -> vector<32x64xf32>
    %229 = arith.addf %224, %228 : vector<32x64xf32>
    %c6_229 = arith.constant 6 : index
    %c0_230 = arith.constant 0 : index
    %230 = tpu.strided_load %arg14[%c6_229, %c0_230] {strides = array<i32: 2, 1>} : memref<78x32xf32, #tpu.memory_space<vmem>>, vector<32x32xf32>
    %c6_231 = arith.constant 6 : index
    %c0_232 = arith.constant 0 : index
    %c0_233 = arith.constant 0 : index
    %231 = vector.load %arg6[%c6_231, %c0_232, %c0_233] : memref<16x32x64xf32, #tpu.memory_space<vmem>>, vector<1x32x64xf32>
    %232 = vector.shape_cast %231 : vector<1x32x64xf32> to vector<32x64xf32>
    %cst_234 = arith.constant dense<0.000000e+00> : vector<32x64xf32>
    %233 = tpu.matmul %230, %232, %cst_234 {dimension_numbers = #tpu.dot_dimension_numbers<[1], [0], [0], [1], [0, 0, 1, 1], [], []>} : vector<32x32xf32>, vector<32x64xf32>, vector<32x64xf32> -> vector<32x64xf32>
    %234 = arith.addf %229, %233 : vector<32x64xf32>
    %c7_235 = arith.constant 7 : index
    %c0_236 = arith.constant 0 : index
    %235 = tpu.strided_load %arg14[%c7_235, %c0_236] {strides = array<i32: 2, 1>} : memref<78x32xf32, #tpu.memory_space<vmem>>, vector<32x32xf32>
    %c7_237 = arith.constant 7 : index
    %c0_238 = arith.constant 0 : index
    %c0_239 = arith.constant 0 : index
    %236 = vector.load %arg6[%c7_237, %c0_238, %c0_239] : memref<16x32x64xf32, #tpu.memory_space<vmem>>, vector<1x32x64xf32>
    %237 = vector.shape_cast %236 : vector<1x32x64xf32> to vector<32x64xf32>
    %cst_240 = arith.constant dense<0.000000e+00> : vector<32x64xf32>
    %238 = tpu.matmul %235, %237, %cst_240 {dimension_numbers = #tpu.dot_dimension_numbers<[1], [0], [0], [1], [0, 0, 1, 1], [], []>} : vector<32x32xf32>, vector<32x64xf32>, vector<32x64xf32> -> vector<32x64xf32>
    %239 = arith.addf %234, %238 : vector<32x64xf32>
    %c8_241 = arith.constant 8 : index
    %c0_242 = arith.constant 0 : index
    %240 = tpu.strided_load %arg14[%c8_241, %c0_242] {strides = array<i32: 2, 1>} : memref<78x32xf32, #tpu.memory_space<vmem>>, vector<32x32xf32>
    %c8_243 = arith.constant 8 : index
    %c0_244 = arith.constant 0 : index
    %c0_245 = arith.constant 0 : index
    %241 = vector.load %arg6[%c8_243, %c0_244, %c0_245] : memref<16x32x64xf32, #tpu.memory_space<vmem>>, vector<1x32x64xf32>
    %242 = vector.shape_cast %241 : vector<1x32x64xf32> to vector<32x64xf32>
    %cst_246 = arith.constant dense<0.000000e+00> : vector<32x64xf32>
    %243 = tpu.matmul %240, %242, %cst_246 {dimension_numbers = #tpu.dot_dimension_numbers<[1], [0], [0], [1], [0, 0, 1, 1], [], []>} : vector<32x32xf32>, vector<32x64xf32>, vector<32x64xf32> -> vector<32x64xf32>
    %244 = arith.addf %239, %243 : vector<32x64xf32>
    %c9_247 = arith.constant 9 : index
    %c0_248 = arith.constant 0 : index
    %245 = tpu.strided_load %arg14[%c9_247, %c0_248] {strides = array<i32: 2, 1>} : memref<78x32xf32, #tpu.memory_space<vmem>>, vector<32x32xf32>
    %c9_249 = arith.constant 9 : index
    %c0_250 = arith.constant 0 : index
    %c0_251 = arith.constant 0 : index
    %246 = vector.load %arg6[%c9_249, %c0_250, %c0_251] : memref<16x32x64xf32, #tpu.memory_space<vmem>>, vector<1x32x64xf32>
    %247 = vector.shape_cast %246 : vector<1x32x64xf32> to vector<32x64xf32>
    %cst_252 = arith.constant dense<0.000000e+00> : vector<32x64xf32>
    %248 = tpu.matmul %245, %247, %cst_252 {dimension_numbers = #tpu.dot_dimension_numbers<[1], [0], [0], [1], [0, 0, 1, 1], [], []>} : vector<32x32xf32>, vector<32x64xf32>, vector<32x64xf32> -> vector<32x64xf32>
    %249 = arith.addf %244, %248 : vector<32x64xf32>
    %c10_253 = arith.constant 10 : index
    %c0_254 = arith.constant 0 : index
    %250 = tpu.strided_load %arg14[%c10_253, %c0_254] {strides = array<i32: 2, 1>} : memref<78x32xf32, #tpu.memory_space<vmem>>, vector<32x32xf32>
    %c10_255 = arith.constant 10 : index
    %c0_256 = arith.constant 0 : index
    %c0_257 = arith.constant 0 : index
    %251 = vector.load %arg6[%c10_255, %c0_256, %c0_257] : memref<16x32x64xf32, #tpu.memory_space<vmem>>, vector<1x32x64xf32>
    %252 = vector.shape_cast %251 : vector<1x32x64xf32> to vector<32x64xf32>
    %cst_258 = arith.constant dense<0.000000e+00> : vector<32x64xf32>
    %253 = tpu.matmul %250, %252, %cst_258 {dimension_numbers = #tpu.dot_dimension_numbers<[1], [0], [0], [1], [0, 0, 1, 1], [], []>} : vector<32x32xf32>, vector<32x64xf32>, vector<32x64xf32> -> vector<32x64xf32>
    %254 = arith.addf %249, %253 : vector<32x64xf32>
    %c11_259 = arith.constant 11 : index
    %c0_260 = arith.constant 0 : index
    %255 = tpu.strided_load %arg14[%c11_259, %c0_260] {strides = array<i32: 2, 1>} : memref<78x32xf32, #tpu.memory_space<vmem>>, vector<32x32xf32>
    %c11_261 = arith.constant 11 : index
    %c0_262 = arith.constant 0 : index
    %c0_263 = arith.constant 0 : index
    %256 = vector.load %arg6[%c11_261, %c0_262, %c0_263] : memref<16x32x64xf32, #tpu.memory_space<vmem>>, vector<1x32x64xf32>
    %257 = vector.shape_cast %256 : vector<1x32x64xf32> to vector<32x64xf32>
    %cst_264 = arith.constant dense<0.000000e+00> : vector<32x64xf32>
    %258 = tpu.matmul %255, %257, %cst_264 {dimension_numbers = #tpu.dot_dimension_numbers<[1], [0], [0], [1], [0, 0, 1, 1], [], []>} : vector<32x32xf32>, vector<32x64xf32>, vector<32x64xf32> -> vector<32x64xf32>
    %259 = arith.addf %254, %258 : vector<32x64xf32>
    %c12_265 = arith.constant 12 : index
    %c0_266 = arith.constant 0 : index
    %260 = tpu.strided_load %arg14[%c12_265, %c0_266] {strides = array<i32: 2, 1>} : memref<78x32xf32, #tpu.memory_space<vmem>>, vector<32x32xf32>
    %c12_267 = arith.constant 12 : index
    %c0_268 = arith.constant 0 : index
    %c0_269 = arith.constant 0 : index
    %261 = vector.load %arg6[%c12_267, %c0_268, %c0_269] : memref<16x32x64xf32, #tpu.memory_space<vmem>>, vector<1x32x64xf32>
    %262 = vector.shape_cast %261 : vector<1x32x64xf32> to vector<32x64xf32>
    %cst_270 = arith.constant dense<0.000000e+00> : vector<32x64xf32>
    %263 = tpu.matmul %260, %262, %cst_270 {dimension_numbers = #tpu.dot_dimension_numbers<[1], [0], [0], [1], [0, 0, 1, 1], [], []>} : vector<32x32xf32>, vector<32x64xf32>, vector<32x64xf32> -> vector<32x64xf32>
    %264 = arith.addf %259, %263 : vector<32x64xf32>
    %c13_271 = arith.constant 13 : index
    %c0_272 = arith.constant 0 : index
    %265 = tpu.strided_load %arg14[%c13_271, %c0_272] {strides = array<i32: 2, 1>} : memref<78x32xf32, #tpu.memory_space<vmem>>, vector<32x32xf32>
    %c13_273 = arith.constant 13 : index
    %c0_274 = arith.constant 0 : index
    %c0_275 = arith.constant 0 : index
    %266 = vector.load %arg6[%c13_273, %c0_274, %c0_275] : memref<16x32x64xf32, #tpu.memory_space<vmem>>, vector<1x32x64xf32>
    %267 = vector.shape_cast %266 : vector<1x32x64xf32> to vector<32x64xf32>
    %cst_276 = arith.constant dense<0.000000e+00> : vector<32x64xf32>
    %268 = tpu.matmul %265, %267, %cst_276 {dimension_numbers = #tpu.dot_dimension_numbers<[1], [0], [0], [1], [0, 0, 1, 1], [], []>} : vector<32x32xf32>, vector<32x64xf32>, vector<32x64xf32> -> vector<32x64xf32>
    %269 = arith.addf %264, %268 : vector<32x64xf32>
    %c14_277 = arith.constant 14 : index
    %c0_278 = arith.constant 0 : index
    %270 = tpu.strided_load %arg14[%c14_277, %c0_278] {strides = array<i32: 2, 1>} : memref<78x32xf32, #tpu.memory_space<vmem>>, vector<32x32xf32>
    %c14_279 = arith.constant 14 : index
    %c0_280 = arith.constant 0 : index
    %c0_281 = arith.constant 0 : index
    %271 = vector.load %arg6[%c14_279, %c0_280, %c0_281] : memref<16x32x64xf32, #tpu.memory_space<vmem>>, vector<1x32x64xf32>
    %272 = vector.shape_cast %271 : vector<1x32x64xf32> to vector<32x64xf32>
    %cst_282 = arith.constant dense<0.000000e+00> : vector<32x64xf32>
    %273 = tpu.matmul %270, %272, %cst_282 {dimension_numbers = #tpu.dot_dimension_numbers<[1], [0], [0], [1], [0, 0, 1, 1], [], []>} : vector<32x32xf32>, vector<32x64xf32>, vector<32x64xf32> -> vector<32x64xf32>
    %274 = arith.addf %269, %273 : vector<32x64xf32>
    %c15_283 = arith.constant 15 : index
    %c0_284 = arith.constant 0 : index
    %275 = tpu.strided_load %arg14[%c15_283, %c0_284] {strides = array<i32: 2, 1>} : memref<78x32xf32, #tpu.memory_space<vmem>>, vector<32x32xf32>
    %c15_285 = arith.constant 15 : index
    %c0_286 = arith.constant 0 : index
    %c0_287 = arith.constant 0 : index
    %276 = vector.load %arg6[%c15_285, %c0_286, %c0_287] : memref<16x32x64xf32, #tpu.memory_space<vmem>>, vector<1x32x64xf32>
    %277 = vector.shape_cast %276 : vector<1x32x64xf32> to vector<32x64xf32>
    %cst_288 = arith.constant dense<0.000000e+00> : vector<32x64xf32>
    %278 = tpu.matmul %275, %277, %cst_288 {dimension_numbers = #tpu.dot_dimension_numbers<[1], [0], [0], [1], [0, 0, 1, 1], [], []>} : vector<32x32xf32>, vector<32x64xf32>, vector<32x64xf32> -> vector<32x64xf32>
    %279 = arith.addf %274, %278 : vector<32x64xf32>
    %c0_289 = arith.constant 0 : index
    %c0_290 = arith.constant 0 : index
    %280 = vector.load %arg7[%c0_289, %c0_290] : memref<3x64xf32, #tpu.memory_space<vmem>>, vector<3x64xf32>
    %281 = vector.extract_strided_slice %280 {offsets = [0, 0], sizes = [1, 64], strides = [1, 1]} : vector<3x64xf32> to vector<1x64xf32>
    %282 = vector.broadcast %281 : vector<1x64xf32> to vector<32x64xf32>
    %283 = arith.addf %279, %282 : vector<32x64xf32>
    %cst_291 = arith.constant 0.000000e+00 : f32
    %284 = vector.broadcast %cst_291 : f32 to vector<32x64xf32>
    %285 = arith.maximumf %283, %284 : vector<32x64xf32>
    %286 = vector.extract_strided_slice %280 {offsets = [1, 0], sizes = [1, 64], strides = [1, 1]} : vector<3x64xf32> to vector<1x64xf32>
    %287 = vector.broadcast %286 : vector<1x64xf32> to vector<32x64xf32>
    %288 = arith.mulf %285, %287 : vector<32x64xf32>
    %289 = vector.extract_strided_slice %280 {offsets = [2, 0], sizes = [1, 64], strides = [1, 1]} : vector<3x64xf32> to vector<1x64xf32>
    %290 = vector.broadcast %289 : vector<1x64xf32> to vector<32x64xf32>
    %291 = arith.addf %288, %290 : vector<32x64xf32>
    %cst_292 = arith.constant dense<0.000000e+00> : vector<64xf32>
    %292 = vector.multi_reduction <add>, %291, %cst_292 [0] : vector<32x64xf32> to vector<64xf32>
    %293 = vector.shape_cast %292 : vector<64xf32> to vector<1x64xf32>
    %cst_293 = arith.constant 3.200000e+01 : f32
    %294 = vector.broadcast %cst_293 : f32 to vector<1x64xf32>
    %295 = arith.divf %293, %294 : vector<1x64xf32>
    %c0_294 = arith.constant 0 : index
    %c0_295 = arith.constant 0 : index
    %296 = vector.load %arg8[%c0_294, %c0_295] : memref<64x512xf32, #tpu.memory_space<vmem>>, vector<64x512xf32>
    %cst_296 = arith.constant dense<0.000000e+00> : vector<1x512xf32>
    %297 = tpu.matmul %295, %296, %cst_296 {dimension_numbers = #tpu.dot_dimension_numbers<[1], [0], [0], [1], [0, 0, 1, 1], [], []>} : vector<1x64xf32>, vector<64x512xf32>, vector<1x512xf32> -> vector<1x512xf32>
    %c0_297 = arith.constant 0 : index
    %c0_298 = arith.constant 0 : index
    %298 = vector.load %arg9[%c0_297, %c0_298] : memref<1x512xf32, #tpu.memory_space<vmem>>, vector<1x512xf32>
    %299 = arith.addf %297, %298 : vector<1x512xf32>
    %c0_299 = arith.constant 0 : index
    %c0_300 = arith.constant 0 : index
    %c0_301 = arith.constant 0 : index
    %300 = vector.load %arg10[%c0_299, %c0_300, %c0_301] : memref<1x1x512xf32, #tpu.memory_space<vmem>>, vector<1x1x512xf32>
    %301 = vector.shape_cast %300 : vector<1x1x512xf32> to vector<1x512xf32>
    %302 = vector.shape_cast %299 : vector<1x512xf32> to vector<1x1x512xf32>
    tpu.vector_store %arg10[%c0_299, %c0_300, %c0_301], %302 {strides = array<i32>} : memref<1x1x512xf32, #tpu.memory_space<vmem>>, vector<1x1x512xf32>,
    return
  }
  func.func @transform_0(%arg0: i32) -> (i32, i32, i32) {
    %c0_i32 = arith.constant 0 : i32
    %c0_i32_0 = arith.constant 0 : i32
    %c0_i32_1 = arith.constant 0 : i32
    return %arg0, %c0_i32, %c0_i32_0 : i32, i32, i32
  }
  func.func @transform_1(%arg0: i32) -> (i32, i32) {
    %c0_i32 = arith.constant 0 : i32
    %c0_i32_0 = arith.constant 0 : i32
    %c0_i32_1 = arith.constant 0 : i32
    return %c0_i32, %c0_i32_0 : i32, i32
  }
  func.func @transform_2(%arg0: i32) -> (i32, i32) {
    %c0_i32 = arith.constant 0 : i32
    %c0_i32_0 = arith.constant 0 : i32
    %c0_i32_1 = arith.constant 0 : i32
    return %c0_i32, %c0_i32_0 : i32, i32
  }
  func.func @transform_3(%arg0: i32) -> (i32, i32, i32) {
    %c0_i32 = arith.constant 0 : i32
    %c0_i32_0 = arith.constant 0 : i32
    %c0_i32_1 = arith.constant 0 : i32
    %c0_i32_2 = arith.constant 0 : i32
    return %c0_i32, %c0_i32_0, %c0_i32_1 : i32, i32, i32
  }
  func.func @transform_4(%arg0: i32) -> (i32, i32) {
    %c0_i32 = arith.constant 0 : i32
    %c0_i32_0 = arith.constant 0 : i32
    %c0_i32_1 = arith.constant 0 : i32
    return %c0_i32, %c0_i32_0 : i32, i32
  }
  func.func @transform_5(%arg0: i32) -> (i32, i32, i32) {
    %c0_i32 = arith.constant 0 : i32
    %c0_i32_0 = arith.constant 0 : i32
    %c0_i32_1 = arith.constant 0 : i32
    %c0_i32_2 = arith.constant 0 : i32
    return %c0_i32, %c0_i32_0, %c0_i32_1 : i32, i32, i32
  }
  func.func @transform_6(%arg0: i32) -> (i32, i32) {
    %c0_i32 = arith.constant 0 : i32
    %c0_i32_0 = arith.constant 0 : i32
    %c0_i32_1 = arith.constant 0 : i32
    return %c0_i32, %c0_i32_0 : i32, i32
  }
  func.func @transform_7(%arg0: i32) -> (i32, i32) {
    %c0_i32 = arith.constant 0 : i32
    %c0_i32_0 = arith.constant 0 : i32
    %c0_i32_1 = arith.constant 0 : i32
    return %c0_i32, %c0_i32_0 : i32, i32
  }
  func.func @transform_8(%arg0: i32) -> (i32, i32) {
    %c0_i32 = arith.constant 0 : i32
    %c0_i32_0 = arith.constant 0 : i32
    %c0_i32_1 = arith.constant 0 : i32
    return %c0_i32, %c0_i32_0 : i32, i32
  }
  func.func @transform_9(%arg0: i32) -> (i32, i32, i32) {
    %c0_i32 = arith.constant 0 : i32
    %c0_i32_0 = arith.constant 0 : i32
    %c0_i32_1 = arith.constant 0 : i32
    return %arg0, %c0_i32, %c0_i32_0 : i32, i32, i32
  }
}

</mosaic_0001>

<bundles_post_ra>
// kernel: vibration_encoder.1
= control target key start
LH: loop header
LB: loop body
LE: loop exit
PB: predicated region body
PF: predicated region fallthrough
CT: control target
= control target key end

     0   :  { %s15024_s30 = smov 0   ;;  %s16910_s0 = inlined_call_operand.vmem [shape: f32[2,512,64], index: 0, kind: input, shape index: {}]   ;;  %s16911_s1 = inlined_call_operand.vmem [shape: f32[64,16], index: 1, kind: input, shape index: {}]   ;;  %s16912_s2 = inlined_call_operand.vmem [shape: f32[3,16], index: 2, kind: input, shape index: {}]   ;;  %s16913_s3 = inlined_call_operand.vmem [shape: f32[32,16,32], index: 3, kind: input, shape index: {}]   ;;  %s16914_s4 = inlined_call_operand.vmem [shape: f32[3,32], index: 4, kind: input, shape index: {}]   ;;  %s16915_s5 = inlined_call_operand.vmem [shape: f32[16,32,64], index: 5, kind: input, shape index: {}]   ;;  %s16916_s6 = inlined_call_operand.vmem [shape: f32[3,64], index: 6, kind: input, shape index: {}]   ;;  %s16917_s7 = inlined_call_operand.vmem [shape: f32[64,512], index: 7, kind: input, shape index: {}]   ;;  %s16918_s8 = inlined_call_operand.vmem [shape: f32[1,512], index: 8, kind: input, shape index: {}]   ;;  %s16919_s9 = inlined_call_operand.vmem [shape: f32[2,1,512], index: 9, kind: output, shape index: {}]  }
   0x1 LB: > { %s11309_s10 = sadd.s32 4294967295, %s14970_s30   ;;  %p11313_p0 = scmp.ge.s32.totalorder %s14970_s30, 1  ;;  %s14970_s30 = sphi %s15024_s30, %s19_s30  }
   0x2   : > { %p287_p1 = scmp.lt.s32.totalorder %s14970_s30, 3 }
   0x4   : > { %p288_p2 = pnand %p11313_p0, %p287_p1 }
   0x5   : > { %v395_v0 = vld [vmem:[%s16911_s1] sm:$0xff] (!%p288_p2)  ;;  %v396_v1 = vld [vmem:[%s16911_s1 + $0x8] sm:$0xff] (!%p288_p2)  ;;  %v397_v2 = vld [vmem:[%s16911_s1 + $0x10] sm:$0xff] (!%p288_p2)  ;;  %p322_p3 = scmp.lt.s32.totalorder (!%p288_p2), %s11309_s10, 1  ;;  %vm408_vm0 = vcmask (!%p288_p2), 523264   ;;  %vm1186_vm1 = vcmask (!%p288_p2), 130048  }
   0x6   : > { %291 = sbr.rel (%p288_p2) target bundleno = 1868 (0x74c), region = 56  ;;  %v14092_v3 = vpack.c.bf16 (!%p288_p2), %v396_v1, %v395_v0  ;;  %v398_v4 = vld [vmem:[%s16911_s1 + $0x18] sm:$0xff] (!%p288_p2)  ;;  %v399_v6 = vld [vmem:[%s16911_s1 + $0x20] sm:$0xff] (!%p288_p2)  ;;  %v400_v7 = vld [vmem:[%s16911_s1 + $0x28] sm:$0xff] (!%p288_p2)  ;;  %vm1286_vm2 = vcmask (!%p288_p2), 128000   ;;  %vm9090_vm3 = vcmask (!%p288_p2), 261120  }
   0x7   : > { %v14096_v5 = vpack.c.bf16 (!%p288_p2), %v398_v4, %v397_v2  ;;  %v14100_v8 = vpack.c.bf16 (!%p288_p2), %v400_v7, %v399_v6  ;;  %v401_v9 = vld [vmem:[%s16911_s1 + $0x30] sm:$0xff] (!%p288_p2)  ;;  %v402_v10 = vld [vmem:[%s16911_s1 + $0x38] sm:$0xff] (!%p288_p2)  ;;  %vm9116_vm4 = vcmask (!%p288_p2), 259072  }
   0x8   : > { %14093 = vmatprep.subr.bf16.mxu0 (!%p288_p2), %v14092_v3  ;;  %v14104_v12 = vpack.c.bf16 (!%p288_p2), %v402_v10, %v401_v9  ;;  %v11382_v9 = vld [vmem:[%s16913_s3 + $0x18] sm:$0xff] (!%p288_p2) }
   0x9   : > { %14095 = vmatpush3.bf16.msra.mxu0 (!%p288_p2), %v14092_v3  ;;  %v14972_v3 = vmov (!%p288_p2), 0.0  }
   0xa   : > { %14097 = vmatprep.subr.bf16.mxu0 (!%p288_p2), %v14096_v5  ;;  %1251 = vst.msk [vmem:[#allocation3] sm:$0xff] (!%p288_p2), %vm1186_vm1, %v14972_v3  ;;  %1252 = vst.msk [vmem:[#allocation3 + $0x8] sm:$0xff] (!%p288_p2), %vm1186_vm1, %v14972_v3 }
   0xb   : > { %1253 = vst.msk [vmem:[#allocation3 + $0x10] sm:$0xff] (!%p288_p2), %vm1186_vm1, %v14972_v3  ;;  %1254 = vst.msk [vmem:[#allocation3 + $0x18] sm:$0xff] (!%p288_p2), %vm1186_vm1, %v14972_v3 }
   0xc   : > { %1255 = vst.msk [vmem:[#allocation3 + $0x20] sm:$0xff] (!%p288_p2), %vm1186_vm1, %v14972_v3  ;;  %1256 = vst.msk [vmem:[#allocation3 + $0x28] sm:$0xff] (!%p288_p2), %vm1186_vm1, %v14972_v3 }
   0xd   : > { %s16921_s10 = smov (!%p322_p3, %s11309_s10), 1  ;;  %14099 = vmatpush3.bf16.msra.mxu0 %v14096_v5  ;;  %1257 = vst.msk [vmem:[#allocation3 + $0x30] sm:$0xff] %vm1186_vm1, %v14972_v3  ;;  %1258 = vst.msk [vmem:[#allocation3 + $0x38] sm:$0xff] %vm1186_vm1, %v14972_v3 }
   0xe   : > { %s12083_s23 = sshll.u32 %s16921_s10, 9  ;;  %14101 = vmatprep.subr.bf16.mxu0 %v14100_v8  ;;  %1259 = vst.msk [vmem:[#allocation3 + $0x40] sm:$0xff] %vm1186_vm1, %v14972_v3  ;;  %1260 = vst.msk [vmem:[#allocation3 + $0x48] sm:$0xff] %vm1186_vm1, %v14972_v3  ;;  %s11316_s17 = sshll.u32 %s16921_s10, 2 }
   0xf   : > { %s15056_s26 = scalar_lea.vmem %s16910_s0, %s12083_s23  ;;  %1261 = vst.msk [vmem:[#allocation3 + $0x50] sm:$0xff] %vm1186_vm1, %v14972_v3  ;;  %1262 = vst.msk [vmem:[#allocation3 + $0x58] sm:$0xff] %vm1186_vm1, %v14972_v3  ;;  %s330_s20 = scalar_lea.vmem %s16919_s9, %s11316_s17 }
  0x10   : > { %v331_v11 = vld [vmem:[%s15056_s26] sm:$0xff]  ;;  %v332_v13 = vld [vmem:[%s15056_s26 + $0x8] sm:$0xff]  ;;  %v333_v14 = vld [vmem:[%s15056_s26 + $0x10] sm:$0xff]  ;;  %1263 = vst.msk [vmem:[#allocation3 + $0x60] sm:$0xff] %vm1186_vm1, %v14972_v3 }
  0x11   : > { %12876 = vmatprep.mubr.msk.f32.mxu0 %vm408_vm0, %v331_v11  ;;  %14103 = vmatpush3.bf16.msra.mxu0 %v14100_v8  ;;  %v334_v15 = vld [vmem:[%s15056_s26 + $0x18] sm:$0xff]  ;;  %v335_v16 = vld [vmem:[%s15056_s26 + $0x20] sm:$0xff]  ;;  %v336_v17 = vld [vmem:[%s15056_s26 + $0x28] sm:$0xff]  ;;  %1264 = vst.msk [vmem:[#allocation3 + $0x68] sm:$0xff] %vm1186_vm1, %v14972_v3 }
  0x12   : > { %14105 = vmatprep.subr.bf16.mxu0 %v14104_v12  ;;  %v337_v18 = vld [vmem:[%s15056_s26 + $0x30] sm:$0xff]  ;;  %v338_v19 = vld [vmem:[%s15056_s26 + $0x38] sm:$0xff]  ;;  %v339_v20 = vld [vmem:[%s15056_s26 + $0x40] sm:$0xff]  ;;  %1265 = vst.msk [vmem:[#allocation3 + $0x70] sm:$0xff] %vm1186_vm1, %v14972_v3 }
  0x13   : > { %v340_v21 = vld [vmem:[%s15056_s26 + $0x48] sm:$0xff]  ;;  %v341_v22 = vld [vmem:[%s15056_s26 + $0x50] sm:$0xff]  ;;  %v342_v23 = vld [vmem:[%s15056_s26 + $0x58] sm:$0xff]  ;;  %1266 = vst.msk [vmem:[#allocation3 + $0x78] sm:$0xff] %vm1186_vm1, %v14972_v3 }
  0x14   : > { %v343_v24 = vld [vmem:[%s15056_s26 + $0x60] sm:$0xff]  ;;  %v344_v25 = vld [vmem:[%s15056_s26 + $0x68] sm:$0xff]  ;;  %v345_v26 = vld [vmem:[%s15056_s26 + $0x70] sm:$0xff]  ;;  %1267 = vst.msk [vmem:[#allocation3 + $0x80] sm:$0xff] %vm1186_vm1, %v14972_v3 }
  0x15   : > { %14107 = vmatpush3.bf16.msra.mxu0 %v14104_v12  ;;  %v346_v27 = vld [vmem:[%s15056_s26 + $0x78] sm:$0xff]  ;;  %v347_v28 = vld [vmem:[%s15056_s26 + $0x80] sm:$0xff]  ;;  %v348_v29 = vld [vmem:[%s15056_s26 + $0x88] sm:$0xff]  ;;  %1268 = vst.msk [vmem:[#allocation3 + $0x88] sm:$0xff] %vm1186_vm1, %v14972_v3 }
  0x16   : > { %v349_v30 = vld [vmem:[%s15056_s26 + $0x90] sm:$0xff]  ;;  %v350_v31 = vld [vmem:[%s15056_s26 + $0x98] sm:$0xff]  ;;  %v351_v32 = vld [vmem:[%s15056_s26 + $0xa0] sm:$0xff]  ;;  %1269 = vst.msk [vmem:[#allocation3 + $0x90] sm:$0xff] %vm1186_vm1, %v14972_v3 }
  0x17   : > { %v352_v33 = vld [vmem:[%s15056_s26 + $0xa8] sm:$0xff]  ;;  %v353_v34 = vld [vmem:[%s15056_s26 + $0xb0] sm:$0xff]  ;;  %v354_v35 = vld [vmem:[%s15056_s26 + $0xb8] sm:$0xff]  ;;  %1270 = vst.msk [vmem:[#allocation3 + $0x98] sm:$0xff] %vm1186_vm1, %v14972_v3 }
  0x18   : > { %12877 = vmatmul.mubr.msk.f32.vlgmr.msra.gmra.mrb[0].mxu0 %vm408_vm0, %v332_v13  ;;  %v355_v36 = vld [vmem:[%s15056_s26 + $0xc0] sm:$0xff]  ;;  %v356_v37 = vld [vmem:[%s15056_s26 + $0xc8] sm:$0xff]  ;;  %v357_v38 = vld [vmem:[%s15056_s26 + $0xd0] sm:$0xff]  ;;  %1271 = vst.msk [vmem:[#allocation3 + $0xa0] sm:$0xff] %vm1186_vm1, %v14972_v3 }
  0x19   : > { %12879 = vmatprep.mubr.msk.f32.mxu0 %vm408_vm0, %v333_v14  ;;  %v358_v39 = vld [vmem:[%s15056_s26 + $0xd8] sm:$0xff]  ;;  %v359_v40 = vld [vmem:[%s15056_s26 + $0xe0] sm:$0xff]  ;;  %v360_v41 = vld [vmem:[%s15056_s26 + $0xe8] sm:$0xff]  ;;  %1272 = vst.msk [vmem:[#allocation3 + $0xa8] sm:$0xff] %vm1186_vm1, %v14972_v3 }
  0x1a   : > { %v361_v42 = vld [vmem:[%s15056_s26 + $0xf0] sm:$0xff]  ;;  %v362_v43 = vld [vmem:[%s15056_s26 + $0xf8] sm:$0xff]  ;;  %v363_v44 = vld [vmem:[%s15056_s26 + $0x100] sm:$0xff]  ;;  %1273 = vst.msk [vmem:[#allocation3 + $0xb0] sm:$0xff] %vm1186_vm1, %v14972_v3 }
  0x1b   : > { %v364_v45 = vld [vmem:[%s15056_s26 + $0x108] sm:$0xff]  ;;  %v365_v46 = vld [vmem:[%s15056_s26 + $0x110] sm:$0xff]  ;;  %v366_v47 = vld [vmem:[%s15056_s26 + $0x118] sm:$0xff]  ;;  %1274 = vst.msk [vmem:[#allocation3 + $0xb8] sm:$0xff] %vm1186_vm1, %v14972_v3 }
  0x1c   : > { %12880 = vmatmul.mubr.msk.f32.gmra.mrb[2].mxu0 %vm408_vm0, %v334_v15  ;;  %v367_v48 = vld [vmem:[%s15056_s26 + $0x120] sm:$0xff]  ;;  %v368_v49 = vld [vmem:[%s15056_s26 + $0x128] sm:$0xff]  ;;  %v369_v50 = vld [vmem:[%s15056_s26 + $0x130] sm:$0xff]  ;;  %1275 = vst.msk [vmem:[#allocation3 + $0xc0] sm:$0xff] %vm1186_vm1, %v14972_v3 }
  0x1d   : > { %12882 = vmatprep.mubr.msk.f32.mxu0 %vm408_vm0, %v335_v16  ;;  %v370_v51 = vld [vmem:[%s15056_s26 + $0x138] sm:$0xff]  ;;  %v371_v52 = vld [vmem:[%s15056_s26 + $0x140] sm:$0xff]  ;;  %v372_v53 = vld [vmem:[%s15056_s26 + $0x148] sm:$0xff]  ;;  %1276 = vst.msk [vmem:[#allocation3 + $0xc8] sm:$0xff] %vm1186_vm1, %v14972_v3 }
  0x1e   : > { %v373_v54 = vld [vmem:[%s15056_s26 + $0x150] sm:$0xff]  ;;  %v374_v55 = vld [vmem:[%s15056_s26 + $0x158] sm:$0xff]  ;;  %v375_v56 = vld [vmem:[%s15056_s26 + $0x160] sm:$0xff]  ;;  %1277 = vst.msk [vmem:[#allocation3 + $0xd0] sm:$0xff] %vm1186_vm1, %v14972_v3 }
  0x1f   : > { %v376_v57 = vld [vmem:[%s15056_s26 + $0x168] sm:$0xff]  ;;  %v377_v58 = vld [vmem:[%s15056_s26 + $0x170] sm:$0xff]  ;;  %v378_v59 = vld [vmem:[%s15056_s26 + $0x178] sm:$0xff]  ;;  %1278 = vst.msk [vmem:[#allocation3 + $0xd8] sm:$0xff] %vm1186_vm1, %v14972_v3 }
  0x20   : > { %12883 = vmatmul.mubr.msk.f32.gmra.mrb[4].mxu0 %vm408_vm0, %v336_v17  ;;  %v379_v60 = vld [vmem:[%s15056_s26 + $0x180] sm:$0xff]  ;;  %v380_v61 = vld [vmem:[%s15056_s26 + $0x188] sm:$0xff]  ;;  %v381_v62 = vld [vmem:[%s15056_s26 + $0x190] sm:$0xff]  ;;  %1279 = vst.msk [vmem:[#allocation3 + $0xe0] sm:$0xff] %vm1186_vm1, %v14972_v3 }
  0x21   : > { %12885 = vmatprep.mubr.msk.f32.mxu0 %vm408_vm0, %v337_v18  ;;  %v382_v63 = vld [vmem:[%s15056_s26 + $0x198] sm:$0xff]  ;;  %v383_v0 = vld [vmem:[%s15056_s26 + $0x1a0] sm:$0xff]  ;;  %v384_v1 = vld [vmem:[%s15056_s26 + $0x1a8] sm:$0xff]  ;;  %1280 = vst.msk [vmem:[#allocation3 + $0xe8] sm:$0xff] %vm1186_vm1, %v14972_v3 }
  0x22   : > { %v385_v2 = vld [vmem:[%s15056_s26 + $0x1b0] sm:$0xff]  ;;  %1281 = vst.msk [vmem:[#allocation3 + $0xf0] sm:$0xff] %vm1186_vm1, %v14972_v3  ;;  %1282 = vst.msk [vmem:[#allocation3 + $0xf8] sm:$0xff] %vm1186_vm1, %v14972_v3  ;;  %v386_v4 = vld [vmem:[%s15056_s26 + $0x1b8] sm:$0xff] }
  0x23   : > { %1283 = vst.msk [vmem:[#allocation3 + $0x100] sm:$0xff] %vm1186_vm1, %v14972_v3  ;;  %1284 = vst.msk [vmem:[#allocation3 + $0x108] sm:$0xff] %vm1186_vm1, %v14972_v3  ;;  %v387_v5 = vld [vmem:[%s15056_s26 + $0x1c0] sm:$0xff]  ;;  %v388_v6 = vld [vmem:[%s15056_s26 + $0x1c8] sm:$0xff] }
  0x24   : > { %12886 = vmatmul.mubr.msk.f32.gmra.mrb[6].mxu0 %vm408_vm0, %v338_v19  ;;  %1285 = vst.msk [vmem:[#allocation3 + $0x110] sm:$0xff] %vm1186_vm1, %v14972_v3  ;;  %v389_v7 = vld [vmem:[%s15056_s26 + $0x1d0] sm:$0xff]  ;;  %v390_v10 = vld [vmem:[%s15056_s26 + $0x1d8] sm:$0xff]  ;;  %v391_v12 = vld [vmem:[%s15056_s26 + $0x1e0] sm:$0xff]  ;;  %v404_v19 = vlaneseq }
  0x25   : > { %12888 = vmatprep.mubr.msk.f32.mxu0 %vm408_vm0, %v339_v20  ;;  %v11381_v8 = vld [vmem:[%s16913_s3 + $0x10] sm:$0xff]  ;;  %v392_v13 = vld [vmem:[%s15056_s26 + $0x1e8] sm:$0xff]  ;;  %v394_v15 = vld [vmem:[%s15056_s26 + $0x1f8] sm:$0xff]  ;;  %1287 = vst.msk [vmem:[#allocation3 + $0x118] sm:$0x3f] %vm1286_vm2, %v14972_v3 }
  0x26   : > { %v14108_v11 = vpack.c.bf16 %v11382_v9, %v11381_v8  ;;  %v393_v14 = vld [vmem:[%s15056_s26 + $0x1f0] sm:$0xff]  ;;  %v11578_v17 = vld [vmem:[%s16913_s3 + $0xb8] sm:$0xff]  ;;  %v15279_v20 = vshrl.u32 %v404_v19, 7  ;;  %9107 = vst.msk [vmem:[#allocation5] sm:$0xff] %vm9090_vm3, %v14972_v3  ;;  %9108 = vst.msk [vmem:[#allocation5 + $0x8] sm:$0xff] %vm9090_vm3, %v14972_v3  ;;  %vm11253_vm5 = vcmp.lt.s32.totalorder %v404_v19, 512 }
  0x27   : > { %v11577_v16 = vld [vmem:[%s16913_s3 + $0xb0] sm:$0xff]  ;;  %9109 = vst.msk [vmem:[#allocation5 + $0x10] sm:$0xff] %vm9090_vm3, %v14972_v3  ;;  %9110 = vst.msk [vmem:[#allocation5 + $0x18] sm:$0xff] %vm9090_vm3, %v14972_v3 }
  0x28   : > { %12889 = vmatmul.mubr.msk.f32.gmra.mrb[8].mxu0 %vm408_vm0, %v340_v21  ;;  %14109 = vmatprep.subr.bf16.mxu0 %v14108_v11  ;;  %v15274_v18 = vpack.c.bf16 %v11578_v17, %v11577_v16  ;;  %v15282_v21 = vsub.s32 0, %v15279_v20  ;;  %9111 = vst.msk [vmem:[#allocation5 + $0x20] sm:$0xff] %vm9090_vm3, %v14972_v3  ;;  %9112 = vst.msk [vmem:[#allocation5 + $0x28] sm:$0xff] %vm9090_vm3, %v14972_v3 }
  0x29   : > { %12891 = vmatprep.mubr.msk.f32.mxu0 %vm408_vm0, %v341_v22  ;;  %14111 = vmatpush3.bf16.msra.mxu0 %v14108_v11  ;;  %v403_v22 = vld [vmem:[%s16912_s2] sm:$0x7]  ;;  %9113 = vst.msk [vmem:[#allocation5 + $0x30] sm:$0xff] %vm9090_vm3, %v14972_v3  ;;  %9114 = vst.msk [vmem:[#allocation5 + $0x38] sm:$0xff] %vm9090_vm3, %v14972_v3 }
  0x2a   : > { %14396 = vmatprep.subr.bf16.mxu1 %v15274_v18  ;;  %9115 = vst.msk [vmem:[#allocation5 + $0x40] sm:$0xff] %vm9090_vm3, %v14972_v3 }
  0x2b   : > { %14397 = vmatpush3.bf16.msra.mxu1 %v15274_v18  ;;  %9117 = vst.msk [vmem:[#allocation5 + $0x48] sm:$0x3f] %vm9116_vm4, %v14972_v3 }
  0x2c   : > { %12892 = vmatmul.mubr.msk.f32.gmra.mrb[10].mxu0 %vm408_vm0, %v342_v23  ;;  %v15288_v23 = vrot.slane %v403_v22, %v15282_v21 }
  0x2d   : > { %12894 = vmatprep.mubr.msk.f32.mxu0 %vm408_vm0, %v343_v24  ;;  %v15291_v24 = vsub.s32 1, %v15279_v20 }
  0x30   : > { %12895 = vmatmul.mubr.msk.f32.gmra.mrb[12].mxu0 %vm408_vm0, %v344_v25  ;;  %v15294_v25 = vsub.s32 2, %v15279_v20 }
  0x31   : > { %12897 = vmatprep.mubr.msk.f32.mxu0 %vm408_vm0, %v345_v26 }
  0x34   : > { %12898 = vmatmul.mubr.msk.f32.gmra.mrb[14].mxu0 %vm408_vm0, %v346_v27 }
  0x35   : > { %12900 = vmatprep.mubr.msk.f32.mxu0 %vm408_vm0, %v347_v28  ;;  %v15298_v28 = vrot.slane %v403_v22, %v15291_v24 }
  0x38   : > { %12901 = vmatmul.mubr.msk.f32.gmra.mrb[16].mxu0 %vm408_vm0, %v348_v29 }
  0x39   : > { %12903 = vmatprep.mubr.msk.f32.mxu0 %vm408_vm0, %v349_v30 }
  0x3c   : > { %12904 = vmatmul.mubr.msk.f32.gmra.mrb[18].mxu0 %vm408_vm0, %v350_v31 }
  0x3d   : > { %12906 = vmatprep.mubr.msk.f32.mxu0 %vm408_vm0, %v351_v32  ;;  %v15302_v32 = vrot.slane %v403_v22, %v15294_v25 }
  0x40   : > { %12907 = vmatmul.mubr.msk.f32.gmra.mrb[20].mxu0 %vm408_vm0, %v352_v33 }
  0x41   : > { %12909 = vmatprep.mubr.msk.f32.mxu0 %vm408_vm0, %v353_v34 }
  0x44   : > { %12910 = vmatmul.mubr.msk.f32.gmra.mrb[22].mxu0 %vm408_vm0, %v354_v35 }
  0x45   : > { %12912 = vmatprep.mubr.msk.f32.mxu0 %vm408_vm0, %v355_v36 }
  0x48   : > { %12913 = vmatmul.mubr.msk.f32.gmra.mrb[24].mxu0 %vm408_vm0, %v356_v37 }
  0x49   : > { %12915 = vmatprep.mubr.msk.f32.mxu0 %vm408_vm0, %v357_v38 }
  0x4c   : > { %12916 = vmatmul.mubr.msk.f32.gmra.mrb[26].mxu0 %vm408_vm0, %v358_v39 }
  0x4d   : > { %12918 = vmatprep.mubr.msk.f32.mxu0 %vm408_vm0, %v359_v40 }
  0x50   : > { %12919 = vmatmul.mubr.msk.f32.gmra.mrb[28].mxu0 %vm408_vm0, %v360_v41 }
  0x51   : > { %12921 = vmatprep.mubr.msk.f32.mxu0 %vm408_vm0, %v361_v42 }
  0x54   : > { %12922 = vmatmul.mubr.msk.f32.gmra.mrb[30].mxu0 %vm408_vm0, %v362_v43 }
  0x55   : > { %12924 = vmatprep.mubr.msk.f32.mxu0 %vm408_vm0, %v363_v44 }
  0x58   : > { %12925 = vmatmul.mubr.msk.f32.gmra.mrb[32].mxu0 %vm408_vm0, %v364_v45 }
  0x59   : > { %12927 = vmatprep.mubr.msk.f32.mxu0 %vm408_vm0, %v365_v46 }
  0x5c   : > { %12928 = vmatmul.mubr.msk.f32.gmra.mrb[34].mxu0 %vm408_vm0, %v366_v47 }
  0x5d   : > { %12930 = vmatprep.mubr.msk.f32.mxu0 %vm408_vm0, %v367_v48 }
  0x60   : > { %12931 = vmatmul.mubr.msk.f32.gmra.mrb[36].mxu0 %vm408_vm0, %v368_v49 }
  0x61   : > { %12933 = vmatprep.mubr.msk.f32.mxu0 %vm408_vm0, %v369_v50 }
  0x64   : > { %12934 = vmatmul.mubr.msk.f32.gmra.mrb[38].mxu0 %vm408_vm0, %v370_v51 }
  0x65   : > { %12936 = vmatprep.mubr.msk.f32.mxu0 %vm408_vm0, %v371_v52 }
  0x68   : > { %12937 = vmatmul.mubr.msk.f32.gmra.mrb[40].mxu0 %vm408_vm0, %v372_v53 }
  0x69   : > { %12939 = vmatprep.mubr.msk.f32.mxu0 %vm408_vm0, %v373_v54 }
  0x6c   : > { %12940 = vmatmul.mubr.msk.f32.gmra.mrb[42].mxu0 %vm408_vm0, %v374_v55 }
  0x6d   : > { %12942 = vmatprep.mubr.msk.f32.mxu0 %vm408_vm0, %v375_v56 }
  0x70   : > { %12943 = vmatmul.mubr.msk.f32.gmra.mrb[44].mxu0 %vm408_vm0, %v376_v57 }
  0x71   : > { %12945 = vmatprep.mubr.msk.f32.mxu0 %vm408_vm0, %v377_v58 }
  0x74   : > { %12946 = vmatmul.mubr.msk.f32.gmra.mrb[46].mxu0 %vm408_vm0, %v378_v59 }
  0x75   : > { %12948 = vmatprep.mubr.msk.f32.mxu0 %vm408_vm0, %v379_v60 }
  0x78   : > { %12949 = vmatmul.mubr.msk.f32.gmra.mrb[48].mxu0 %vm408_vm0, %v380_v61 }
  0x79   : > { %12951 = vmatprep.mubr.msk.f32.mxu0 %vm408_vm0, %v381_v62 }
  0x7c   : > { %12952 = vmatmul.mubr.msk.f32.gmra.mrb[50].mxu0 %vm408_vm0, %v382_v63 }
  0x7d   : > { %12954 = vmatprep.mubr.msk.f32.mxu0 %vm408_vm0, %v383_v0 }
  0x80   : > { %12955 = vmatmul.mubr.msk.f32.gmra.mrb[52].mxu0 %vm408_vm0, %v384_v1  ;;  %v11595_v1 = vld [vmem:[%s16913_s3 + $0xc0] sm:$0xff] }
  0x81   : > { %12957 = vmatprep.mubr.msk.f32.mxu0 %vm408_vm0, %v385_v2  ;;  %v11596_v2 = vld [vmem:[%s16913_s3 + $0xc8] sm:$0xff] }
  0x82   : > { %v15335_v9 = vpack.c.bf16 %v11596_v2, %v11595_v1 }
  0x84   : > { %12958 = vmatmul.mubr.msk.f32.gmra.mrb[54].mxu0 %vm408_vm0, %v386_v4  ;;  %14157 = vmatprep.subr.bf16.mxu1 %v15335_v9 }
  0x85   : > { %12960 = vmatprep.mubr.msk.f32.mxu0 %vm408_vm0, %v387_v5 }
  0x88   : > { %12961 = vmatmul.mubr.msk.f32.gmra.mrb[56].mxu0 %vm408_vm0, %v388_v6 }
  0x89   : > { %12963 = vmatprep.mubr.msk.f32.mxu0 %vm408_vm0, %v389_v7 }
  0x8c   : > { %12964 = vmatmul.mubr.msk.f32.gmra.mrb[58].mxu0 %vm408_vm0, %v390_v10  ;;  %v1510_v10 = vld [vmem:[%s16913_s3] sm:$0xff] }
  0x8d   : > { %12966 = vmatprep.mubr.msk.f32.mxu0 %vm408_vm0, %v391_v12 }
  0x90   : > { %12967 = vmatmul.mubr.msk.f32.gmra.mrb[60].mxu0 %vm408_vm0, %v392_v13 }
  0x91   : > { %12969 = vmatprep.mubr.msk.f32.mxu0 %vm408_vm0, %v393_v14  ;;  %v1511_v14 = vld [vmem:[%s16913_s3 + $0x8] sm:$0xff] }
  0x92   : > { %v15348_v17 = vpack.c.bf16 %v1511_v14, %v1510_v10 }
  0x94   : > { %12970 = vmatmul.mubr.msk.f32.gmra.mrb[62].mxu0 %vm408_vm0, %v394_v15  ;;  %14113 = vmatprep.subr.bf16.mxu0 %v15348_v17 }
  0xeb   : > { %v12878_v26 = vpop.f32.mrb[0].mxu0 }
  0xec   : > { %v673_v27 = vadd.f32 %v12878_v26, %v15288_v23  ;;  %v667_v29 = vpop.f32.mrb[1].mxu0 }
  0xed   : > { %v668_v30 = vadd.f32 %v667_v29, %v15288_v23 }
  0xee   : > { %v987_v31 = vmax.f32 %v673_v27, 0.0 }
  0xef   : > { %v986_v33 = vmax.f32 %v668_v30, 0.0  ;;  %v12881_v34 = vpop.f32.mrb[2].mxu0 }
  0xf0   : > { %v1055_v35 = vmul.f32 %v15298_v28, %v987_v31  ;;  %v683_v36 = vadd.f32 %v12881_v34, %v15288_v23  ;;  %v677_v37 = vpop.f32.mrb[3].mxu0 }
  0xf1   : > { %v1054_v38 = vmul.f32 %v15298_v28, %v986_v33  ;;  %v678_v39 = vadd.f32 %v677_v37, %v15288_v23 }
  0xf2   : > { %v1123_v40 = vadd.f32 %v15302_v32, %v1055_v35  ;;  %v989_v41 = vmax.f32 %v683_v36, 0.0 }
  0xf3   : > { %v1122_v42 = vadd.f32 %v15302_v32, %v1054_v38  ;;  %v988_v43 = vmax.f32 %v678_v39, 0.0  ;;  %v12884_v44 = vpop.f32.mrb[4].mxu0 }
  0xf4   : > { %1188 = vst.msk [vmem:[#allocation2 + $0x8] sm:$0xff] %vm1186_vm1, %v1123_v40  ;;  %v1057_v45 = vmul.f32 %v15298_v28, %v989_v41  ;;  %v693_v46 = vadd.f32 %v12884_v44, %v15288_v23  ;;  %v687_v47 = vpop.f32.mrb[5].mxu0 }
  0xf5   : > { %1187 = vst.msk [vmem:[#allocation2] sm:$0xff] %vm1186_vm1, %v1122_v42  ;;  %v1056_v48 = vmul.f32 %v15298_v28, %v988_v43  ;;  %v688_v49 = vadd.f32 %v687_v47, %v15288_v23 }
  0xf6   : > { %v1125_v50 = vadd.f32 %v15302_v32, %v1057_v45  ;;  %v991_v51 = vmax.f32 %v693_v46, 0.0 }
  0xf7   : > { %v1124_v52 = vadd.f32 %v15302_v32, %v1056_v48  ;;  %v990_v53 = vmax.f32 %v688_v49, 0.0  ;;  %v12887_v54 = vpop.f32.mrb[6].mxu0 }
  0xf8   : > { %1190 = vst.msk [vmem:[#allocation2 + $0x18] sm:$0xff] %vm1186_vm1, %v1125_v50  ;;  %v1059_v55 = vmul.f32 %v15298_v28, %v991_v51  ;;  %v703_v56 = vadd.f32 %v12887_v54, %v15288_v23  ;;  %v697_v57 = vpop.f32.mrb[7].mxu0 }
  0xf9   : > { %1189 = vst.msk [vmem:[#allocation2 + $0x10] sm:$0xff] %vm1186_vm1, %v1124_v52  ;;  %v1058_v58 = vmul.f32 %v15298_v28, %v990_v53  ;;  %v698_v59 = vadd.f32 %v697_v57, %v15288_v23 }
  0xfa   : > { %v1127_v60 = vadd.f32 %v15302_v32, %v1059_v55  ;;  %v993_v61 = vmax.f32 %v703_v56, 0.0 }
  0xfb   : > { %v1126_v62 = vadd.f32 %v15302_v32, %v1058_v58  ;;  %v992_v63 = vmax.f32 %v698_v59, 0.0  ;;  %v12890_v0 = vpop.f32.mrb[8].mxu0 }
  0xfc   : > { %v1288_v4 = vld [vmem:[#allocation2] ss:$2 sm:$0xff]  ;;  %v1352_v5 = vld [vmem:[#allocation2 + $0x1] ss:$2 sm:$0xff]  ;;  %1192 = vst.msk [vmem:[#allocation2 + $0x28] sm:$0xff] %vm1186_vm1, %v1127_v60  ;;  %v1061_v6 = vmul.f32 %v15298_v28, %v993_v61  ;;  %v713_v7 = vadd.f32 %v12890_v0, %v15288_v23  ;;  %v707_v8 = vpop.f32.mrb[9].mxu0 }
  0xfd   : > { %v1415_v11 = vmax.f32 %v1288_v4, %v1352_v5  ;;  %1191 = vst.msk [vmem:[#allocation2 + $0x20] sm:$0xff] %vm1186_vm1, %v1126_v62  ;;  %v1060_v12 = vmul.f32 %v15298_v28, %v992_v63  ;;  %v708_v13 = vadd.f32 %v707_v8, %v15288_v23 }
  0xfe   : > { %v1129_v15 = vadd.f32 %v15302_v32, %v1061_v6  ;;  %v995_v16 = vmax.f32 %v713_v7, 0.0 }
  0xff   : > { %v1128_v22 = vadd.f32 %v15302_v32, %v1060_v12  ;;  %v994_v26 = vmax.f32 %v708_v13, 0.0  ;;  %v12893_v27 = vpop.f32.mrb[10].mxu0  ;;  %1447 = vst.msk [vmem:[#allocation3 + $0xf] sm:$0xff] %vm1186_vm1, %v1415_v11 }
 0x100   : > { %v1290_v29 = vld [vmem:[#allocation2 + $0x10] ss:$2 sm:$0xff]  ;;  %v1354_v30 = vld [vmem:[#allocation2 + $0x11] ss:$2 sm:$0xff]  ;;  %1194 = vst.msk [vmem:[#allocation2 + $0x38] sm:$0xff] %vm1186_vm1, %v1129_v15  ;;  %v1063_v31 = vmul.f32 %v15298_v28, %v995_v16  ;;  %v723_v33 = vadd.f32 %v12893_v27, %v15288_v23  ;;  %v717_v34 = vpop.f32.mrb[11].mxu0 }
 0x101   : > { %v1416_v35 = vmax.f32 %v1290_v29, %v1354_v30  ;;  %1193 = vst.msk [vmem:[#allocation2 + $0x30] sm:$0xff] %vm1186_vm1, %v1128_v22  ;;  %v1062_v36 = vmul.f32 %v15298_v28, %v994_v26  ;;  %v718_v37 = vadd.f32 %v717_v34, %v15288_v23 }
 0x102   : > { %v1131_v38 = vadd.f32 %v15302_v32, %v1063_v31  ;;  %v997_v39 = vmax.f32 %v723_v33, 0.0 }
 0x103   : > { %v1130_v40 = vadd.f32 %v15302_v32, %v1062_v36  ;;  %v996_v41 = vmax.f32 %v718_v37, 0.0  ;;  %v12896_v42 = vpop.f32.mrb[12].mxu0  ;;  %1448 = vst.msk [vmem:[#allocation3 + $0x17] sm:$0xff] %vm1186_vm1, %v1416_v35 }
 0x104   : > { %v1292_v43 = vld [vmem:[#allocation2 + $0x20] ss:$2 sm:$0xff]  ;;  %v1356_v44 = vld [vmem:[#allocation2 + $0x21] ss:$2 sm:$0xff]  ;;  %1196 = vst.msk [vmem:[#allocation2 + $0x48] sm:$0xff] %vm1186_vm1, %v1131_v38  ;;  %v1065_v45 = vmul.f32 %v15298_v28, %v997_v39  ;;  %v733_v46 = vadd.f32 %v12896_v42, %v15288_v23  ;;  %v727_v47 = vpop.f32.mrb[13].mxu0 }
 0x105   : > { %v1417_v48 = vmax.f32 %v1292_v43, %v1356_v44  ;;  %1195 = vst.msk [vmem:[#allocation2 + $0x40] sm:$0xff] %vm1186_vm1, %v1130_v40  ;;  %v1064_v49 = vmul.f32 %v15298_v28, %v996_v41  ;;  %v728_v50 = vadd.f32 %v727_v47, %v15288_v23 }
 0x106   : > { %v1133_v51 = vadd.f32 %v15302_v32, %v1065_v45  ;;  %v999_v52 = vmax.f32 %v733_v46, 0.0  ;;  %v1513_v53 = vld [vmem:[#allocation3 + $0x1] ss:$2 sm:$0xff] }
 0x107   : > { %v1132_v54 = vadd.f32 %v15302_v32, %v1064_v49  ;;  %v998_v55 = vmax.f32 %v728_v50, 0.0  ;;  %v12899_v56 = vpop.f32.mrb[14].mxu0  ;;  %12976 = vmatprep.mubr.msk.f32.mxu0 %vm1186_vm1, %v1513_v53  ;;  %1449 = vst.msk [vmem:[#allocation3 + $0x1f] sm:$0xff] %vm1186_vm1, %v1417_v48 }
 0x108   : > { %v1294_v57 = vld [vmem:[#allocation2 + $0x30] ss:$2 sm:$0xff]  ;;  %v1358_v58 = vld [vmem:[#allocation2 + $0x31] ss:$2 sm:$0xff]  ;;  %1198 = vst.msk [vmem:[#allocation2 + $0x58] sm:$0xff] %vm1186_vm1, %v1133_v51  ;;  %v1067_v59 = vmul.f32 %v15298_v28, %v999_v52  ;;  %v743_v60 = vadd.f32 %v12899_v56, %v15288_v23  ;;  %v737_v61 = vpop.f32.mrb[15].mxu0 }
 0x109   : > { %v1418_v62 = vmax.f32 %v1294_v57, %v1358_v58  ;;  %1197 = vst.msk [vmem:[#allocation2 + $0x50] sm:$0xff] %vm1186_vm1, %v1132_v54  ;;  %v1066_v63 = vmul.f32 %v15298_v28, %v998_v55  ;;  %v738_v0 = vadd.f32 %v737_v61, %v15288_v23 }
 0x10a   : > { %v1135_v1 = vadd.f32 %v15302_v32, %v1067_v59  ;;  %v1001_v2 = vmax.f32 %v743_v60, 0.0 }
 0x10b   : > { %v1134_v4 = vadd.f32 %v15302_v32, %v1066_v63  ;;  %v1000_v5 = vmax.f32 %v738_v0, 0.0  ;;  %1450 = vst.msk [vmem:[#allocation3 + $0x27] sm:$0xff] %vm1186_vm1, %v1418_v62  ;;  %v12902_v6 = vpop.f32.mrb[16].mxu0 }
 0x10c   : > { %v1296_v7 = vld [vmem:[#allocation2 + $0x40] ss:$2 sm:$0xff]  ;;  %v1360_v8 = vld [vmem:[#allocation2 + $0x41] ss:$2 sm:$0xff]  ;;  %1200 = vst.msk [vmem:[#allocation2 + $0x68] sm:$0xff] %vm1186_vm1, %v1135_v1  ;;  %v1069_v10 = vmul.f32 %v15298_v28, %v1001_v2  ;;  %v753_v11 = vadd.f32 %v12902_v6, %v15288_v23  ;;  %v747_v12 = vpop.f32.mrb[17].mxu0 }
 0x10d   : > { %v1419_v13 = vmax.f32 %v1296_v7, %v1360_v8  ;;  %1199 = vst.msk [vmem:[#allocation2 + $0x60] sm:$0xff] %vm1186_vm1, %v1134_v4  ;;  %v1068_v14 = vmul.f32 %v15298_v28, %v1000_v5  ;;  %v748_v15 = vadd.f32 %v747_v12, %v15288_v23 }
 0x10e   : > { %v1137_v16 = vadd.f32 %v15302_v32, %v1069_v10  ;;  %v1003_v22 = vmax.f32 %v753_v11, 0.0  ;;  %v1515_v26 = vld [vmem:[#allocation3 + $0x11] ss:$2 sm:$0xff] }
 0x10f   : > { %v1136_v27 = vadd.f32 %v15302_v32, %v1068_v14  ;;  %1451 = vst.msk [vmem:[#allocation3 + $0x2f] sm:$0xff] %vm1186_vm1, %v1419_v13  ;;  %v1002_v29 = vmax.f32 %v748_v15, 0.0  ;;  %v12905_v30 = vpop.f32.mrb[18].mxu0  ;;  %12977 = vmatmul.mubr.msk.f32.vlgmr.msra.gmra.mrb[64].mxu0 %vm1186_vm1, %v1515_v26  ;;  %v11416_v26 = vld [vmem:[%s16913_s3 + $0x28] sm:$0xff] }
 0x110   : > { %v1298_v31 = vld [vmem:[#allocation2 + $0x50] ss:$2 sm:$0xff]  ;;  %v1362_v33 = vld [vmem:[#allocation2 + $0x51] ss:$2 sm:$0xff]  ;;  %1202 = vst.msk [vmem:[#allocation2 + $0x78] sm:$0xff] %vm1186_vm1, %v1137_v16  ;;  %v1071_v34 = vmul.f32 %v15298_v28, %v1003_v22  ;;  %v763_v35 = vadd.f32 %v12905_v30, %v15288_v23  ;;  %v757_v36 = vpop.f32.mrb[19].mxu0  ;;  %14115 = vmatpush3.bf16.msra.mxu0 %v15348_v17 }
 0x111   : > { %v1420_v37 = vmax.f32 %v1298_v31, %v1362_v33  ;;  %1201 = vst.msk [vmem:[#allocation2 + $0x70] sm:$0xff] %vm1186_vm1, %v1136_v27  ;;  %v1070_v38 = vmul.f32 %v15298_v28, %v1002_v29  ;;  %v758_v39 = vadd.f32 %v757_v36, %v15288_v23  ;;  %v11415_v22 = vld [vmem:[%s16913_s3 + $0x20] sm:$0xff] }
 0x112   : > { %v1139_v40 = vadd.f32 %v15302_v32, %v1071_v34  ;;  %v1005_v41 = vmax.f32 %v763_v35, 0.0  ;;  %v15433_v31 = vpack.c.bf16 %v11416_v26, %v11415_v22 }
 0x113   : > { %1452 = vst.msk [vmem:[#allocation3 + $0x37] sm:$0xff] %vm1186_vm1, %v1420_v37  ;;  %v1138_v42 = vadd.f32 %v15302_v32, %v1070_v38  ;;  %v1004_v43 = vmax.f32 %v758_v39, 0.0  ;;  %v12908_v44 = vpop.f32.mrb[20].mxu0 }
 0x114   : > { %v1300_v45 = vld [vmem:[#allocation2 + $0x60] ss:$2 sm:$0xff]  ;;  %v1364_v46 = vld [vmem:[#allocation2 + $0x61] ss:$2 sm:$0xff]  ;;  %1204 = vst.msk [vmem:[#allocation2 + $0x88] sm:$0xff] %vm1186_vm1, %v1139_v40  ;;  %v1073_v17 = vmul.f32 %v15298_v28, %v1005_v41  ;;  %v773_v47 = vadd.f32 %v12908_v44, %v15288_v23  ;;  %v767_v48 = vpop.f32.mrb[21].mxu0  ;;  %14117 = vmatprep.subr.bf16.mxu0 %v15433_v31 }
 0x115   : > { %v1421_v49 = vmax.f32 %v1300_v45, %v1364_v46  ;;  %1203 = vst.msk [vmem:[#allocation2 + $0x80] sm:$0xff] %vm1186_vm1, %v1138_v42  ;;  %v1072_v50 = vmul.f32 %v15298_v28, %v1004_v43  ;;  %v768_v51 = vadd.f32 %v767_v48, %v15288_v23 }
 0x116   : > { %v1141_v52 = vadd.f32 %v15302_v32, %v1073_v17  ;;  %v1007_v53 = vmax.f32 %v773_v47, 0.0  ;;  %v1517_v54 = vld [vmem:[#allocation3 + $0x21] ss:$2 sm:$0xff] }
 0x117   : > { %1453 = vst.msk [vmem:[#allocation3 + $0x3f] sm:$0xff] %vm1186_vm1, %v1421_v49  ;;  %v1140_v55 = vadd.f32 %v15302_v32, %v1072_v50  ;;  %v1006_v56 = vmax.f32 %v768_v51, 0.0  ;;  %v12911_v57 = vpop.f32.mrb[22].mxu0  ;;  %12979 = vmatprep.mubr.msk.f32.mxu0 %vm1186_vm1, %v1517_v54 }
 0x118   : > { %v1302_v58 = vld [vmem:[#allocation2 + $0x70] ss:$2 sm:$0xff]  ;;  %v1366_v59 = vld [vmem:[#allocation2 + $0x71] ss:$2 sm:$0xff]  ;;  %1206 = vst.msk [vmem:[#allocation2 + $0x98] sm:$0xff] %vm1186_vm1, %v1141_v52  ;;  %v1075_v60 = vmul.f32 %v15298_v28, %v1007_v53  ;;  %v783_v61 = vadd.f32 %v12911_v57, %v15288_v23  ;;  %v777_v62 = vpop.f32.mrb[23].mxu0 }
 0x119   : > { %v1422_v63 = vmax.f32 %v1302_v58, %v1366_v59  ;;  %1205 = vst.msk [vmem:[#allocation2 + $0x90] sm:$0xff] %vm1186_vm1, %v1140_v55  ;;  %v1074_v0 = vmul.f32 %v15298_v28, %v1006_v56  ;;  %v778_v1 = vadd.f32 %v777_v62, %v15288_v23 }
 0x11a   : > { %v1143_v2 = vadd.f32 %v15302_v32, %v1075_v60  ;;  %v1009_v4 = vmax.f32 %v783_v61, 0.0 }
 0x11b   : > { %1454 = vst.msk [vmem:[#allocation3 + $0x47] sm:$0xff] %vm1186_vm1, %v1422_v63  ;;  %v1142_v5 = vadd.f32 %v15302_v32, %v1074_v0  ;;  %v1008_v6 = vmax.f32 %v778_v1, 0.0  ;;  %v12914_v7 = vpop.f32.mrb[24].mxu0 }
 0x11c   : > { %v1304_v8 = vld [vmem:[#allocation2 + $0x80] ss:$2 sm:$0xff]  ;;  %v1368_v10 = vld [vmem:[#allocation2 + $0x81] ss:$2 sm:$0xff]  ;;  %1208 = vst.msk [vmem:[#allocation2 + $0xa8] sm:$0xff] %vm1186_vm1, %v1143_v2  ;;  %v1077_v11 = vmul.f32 %v15298_v28, %v1009_v4  ;;  %v793_v12 = vadd.f32 %v12914_v7, %v15288_v23  ;;  %v787_v13 = vpop.f32.mrb[25].mxu0 }
 0x11d   : > { %v1423_v14 = vmax.f32 %v1304_v8, %v1368_v10  ;;  %1207 = vst.msk [vmem:[#allocation2 + $0xa0] sm:$0xff] %vm1186_vm1, %v1142_v5  ;;  %v1076_v15 = vmul.f32 %v15298_v28, %v1008_v6  ;;  %v788_v16 = vadd.f32 %v787_v13, %v15288_v23 }
 0x11e   : > { %v1145_v27 = vadd.f32 %v15302_v32, %v1077_v11  ;;  %v1011_v29 = vmax.f32 %v793_v12, 0.0  ;;  %v1519_v30 = vld [vmem:[#allocation3 + $0x31] ss:$2 sm:$0xff] }
 0x11f   : > { %1455 = vst.msk [vmem:[#allocation3 + $0x4f] sm:$0xff] %vm1186_vm1, %v1423_v14  ;;  %v1144_v33 = vadd.f32 %v15302_v32, %v1076_v15  ;;  %v1010_v34 = vmax.f32 %v788_v16, 0.0  ;;  %v12917_v35 = vpop.f32.mrb[26].mxu0  ;;  %12980 = vmatmul.mubr.msk.f32.gmra.mrb[66].mxu0 %vm1186_vm1, %v1519_v30 }
 0x120   : > { %v1306_v36 = vld [vmem:[#allocation2 + $0x90] ss:$2 sm:$0xff]  ;;  %v1370_v37 = vld [vmem:[#allocation2 + $0x91] ss:$2 sm:$0xff]  ;;  %1210 = vst.msk [vmem:[#allocation2 + $0xb8] sm:$0xff] %vm1186_vm1, %v1145_v27  ;;  %v1079_v38 = vmul.f32 %v15298_v28, %v1011_v29  ;;  %v803_v39 = vadd.f32 %v12917_v35, %v15288_v23  ;;  %v797_v40 = vpop.f32.mrb[27].mxu0 }
 0x121   : > { %v1424_v41 = vmax.f32 %v1306_v36, %v1370_v37  ;;  %1209 = vst.msk [vmem:[#allocation2 + $0xb0] sm:$0xff] %vm1186_vm1, %v1144_v33  ;;  %v1078_v42 = vmul.f32 %v15298_v28, %v1010_v34  ;;  %v798_v43 = vadd.f32 %v797_v40, %v15288_v23 }
 0x122   : > { %v1147_v44 = vadd.f32 %v15302_v32, %v1079_v38  ;;  %v1013_v45 = vmax.f32 %v803_v39, 0.0 }
 0x123   : > { %1456 = vst.msk [vmem:[#allocation3 + $0x57] sm:$0xff] %vm1186_vm1, %v1424_v41  ;;  %v1146_v46 = vadd.f32 %v15302_v32, %v1078_v42  ;;  %v1012_v17 = vmax.f32 %v798_v43, 0.0  ;;  %v12920_v47 = vpop.f32.mrb[28].mxu0 }
 0x124   : > { %v1308_v48 = vld [vmem:[#allocation2 + $0xa0] ss:$2 sm:$0xff]  ;;  %v1372_v49 = vld [vmem:[#allocation2 + $0xa1] ss:$2 sm:$0xff]  ;;  %1212 = vst.msk [vmem:[#allocation2 + $0xc8] sm:$0xff] %vm1186_vm1, %v1147_v44  ;;  %v1081_v50 = vmul.f32 %v15298_v28, %v1013_v45  ;;  %v813_v51 = vadd.f32 %v12920_v47, %v15288_v23  ;;  %v807_v52 = vpop.f32.mrb[29].mxu0 }
 0x125   : > { %v1425_v53 = vmax.f32 %v1308_v48, %v1372_v49  ;;  %1211 = vst.msk [vmem:[#allocation2 + $0xc0] sm:$0xff] %vm1186_vm1, %v1146_v46  ;;  %v1080_v54 = vmul.f32 %v15298_v28, %v1012_v17  ;;  %v808_v55 = vadd.f32 %v807_v52, %v15288_v23 }
 0x126   : > { %v1149_v56 = vadd.f32 %v15302_v32, %v1081_v50  ;;  %v1015_v57 = vmax.f32 %v813_v51, 0.0  ;;  %v1521_v58 = vld [vmem:[#allocation3 + $0x41] ss:$2 sm:$0xff] }
 0x127   : > { %1457 = vst.msk [vmem:[#allocation3 + $0x5f] sm:$0xff] %vm1186_vm1, %v1425_v53  ;;  %v1148_v59 = vadd.f32 %v15302_v32, %v1080_v54  ;;  %v1014_v60 = vmax.f32 %v808_v55, 0.0  ;;  %v12923_v61 = vpop.f32.mrb[30].mxu0  ;;  %12982 = vmatprep.mubr.msk.f32.mxu0 %vm1186_vm1, %v1521_v58 }
 0x128   : > { %v1310_v62 = vld [vmem:[#allocation2 + $0xb0] ss:$2 sm:$0xff]  ;;  %v1374_v63 = vld [vmem:[#allocation2 + $0xb1] ss:$2 sm:$0xff]  ;;  %1214 = vst.msk [vmem:[#allocation2 + $0xd8] sm:$0xff] %vm1186_vm1, %v1149_v56  ;;  %v1083_v0 = vmul.f32 %v15298_v28, %v1015_v57  ;;  %v823_v1 = vadd.f32 %v12923_v61, %v15288_v23  ;;  %v817_v2 = vpop.f32.mrb[31].mxu0 }
 0x129   : > { %v1426_v4 = vmax.f32 %v1310_v62, %v1374_v63  ;;  %1213 = vst.msk [vmem:[#allocation2 + $0xd0] sm:$0xff] %vm1186_vm1, %v1148_v59  ;;  %v1082_v5 = vmul.f32 %v15298_v28, %v1014_v60  ;;  %v818_v6 = vadd.f32 %v817_v2, %v15288_v23 }
 0x12a   : > { %v1151_v7 = vadd.f32 %v15302_v32, %v1083_v0  ;;  %v1017_v8 = vmax.f32 %v823_v1, 0.0 }
 0x12b   : > { %1458 = vst.msk [vmem:[#allocation3 + $0x67] sm:$0xff] %vm1186_vm1, %v1426_v4  ;;  %v1150_v10 = vadd.f32 %v15302_v32, %v1082_v5  ;;  %v1016_v11 = vmax.f32 %v818_v6, 0.0  ;;  %v12926_v12 = vpop.f32.mrb[32].mxu0 }
 0x12c   : > { %v1312_v13 = vld [vmem:[#allocation2 + $0xc0] ss:$2 sm:$0xff]  ;;  %v1376_v14 = vld [vmem:[#allocation2 + $0xc1] ss:$2 sm:$0xff]  ;;  %1216 = vst.msk [vmem:[#allocation2 + $0xe8] sm:$0xff] %vm1186_vm1, %v1151_v7  ;;  %v1085_v15 = vmul.f32 %v15298_v28, %v1017_v8  ;;  %v833_v16 = vadd.f32 %v12926_v12, %v15288_v23  ;;  %v827_v22 = vpop.f32.mrb[33].mxu0 }
 0x12d   : > { %v1427_v26 = vmax.f32 %v1312_v13, %v1376_v14  ;;  %1215 = vst.msk [vmem:[#allocation2 + $0xe0] sm:$0xff] %vm1186_vm1, %v1150_v10  ;;  %v1084_v27 = vmul.f32 %v15298_v28, %v1016_v11  ;;  %v828_v29 = vadd.f32 %v827_v22, %v15288_v23 }
 0x12e   : > { %v1153_v30 = vadd.f32 %v15302_v32, %v1085_v15  ;;  %v1019_v33 = vmax.f32 %v833_v16, 0.0  ;;  %v1523_v34 = vld [vmem:[#allocation3 + $0x51] ss:$2 sm:$0xff] }
 0x12f   : > { %1459 = vst.msk [vmem:[#allocation3 + $0x6f] sm:$0xff] %vm1186_vm1, %v1427_v26  ;;  %v1152_v35 = vadd.f32 %v15302_v32, %v1084_v27  ;;  %v1018_v36 = vmax.f32 %v828_v29, 0.0  ;;  %v12929_v37 = vpop.f32.mrb[34].mxu0  ;;  %12983 = vmatmul.mubr.msk.f32.gmra.mrb[68].mxu0 %vm1186_vm1, %v1523_v34 }
 0x130   : > { %v1314_v38 = vld [vmem:[#allocation2 + $0xd0] ss:$2 sm:$0xff]  ;;  %v1378_v39 = vld [vmem:[#allocation2 + $0xd1] ss:$2 sm:$0xff]  ;;  %1218 = vst.msk [vmem:[#allocation2 + $0xf8] sm:$0xff] %vm1186_vm1, %v1153_v30  ;;  %v1087_v40 = vmul.f32 %v15298_v28, %v1019_v33  ;;  %v843_v41 = vadd.f32 %v12929_v37, %v15288_v23  ;;  %v837_v42 = vpop.f32.mrb[35].mxu0 }
 0x131   : > { %v1428_v43 = vmax.f32 %v1314_v38, %v1378_v39  ;;  %1217 = vst.msk [vmem:[#allocation2 + $0xf0] sm:$0xff] %vm1186_vm1, %v1152_v35  ;;  %v1086_v44 = vmul.f32 %v15298_v28, %v1018_v36  ;;  %v838_v45 = vadd.f32 %v837_v42, %v15288_v23  ;;  %v11613_v38 = vld [vmem:[%s16913_s3 + $0xd0] sm:$0xff]  ;;  %v11614_v39 = vld [vmem:[%s16913_s3 + $0xd8] sm:$0xff] }
 0x132   : > { %v1155_v46 = vadd.f32 %v15302_v32, %v1087_v40  ;;  %v1021_v17 = vmax.f32 %v843_v41, 0.0 }
 0x133   : > { %1460 = vst.msk [vmem:[#allocation3 + $0x77] sm:$0xff] %vm1186_vm1, %v1428_v43  ;;  %v1154_v47 = vadd.f32 %v15302_v32, %v1086_v44  ;;  %v1020_v48 = vmax.f32 %v838_v45, 0.0  ;;  %v12932_v49 = vpop.f32.mrb[36].mxu0 }
 0x134   : > { %v1316_v50 = vld [vmem:[#allocation2 + $0xe0] ss:$2 sm:$0xff]  ;;  %v1380_v51 = vld [vmem:[#allocation2 + $0xe1] ss:$2 sm:$0xff]  ;;  %1220 = vst.msk [vmem:[#allocation2 + $0x108] sm:$0xff] %vm1186_vm1, %v1155_v46  ;;  %v1089_v52 = vmul.f32 %v15298_v28, %v1021_v17  ;;  %v853_v53 = vadd.f32 %v12932_v49, %v15288_v23  ;;  %v847_v54 = vpop.f32.mrb[37].mxu0 }
 0x135   : > { %v1429_v55 = vmax.f32 %v1316_v50, %v1380_v51  ;;  %1219 = vst.msk [vmem:[#allocation2 + $0x100] sm:$0xff] %vm1186_vm1, %v1154_v47  ;;  %v1088_v56 = vmul.f32 %v15298_v28, %v1020_v48  ;;  %v848_v57 = vadd.f32 %v847_v54, %v15288_v23  ;;  %v15528_v50 = vpack.c.bf16 %v11614_v39, %v11613_v38 }
 0x136   : > { %v1157_v58 = vadd.f32 %v15302_v32, %v1089_v52  ;;  %v1023_v59 = vmax.f32 %v853_v53, 0.0  ;;  %v1525_v60 = vld [vmem:[#allocation3 + $0x61] ss:$2 sm:$0xff] }
 0x137   : > { %1461 = vst.msk [vmem:[#allocation3 + $0x7f] sm:$0xff] %vm1186_vm1, %v1429_v55  ;;  %v1156_v61 = vadd.f32 %v15302_v32, %v1088_v56  ;;  %v1022_v62 = vmax.f32 %v848_v57, 0.0  ;;  %v12935_v63 = vpop.f32.mrb[38].mxu0  ;;  %12985 = vmatprep.mubr.msk.f32.mxu0 %vm1186_vm1, %v1525_v60 }
 0x138   : > { %v1318_v0 = vld [vmem:[#allocation2 + $0xf0] ss:$2 sm:$0xff]  ;;  %v1382_v1 = vld [vmem:[#allocation2 + $0xf1] ss:$2 sm:$0xff]  ;;  %1222 = vst.msk [vmem:[#allocation2 + $0x118] sm:$0xff] %vm1186_vm1, %v1157_v58  ;;  %v1091_v2 = vmul.f32 %v15298_v28, %v1023_v59  ;;  %v863_v4 = vadd.f32 %v12935_v63, %v15288_v23  ;;  %v857_v5 = vpop.f32.mrb[39].mxu0 }
 0x139   : > { %v1430_v6 = vmax.f32 %v1318_v0, %v1382_v1  ;;  %1221 = vst.msk [vmem:[#allocation2 + $0x110] sm:$0xff] %vm1186_vm1, %v1156_v61  ;;  %v1090_v7 = vmul.f32 %v15298_v28, %v1022_v62  ;;  %v858_v8 = vadd.f32 %v857_v5, %v15288_v23 }
 0x13a   : > { %v1159_v10 = vadd.f32 %v15302_v32, %v1091_v2  ;;  %v1025_v11 = vmax.f32 %v863_v4, 0.0  ;;  %v4142_v12 = vld [vmem:[#allocation3 + $0x6b] ss:$2 sm:$0xff] }
 0x13b   : > { %1462 = vst.msk [vmem:[#allocation3 + $0x87] sm:$0xff] %vm1186_vm1, %v1430_v6  ;;  %v1158_v13 = vadd.f32 %v15302_v32, %v1090_v7  ;;  %v1024_v14 = vmax.f32 %v858_v8, 0.0  ;;  %v12938_v15 = vpop.f32.mrb[40].mxu0  ;;  %13293 = vmatprep.mubr.msk.f32.mxu1 %vm1186_vm1, %v4142_v12 }
 0x13c   : > { %v1320_v16 = vld [vmem:[#allocation2 + $0x100] ss:$2 sm:$0xff]  ;;  %v1384_v22 = vld [vmem:[#allocation2 + $0x101] ss:$2 sm:$0xff]  ;;  %1224 = vst.msk [vmem:[#allocation2 + $0x128] sm:$0xff] %vm1186_vm1, %v1159_v10  ;;  %v1093_v26 = vmul.f32 %v15298_v28, %v1025_v11  ;;  %v873_v27 = vadd.f32 %v12938_v15, %v15288_v23  ;;  %v867_v29 = vpop.f32.mrb[41].mxu0 }
 0x13d   : > { %v1431_v30 = vmax.f32 %v1320_v16, %v1384_v22  ;;  %1223 = vst.msk [vmem:[#allocation2 + $0x120] sm:$0xff] %vm1186_vm1, %v1158_v13  ;;  %v1092_v33 = vmul.f32 %v15298_v28, %v1024_v14  ;;  %v868_v34 = vadd.f32 %v867_v29, %v15288_v23 }
 0x13e   : > { %v1161_v35 = vadd.f32 %v15302_v32, %v1093_v26  ;;  %v1027_v36 = vmax.f32 %v873_v27, 0.0  ;;  %v1527_v37 = vld [vmem:[#allocation3 + $0x71] ss:$2 sm:$0xff] }
 0x13f   : > { %1463 = vst.msk [vmem:[#allocation3 + $0x8f] sm:$0xff] %vm1186_vm1, %v1431_v30  ;;  %v1160_v40 = vadd.f32 %v15302_v32, %v1092_v33  ;;  %v1026_v41 = vmax.f32 %v868_v34, 0.0  ;;  %v12941_v42 = vpop.f32.mrb[42].mxu0  ;;  %12986 = vmatmul.mubr.msk.f32.gmra.mrb[70].mxu0 %vm1186_vm1, %v1527_v37 }
 0x140   : > { %v1322_v43 = vld [vmem:[#allocation2 + $0x110] ss:$2 sm:$0xff]  ;;  %v1386_v44 = vld [vmem:[#allocation2 + $0x111] ss:$2 sm:$0xff]  ;;  %1226 = vst.msk [vmem:[#allocation2 + $0x138] sm:$0xff] %vm1186_vm1, %v1161_v35  ;;  %v1095_v45 = vmul.f32 %v15298_v28, %v1027_v36  ;;  %v883_v46 = vadd.f32 %v12941_v42, %v15288_v23  ;;  %v877_v17 = vpop.f32.mrb[43].mxu0 }
 0x141   : > { %v1432_v47 = vmax.f32 %v1322_v43, %v1386_v44  ;;  %1225 = vst.msk [vmem:[#allocation2 + $0x130] sm:$0xff] %vm1186_vm1, %v1160_v40  ;;  %v1094_v48 = vmul.f32 %v15298_v28, %v1026_v41  ;;  %v878_v49 = vadd.f32 %v877_v17, %v15288_v23 }
 0x142   : > { %v1163_v51 = vadd.f32 %v15302_v32, %v1095_v45  ;;  %v1029_v52 = vmax.f32 %v883_v46, 0.0  ;;  %v4144_v53 = vld [vmem:[#allocation3 + $0x7b] ss:$2 sm:$0xff] }
 0x143   : > { %1464 = vst.msk [vmem:[#allocation3 + $0x97] sm:$0xff] %vm1186_vm1, %v1432_v47  ;;  %v1162_v54 = vadd.f32 %v15302_v32, %v1094_v48  ;;  %v1028_v55 = vmax.f32 %v878_v49, 0.0  ;;  %v12944_v56 = vpop.f32.mrb[44].mxu0  ;;  %13294 = vmatmul.mubr.msk.f32.vlgmr.msra.gmra.mrb[0].mxu1 %vm1186_vm1, %v4144_v53 }
 0x144   : > { %v1324_v57 = vld [vmem:[#allocation2 + $0x120] ss:$2 sm:$0xff]  ;;  %v1388_v58 = vld [vmem:[#allocation2 + $0x121] ss:$2 sm:$0xff]  ;;  %1228 = vst.msk [vmem:[#allocation2 + $0x148] sm:$0xff] %vm1186_vm1, %v1163_v51  ;;  %v1097_v59 = vmul.f32 %v15298_v28, %v1029_v52  ;;  %v893_v60 = vadd.f32 %v12944_v56, %v15288_v23  ;;  %v887_v61 = vpop.f32.mrb[45].mxu0  ;;  %14159 = vmatpush3.bf16.msra.mxu1 %v15335_v9 }
 0x145   : > { %v1433_v62 = vmax.f32 %v1324_v57, %v1388_v58  ;;  %1227 = vst.msk [vmem:[#allocation2 + $0x140] sm:$0xff] %vm1186_vm1, %v1162_v54  ;;  %v1096_v63 = vmul.f32 %v15298_v28, %v1028_v55  ;;  %v888_v0 = vadd.f32 %v887_v61, %v15288_v23  ;;  %14161 = vmatprep.subr.bf16.mxu1 %v15528_v50 }
 0x146   : > { %v1165_v1 = vadd.f32 %v15302_v32, %v1097_v59  ;;  %v1031_v2 = vmax.f32 %v893_v60, 0.0  ;;  %v1529_v4 = vld [vmem:[#allocation3 + $0x81] ss:$2 sm:$0xff] }
 0x147   : > { %1465 = vst.msk [vmem:[#allocation3 + $0x9f] sm:$0xff] %vm1186_vm1, %v1433_v62  ;;  %v1164_v5 = vadd.f32 %v15302_v32, %v1096_v63  ;;  %v1030_v6 = vmax.f32 %v888_v0, 0.0  ;;  %v12947_v7 = vpop.f32.mrb[46].mxu0  ;;  %12988 = vmatprep.mubr.msk.f32.mxu0 %vm1186_vm1, %v1529_v4 }
 0x148   : > { %v1326_v9 = vld [vmem:[#allocation2 + $0x130] ss:$2 sm:$0xff]  ;;  %v1390_v8 = vld [vmem:[#allocation2 + $0x131] ss:$2 sm:$0xff]  ;;  %1230 = vst.msk [vmem:[#allocation2 + $0x158] sm:$0xff] %vm1186_vm1, %v1165_v1  ;;  %v1099_v10 = vmul.f32 %v15298_v28, %v1031_v2  ;;  %v903_v11 = vadd.f32 %v12947_v7, %v15288_v23  ;;  %v897_v12 = vpop.f32.mrb[47].mxu0 }
 0x149   : > { %v1434_v13 = vmax.f32 %v1326_v9, %v1390_v8  ;;  %1229 = vst.msk [vmem:[#allocation2 + $0x150] sm:$0xff] %vm1186_vm1, %v1164_v5  ;;  %v1098_v14 = vmul.f32 %v15298_v28, %v1030_v6  ;;  %v898_v15 = vadd.f32 %v897_v12, %v15288_v23 }
 0x14a   : > { %v1167_v16 = vadd.f32 %v15302_v32, %v1099_v10  ;;  %v1033_v22 = vmax.f32 %v903_v11, 0.0  ;;  %v4146_v26 = vld [vmem:[#allocation3 + $0x8b] ss:$2 sm:$0xff] }
 0x14b   : > { %1466 = vst.msk [vmem:[#allocation3 + $0xa7] sm:$0xff] %vm1186_vm1, %v1434_v13  ;;  %v1166_v27 = vadd.f32 %v15302_v32, %v1098_v14  ;;  %v1032_v29 = vmax.f32 %v898_v15, 0.0  ;;  %v12950_v30 = vpop.f32.mrb[48].mxu0  ;;  %13296 = vmatprep.mubr.msk.f32.mxu1 %vm1186_vm1, %v4146_v26 }
 0x14c   : > { %v1328_v33 = vld [vmem:[#allocation2 + $0x140] ss:$2 sm:$0xff]  ;;  %v1392_v34 = vld [vmem:[#allocation2 + $0x141] ss:$2 sm:$0xff]  ;;  %1232 = vst.msk [vmem:[#allocation2 + $0x168] sm:$0xff] %vm1186_vm1, %v1167_v16  ;;  %v1101_v35 = vmul.f32 %v15298_v28, %v1033_v22  ;;  %v913_v36 = vadd.f32 %v12950_v30, %v15288_v23  ;;  %v907_v37 = vpop.f32.mrb[49].mxu0 }
 0x14d   : > { %v1435_v38 = vmax.f32 %v1328_v33, %v1392_v34  ;;  %1231 = vst.msk [vmem:[#allocation2 + $0x160] sm:$0xff] %vm1186_vm1, %v1166_v27  ;;  %v1100_v39 = vmul.f32 %v15298_v28, %v1032_v29  ;;  %v908_v40 = vadd.f32 %v907_v37, %v15288_v23 }
 0x14e   : > { %v1169_v41 = vadd.f32 %v15302_v32, %v1101_v35  ;;  %v1035_v42 = vmax.f32 %v913_v36, 0.0  ;;  %v1531_v43 = vld [vmem:[#allocation3 + $0x91] ss:$2 sm:$0xff] }
 0x14f   : > { %1467 = vst.msk [vmem:[#allocation3 + $0xaf] sm:$0xff] %vm1186_vm1, %v1435_v38  ;;  %v1168_v44 = vadd.f32 %v15302_v32, %v1100_v39  ;;  %v1034_v45 = vmax.f32 %v908_v40, 0.0  ;;  %v12953_v46 = vpop.f32.mrb[50].mxu0  ;;  %12989 = vmatmul.mubr.msk.f32.gmra.mrb[72].mxu0 %vm1186_vm1, %v1531_v43 }
 0x150   : > { %v1330_v17 = vld [vmem:[#allocation2 + $0x150] ss:$2 sm:$0xff]  ;;  %v1394_v47 = vld [vmem:[#allocation2 + $0x151] ss:$2 sm:$0xff]  ;;  %1234 = vst.msk [vmem:[#allocation2 + $0x178] sm:$0xff] %vm1186_vm1, %v1169_v41  ;;  %v1103_v48 = vmul.f32 %v15298_v28, %v1035_v42  ;;  %v923_v49 = vadd.f32 %v12953_v46, %v15288_v23  ;;  %v917_v51 = vpop.f32.mrb[51].mxu0 }
 0x151   : > { %v1436_v52 = vmax.f32 %v1330_v17, %v1394_v47  ;;  %1233 = vst.msk [vmem:[#allocation2 + $0x170] sm:$0xff] %vm1186_vm1, %v1168_v44  ;;  %v1102_v53 = vmul.f32 %v15298_v28, %v1034_v45  ;;  %v918_v54 = vadd.f32 %v917_v51, %v15288_v23 }
 0x152   : > { %v1171_v55 = vadd.f32 %v15302_v32, %v1103_v48  ;;  %v1037_v56 = vmax.f32 %v923_v49, 0.0  ;;  %v4148_v57 = vld [vmem:[#allocation3 + $0x9b] ss:$2 sm:$0xff] }
 0x153   : > { %1468 = vst.msk [vmem:[#allocation3 + $0xb7] sm:$0xff] %vm1186_vm1, %v1436_v52  ;;  %v1170_v58 = vadd.f32 %v15302_v32, %v1102_v53  ;;  %v1036_v59 = vmax.f32 %v918_v54, 0.0  ;;  %v12956_v60 = vpop.f32.mrb[52].mxu0  ;;  %13297 = vmatmul.mubr.msk.f32.gmra.mrb[2].mxu1 %vm1186_vm1, %v4148_v57 }
 0x154   : > { %v1332_v61 = vld [vmem:[#allocation2 + $0x160] ss:$2 sm:$0xff]  ;;  %v1396_v62 = vld [vmem:[#allocation2 + $0x161] ss:$2 sm:$0xff]  ;;  %1236 = vst.msk [vmem:[#allocation2 + $0x188] sm:$0xff] %vm1186_vm1, %v1171_v55  ;;  %v1105_v63 = vmul.f32 %v15298_v28, %v1037_v56  ;;  %v933_v0 = vadd.f32 %v12956_v60, %v15288_v23  ;;  %v927_v1 = vpop.f32.mrb[53].mxu0 }
 0x155   : > { %v1437_v2 = vmax.f32 %v1332_v61, %v1396_v62  ;;  %1235 = vst.msk [vmem:[#allocation2 + $0x180] sm:$0xff] %vm1186_vm1, %v1170_v58  ;;  %v1104_v4 = vmul.f32 %v15298_v28, %v1036_v59  ;;  %v928_v5 = vadd.f32 %v927_v1, %v15288_v23 }
 0x156   : > { %v1173_v6 = vadd.f32 %v15302_v32, %v1105_v63  ;;  %v1039_v7 = vmax.f32 %v933_v0, 0.0  ;;  %v1533_v9 = vld [vmem:[#allocation3 + $0xa1] ss:$2 sm:$0xff] }
 0x157   : > { %1469 = vst.msk [vmem:[#allocation3 + $0xbf] sm:$0xff] %vm1186_vm1, %v1437_v2  ;;  %v1172_v8 = vadd.f32 %v15302_v32, %v1104_v4  ;;  %v1038_v10 = vmax.f32 %v928_v5, 0.0  ;;  %v12959_v11 = vpop.f32.mrb[54].mxu0  ;;  %12991 = vmatprep.mubr.msk.f32.mxu0 %vm1186_vm1, %v1533_v9 }
 0x158   : > { %v1334_v12 = vld [vmem:[#allocation2 + $0x170] ss:$2 sm:$0xff]  ;;  %v1398_v13 = vld [vmem:[#allocation2 + $0x171] ss:$2 sm:$0xff]  ;;  %1238 = vst.msk [vmem:[#allocation2 + $0x198] sm:$0xff] %vm1186_vm1, %v1173_v6  ;;  %v1107_v14 = vmul.f32 %v15298_v28, %v1039_v7  ;;  %v943_v15 = vadd.f32 %v12959_v11, %v15288_v23  ;;  %v937_v16 = vpop.f32.mrb[55].mxu0 }
 0x159   : > { %v1438_v22 = vmax.f32 %v1334_v12, %v1398_v13  ;;  %1237 = vst.msk [vmem:[#allocation2 + $0x190] sm:$0xff] %vm1186_vm1, %v1172_v8  ;;  %v1106_v26 = vmul.f32 %v15298_v28, %v1038_v10  ;;  %v938_v27 = vadd.f32 %v937_v16, %v15288_v23 }
 0x15a   : > { %v1175_v29 = vadd.f32 %v15302_v32, %v1107_v14  ;;  %v1041_v30 = vmax.f32 %v943_v15, 0.0  ;;  %v4150_v33 = vld [vmem:[#allocation3 + $0xab] ss:$2 sm:$0xff] }
 0x15b   : > { %1470 = vst.msk [vmem:[#allocation3 + $0xc7] sm:$0xff] %vm1186_vm1, %v1438_v22  ;;  %v1174_v34 = vadd.f32 %v15302_v32, %v1106_v26  ;;  %v1040_v35 = vmax.f32 %v938_v27, 0.0  ;;  %v12962_v36 = vpop.f32.mrb[56].mxu0  ;;  %13299 = vmatprep.mubr.msk.f32.mxu1 %vm1186_vm1, %v4150_v33 }
 0x15c   : > { %v1336_v37 = vld [vmem:[#allocation2 + $0x180] ss:$2 sm:$0xff]  ;;  %v1400_v38 = vld [vmem:[#allocation2 + $0x181] ss:$2 sm:$0xff]  ;;  %1240 = vst.msk [vmem:[#allocation2 + $0x1a8] sm:$0xff] %vm1186_vm1, %v1175_v29  ;;  %v1109_v39 = vmul.f32 %v15298_v28, %v1041_v30  ;;  %v953_v40 = vadd.f32 %v12962_v36, %v15288_v23  ;;  %v947_v41 = vpop.f32.mrb[57].mxu0 }
 0x15d   : > { %v1439_v42 = vmax.f32 %v1336_v37, %v1400_v38  ;;  %1239 = vst.msk [vmem:[#allocation2 + $0x1a0] sm:$0xff] %vm1186_vm1, %v1174_v34  ;;  %v1108_v43 = vmul.f32 %v15298_v28, %v1040_v35  ;;  %v948_v44 = vadd.f32 %v947_v41, %v15288_v23 }
 0x15e   : > { %v1177_v45 = vadd.f32 %v15302_v32, %v1109_v39  ;;  %v1043_v46 = vmax.f32 %v953_v40, 0.0  ;;  %v1535_v17 = vld [vmem:[#allocation3 + $0xb1] ss:$2 sm:$0xff] }
 0x15f   : > { %1471 = vst.msk [vmem:[#allocation3 + $0xcf] sm:$0xff] %vm1186_vm1, %v1439_v42  ;;  %v1176_v47 = vadd.f32 %v15302_v32, %v1108_v43  ;;  %v1042_v48 = vmax.f32 %v948_v44, 0.0  ;;  %v12965_v49 = vpop.f32.mrb[58].mxu0  ;;  %12992 = vmatmul.mubr.msk.f32.gmra.mrb[74].mxu0 %vm1186_vm1, %v1535_v17 }
 0x160   : > { %v1338_v51 = vld [vmem:[#allocation2 + $0x190] ss:$2 sm:$0xff]  ;;  %v1402_v52 = vld [vmem:[#allocation2 + $0x191] ss:$2 sm:$0xff]  ;;  %1242 = vst.msk [vmem:[#allocation2 + $0x1b8] sm:$0xff] %vm1186_vm1, %v1177_v45  ;;  %v1111_v53 = vmul.f32 %v15298_v28, %v1043_v46  ;;  %v963_v54 = vadd.f32 %v12965_v49, %v15288_v23  ;;  %v957_v55 = vpop.f32.mrb[59].mxu0 }
 0x161   : > { %v1440_v56 = vmax.f32 %v1338_v51, %v1402_v52  ;;  %1241 = vst.msk [vmem:[#allocation2 + $0x1b0] sm:$0xff] %vm1186_vm1, %v1176_v47  ;;  %v1110_v57 = vmul.f32 %v15298_v28, %v1042_v48  ;;  %v958_v58 = vadd.f32 %v957_v55, %v15288_v23 }
 0x162   : > { %v1179_v59 = vadd.f32 %v15302_v32, %v1111_v53  ;;  %v1045_v60 = vmax.f32 %v963_v54, 0.0  ;;  %v4152_v61 = vld [vmem:[#allocation3 + $0xbb] ss:$2 sm:$0xff] }
 0x163   : > { %1472 = vst.msk [vmem:[#allocation3 + $0xd7] sm:$0xff] %vm1186_vm1, %v1440_v56  ;;  %v1178_v62 = vadd.f32 %v15302_v32, %v1110_v57  ;;  %v1044_v63 = vmax.f32 %v958_v58, 0.0  ;;  %v12968_v0 = vpop.f32.mrb[60].mxu0  ;;  %13300 = vmatmul.mubr.msk.f32.gmra.mrb[4].mxu1 %vm1186_vm1, %v4152_v61  ;;  %v1479_v57 = vld [vmem:[#allocation3] ss:$2 sm:$0xff] }
 0x164   : > { %v1340_v1 = vld [vmem:[#allocation2 + $0x1a0] ss:$2 sm:$0xff]  ;;  %v1404_v2 = vld [vmem:[#allocation2 + $0x1a1] ss:$2 sm:$0xff]  ;;  %1244 = vst.msk [vmem:[#allocation2 + $0x1c8] sm:$0xff] %vm1186_vm1, %v1179_v59  ;;  %v1113_v4 = vmul.f32 %v15298_v28, %v1045_v60  ;;  %v973_v5 = vadd.f32 %v12968_v0, %v15288_v23  ;;  %v967_v6 = vpop.f32.mrb[61].mxu0 }
 0x165   : > { %v1441_v7 = vmax.f32 %v1340_v1, %v1404_v2  ;;  %1243 = vst.msk [vmem:[#allocation2 + $0x1c0] sm:$0xff] %vm1186_vm1, %v1178_v62  ;;  %v1112_v9 = vmul.f32 %v15298_v28, %v1044_v63  ;;  %v968_v8 = vadd.f32 %v967_v6, %v15288_v23  ;;  %v11433_v59 = vld [vmem:[%s16913_s3 + $0x30] sm:$0xff]  ;;  %v11434_v60 = vld [vmem:[%s16913_s3 + $0x38] sm:$0xff]  ;;  %v11631_v63 = vld [vmem:[%s16913_s3 + $0xe0] sm:$0xff] }
 0x166   : > { %v1181_v10 = vadd.f32 %v15302_v32, %v1113_v4  ;;  %v1047_v11 = vmax.f32 %v973_v5, 0.0  ;;  %v1537_v12 = vld [vmem:[#allocation3 + $0xc1] ss:$2 sm:$0xff]  ;;  %v1481_v61 = vld [vmem:[#allocation3 + $0x10] ss:$2 sm:$0xff]  ;;  %v15666_v1 = vpack.c.bf16 %v11434_v60, %v11433_v59 }
 0x167   : > { %1473 = vst.msk [vmem:[#allocation3 + $0xdf] sm:$0xff] %vm1186_vm1, %v1441_v7  ;;  %v1180_v13 = vadd.f32 %v15302_v32, %v1112_v9  ;;  %v1046_v14 = vmax.f32 %v968_v8, 0.0  ;;  %v12971_v15 = vpop.f32.mrb[62].mxu0  ;;  %12994 = vmatprep.mubr.msk.f32.mxu0 %vm1186_vm1, %v1537_v12  ;;  %v11632_v0 = vld [vmem:[%s16913_s3 + $0xe8] sm:$0xff]  ;;  %v1485_v6 = vld [vmem:[#allocation3 + $0x30] ss:$2 sm:$0xff] }
 0x168   : > { %v1342_v16 = vld [vmem:[#allocation2 + $0x1b0] ss:$2 sm:$0xff]  ;;  %v1406_v22 = vld [vmem:[#allocation2 + $0x1b1] ss:$2 sm:$0xff]  ;;  %1246 = vst.msk [vmem:[#allocation2 + $0x1d8] sm:$0xff] %vm1186_vm1, %v1181_v10  ;;  %v1115_v26 = vmul.f32 %v15298_v28, %v1047_v11  ;;  %v983_v27 = vadd.f32 %v12971_v15, %v15288_v23  ;;  %v977_v29 = vpop.f32.mrb[63].mxu0  ;;  %v15673_v5 = vpack.c.bf16 %v11632_v0, %v11631_v63 }
 0x169   : > { %v1442_v30 = vmax.f32 %v1342_v16, %v1406_v22  ;;  %1245 = vst.msk [vmem:[#allocation2 + $0x1d0] sm:$0xff] %vm1186_vm1, %v1180_v13  ;;  %v1114_v33 = vmul.f32 %v15298_v28, %v1046_v14  ;;  %v978_v34 = vadd.f32 %v977_v29, %v15288_v23  ;;  %v1483_v2 = vld [vmem:[#allocation3 + $0x20] ss:$2 sm:$0xff]  ;;  %v1497_v16 = vld [vmem:[#allocation3 + $0x90] ss:$2 sm:$0xff] }
 0x16a   : > { %v1183_v35 = vadd.f32 %v15302_v32, %v1115_v26  ;;  %v1049_v36 = vmax.f32 %v983_v27, 0.0  ;;  %v4154_v37 = vld [vmem:[#allocation3 + $0xcb] ss:$2 sm:$0xff]  ;;  %v4374_v4 = vld [vmem:[#allocation3 + $0xc] ss:$2 sm:$0xff] }
 0x16b   : > { %1474 = vst.msk [vmem:[#allocation3 + $0xe7] sm:$0xff] %vm1186_vm1, %v1442_v30  ;;  %v1182_v38 = vadd.f32 %v15302_v32, %v1114_v33  ;;  %v1048_v39 = vmax.f32 %v978_v34, 0.0  ;;  %13302 = vmatprep.mubr.msk.f32.mxu1 %vm1186_vm1, %v4154_v37  ;;  %v4376_v7 = vld [vmem:[#allocation3 + $0x1c] ss:$2 sm:$0xff]  ;;  %v4378_v8 = vld [vmem:[#allocation3 + $0x2c] ss:$2 sm:$0xff] }
 0x16c   : > { %v1344_v40 = vld [vmem:[#allocation2 + $0x1c0] ss:$2 sm:$0xff]  ;;  %v1408_v41 = vld [vmem:[#allocation2 + $0x1c1] ss:$2 sm:$0xff]  ;;  %1248 = vst.msk [vmem:[#allocation2 + $0x1e8] sm:$0xff] %vm1186_vm1, %v1183_v35  ;;  %v1117_v42 = vmul.f32 %v15298_v28, %v1049_v36 }
 0x16d   : > { %v1443_v43 = vmax.f32 %v1344_v40, %v1408_v41  ;;  %1247 = vst.msk [vmem:[#allocation2 + $0x1e0] sm:$0xff] %vm1186_vm1, %v1182_v38  ;;  %v1116_v23 = vmul.f32 %v15298_v28, %v1048_v39  ;;  %v1487_v9 = vld [vmem:[#allocation3 + $0x40] ss:$2 sm:$0xff]  ;;  %v1501_v29 = vld [vmem:[#allocation3 + $0xb0] ss:$2 sm:$0xff] }
 0x16e   : > { %v1185_v44 = vadd.f32 %v15302_v32, %v1117_v42  ;;  %v1539_v45 = vld [vmem:[#allocation3 + $0xd1] ss:$2 sm:$0xff]  ;;  %v4380_v10 = vld [vmem:[#allocation3 + $0x3c] ss:$2 sm:$0xff]  ;;  %v4382_v12 = vld [vmem:[#allocation3 + $0x4c] ss:$2 sm:$0xff] }
 0x16f   : > { %1475 = vst.msk [vmem:[#allocation3 + $0xef] sm:$0xff] %vm1186_vm1, %v1443_v43  ;;  %v1184_v46 = vadd.f32 %v15302_v32, %v1116_v23  ;;  %12995 = vmatmul.mubr.msk.f32.gmra.mrb[76].mxu0 %vm1186_vm1, %v1539_v45  ;;  %v1491_v11 = vld [vmem:[#allocation3 + $0x60] ss:$2 sm:$0xff]  ;;  %v1505_v35 = vld [vmem:[#allocation3 + $0xd0] ss:$2 sm:$0xff] }
 0x170   : > { %v1346_v17 = vld [vmem:[#allocation2 + $0x1d0] ss:$2 sm:$0xff]  ;;  %v1410_v47 = vld [vmem:[#allocation2 + $0x1d1] ss:$2 sm:$0xff]  ;;  %1250 = vst.msk [vmem:[#allocation2 + $0x1f8] sm:$0xff] %vm1186_vm1, %v1185_v44  ;;  %v11451_v43 = vld [vmem:[%s16913_s3 + $0x40] sm:$0xff] }
 0x171   : > { %v1444_v48 = vmax.f32 %v1346_v17, %v1410_v47  ;;  %1249 = vst.msk [vmem:[#allocation2 + $0x1f0] sm:$0xff] %vm1186_vm1, %v1184_v46  ;;  %v4384_v13 = vld [vmem:[#allocation3 + $0x5c] ss:$2 sm:$0xff]  ;;  %v4386_v15 = vld [vmem:[#allocation3 + $0x6c] ss:$2 sm:$0xff] }
 0x172   : > { %v4156_v49 = vld [vmem:[#allocation3 + $0xdb] ss:$2 sm:$0xff]  ;;  %v1495_v14 = vld [vmem:[#allocation3 + $0x80] ss:$2 sm:$0xff]  ;;  %v11649_v46 = vld [vmem:[%s16913_s3 + $0xf0] sm:$0xff] }
 0x173   : > { %1476 = vst.msk [vmem:[#allocation3 + $0xf7] sm:$0xff] %vm1186_vm1, %v1444_v48  ;;  %13303 = vmatmul.mubr.msk.f32.gmra.mrb[6].mxu1 %vm1186_vm1, %v4156_v49  ;;  %v4388_v22 = vld [vmem:[#allocation3 + $0x7c] ss:$2 sm:$0xff]  ;;  %v4390_v27 = vld [vmem:[#allocation3 + $0x8c] ss:$2 sm:$0xff] }
 0x174   : > { %v1348_v28 = vld [vmem:[#allocation2 + $0x1e0] ss:$2 sm:$0xff]  ;;  %v1412_v51 = vld [vmem:[#allocation2 + $0x1e1] ss:$2 sm:$0xff]  ;;  %v11650_v17 = vld [vmem:[%s16913_s3 + $0xf8] sm:$0xff] }
 0x175   : > { %v1445_v52 = vmax.f32 %v1348_v28, %v1412_v51  ;;  %v1499_v26 = vld [vmem:[#allocation3 + $0xa0] ss:$2 sm:$0xff]  ;;  %v4618_v49 = vld [vmem:[#allocation3 + $0xd] ss:$2 sm:$0xff]  ;;  %v15725_v28 = vpack.c.bf16 %v11650_v17, %v11649_v46  ;;  %v4628_v59 = vld [vmem:[#allocation3 + $0x5d] ss:$2 sm:$0xff] }
 0x176   : > { %v1541_v53 = vld [vmem:[#allocation3 + $0xe1] ss:$2 sm:$0xff]  ;;  %v4392_v30 = vld [vmem:[#allocation3 + $0x9c] ss:$2 sm:$0xff]  ;;  %v4394_v34 = vld [vmem:[#allocation3 + $0xac] ss:$2 sm:$0xff] }
 0x177   : > { %1477 = vst.msk [vmem:[#allocation3 + $0xff] sm:$0xff] %vm1186_vm1, %v1445_v52  ;;  %12997 = vmatprep.mubr.msk.f32.mxu0 %vm1186_vm1, %v1541_v53  ;;  %v1503_v33 = vld [vmem:[#allocation3 + $0xc0] ss:$2 sm:$0xff]  ;;  %v4620_v52 = vld [vmem:[#allocation3 + $0x1d] ss:$2 sm:$0xff] }
 0x178   : > { %v1350_v32 = vld [vmem:[#allocation2 + $0x1f0] ss:$2 sm:$0xff]  ;;  %v1414_v54 = vld [vmem:[#allocation2 + $0x1f1] ss:$2 sm:$0xff]  ;;  %v1507_v37 = vld [vmem:[#allocation3 + $0xe0] ss:$2 sm:$0xff] }
 0x179   : > { %v1446_v55 = vmax.f32 %v1350_v32, %v1414_v54  ;;  %v4396_v36 = vld [vmem:[#allocation3 + $0xbc] ss:$2 sm:$0xff]  ;;  %v4398_v38 = vld [vmem:[#allocation3 + $0xcc] ss:$2 sm:$0xff]  ;;  %v4622_v32 = vld [vmem:[#allocation3 + $0x2d] ss:$2 sm:$0xff] }
 0x17a   : > { %v4158_v56 = vld [vmem:[#allocation3 + $0xeb] ss:$2 sm:$0xff]  ;;  %v1509_v39 = vld [vmem:[#allocation3 + $0xf0] ss:$2 sm:$0xff] }
 0x17b   : > { %1478 = vst.msk [vmem:[#allocation3 + $0x107] sm:$0xff] %vm1186_vm1, %v1446_v55  ;;  %13305 = vmatprep.mubr.msk.f32.mxu1 %vm1186_vm1, %v4158_v56  ;;  %v4400_v40 = vld [vmem:[#allocation3 + $0xdc] ss:$2 sm:$0xff]  ;;  %v4402_v42 = vld [vmem:[#allocation3 + $0xec] ss:$2 sm:$0xff] }
 0x17c   : > { %v1934_v41 = vld [vmem:[#allocation3 + $0x2] ss:$2 sm:$0xff]  ;;  %v1936_v44 = vld [vmem:[#allocation3 + $0x12] ss:$2 sm:$0xff]  ;;  %v4624_v55 = vld [vmem:[#allocation3 + $0x3d] ss:$2 sm:$0xff] }
 0x17d   : > { %v11452_v23 = vld [vmem:[%s16913_s3 + $0x48] sm:$0xff]  ;;  %v1940_v51 = vld [vmem:[#allocation3 + $0x32] ss:$2 sm:$0xff] }
 0x17e   : > { %v1543_v58 = vld [vmem:[#allocation3 + $0xf1] ss:$2 sm:$0xff]  ;;  %v15718_v47 = vpack.c.bf16 %v11452_v23, %v11451_v43  ;;  %v1938_v48 = vld [vmem:[#allocation3 + $0x22] ss:$2 sm:$0xff]  ;;  %v1944_v54 = vld [vmem:[#allocation3 + $0x52] ss:$2 sm:$0xff] }
 0x17f   : > { %12998 = vmatmul.mubr.msk.f32.gmra.mrb[78].mxu0 %vm1186_vm1, %v1543_v58  ;;  %v1942_v53 = vld [vmem:[#allocation3 + $0x42] ss:$2 sm:$0xff]  ;;  %v1948_v58 = vld [vmem:[#allocation3 + $0x72] ss:$2 sm:$0xff]  ;;  %v4632_v63 = vld [vmem:[#allocation3 + $0x7d] ss:$2 sm:$0xff] }
 0x180   : > { %13004 = vmatprep.mubr.msk.f32.mxu0 %vm1186_vm1, %v1479_v57  ;;  %v1946_v56 = vld [vmem:[#allocation3 + $0x62] ss:$2 sm:$0xff]  ;;  %v4626_v57 = vld [vmem:[#allocation3 + $0x4d] ss:$2 sm:$0xff] }
 0x181   : > { %v1950_v60 = vld [vmem:[#allocation3 + $0x82] ss:$2 sm:$0xff]  ;;  %v2194_v23 = vld [vmem:[#allocation3 + $0x83] ss:$2 sm:$0xff] }
 0x182   : > { %v4160_v62 = vld [vmem:[#allocation3 + $0xfb] ss:$2 sm:$0xff]  ;;  %v4404_v45 = vld [vmem:[#allocation3 + $0xfc] ss:$2 sm:$0xff] }
 0x183   : > { %13005 = vmatmul.mubr.msk.f32.vlgmr.msra.gmra.mrb[64].mxu0 %vm1186_vm1, %v1481_v61  ;;  %13306 = vmatmul.mubr.msk.f32.gmra.mrb[8].mxu1 %vm1186_vm1, %v4160_v62  ;;  %v4630_v61 = vld [vmem:[#allocation3 + $0x6d] ss:$2 sm:$0xff]  ;;  %v1952_v62 = vld [vmem:[#allocation3 + $0x92] ss:$2 sm:$0xff]  ;;  %v1954_v0 = vld [vmem:[#allocation3 + $0xa2] ss:$2 sm:$0xff] }
 0x184   : > { %13007 = vmatprep.mubr.msk.f32.mxu0 %vm1186_vm1, %v1483_v2  ;;  %13312 = vmatprep.mubr.msk.f32.mxu1 %vm1186_vm1, %v4374_v4  ;;  %v1956_v2 = vld [vmem:[#allocation3 + $0xb2] ss:$2 sm:$0xff]  ;;  %v4636_v4 = vld [vmem:[#allocation3 + $0x9d] ss:$2 sm:$0xff] }
 0x185   : > { %14119 = vmatpush3.bf16.msra.mxu0 %v15433_v31  ;;  %v1489_v31 = vld [vmem:[#allocation3 + $0x50] ss:$2 sm:$0xff]  ;;  %v2198_v17 = vld [vmem:[#allocation3 + $0xa3] ss:$2 sm:$0xff] }
 0x186   : > { %14121 = vmatprep.subr.bf16.mxu0 %v15666_v1  ;;  %v4872_v43 = vld [vmem:[#allocation3 + $0x5e] ss:$2 sm:$0xff] }
 0x187   : > { %13008 = vmatmul.mubr.msk.f32.gmra.mrb[66].mxu0 %vm1186_vm1, %v1485_v6  ;;  %13313 = vmatmul.mubr.msk.f32.vlgmr.msra.gmra.mrb[10].mxu1 %vm1186_vm1, %v4376_v7  ;;  %v4638_v6 = vld [vmem:[#allocation3 + $0xad] ss:$2 sm:$0xff]  ;;  %v1960_v7 = vld [vmem:[#allocation3 + $0xd2] ss:$2 sm:$0xff] }
 0x188   : > { %14163 = vmatpush3.bf16.msra.mxu1 %v15528_v50  ;;  %13010 = vmatprep.mubr.msk.f32.mxu0 %vm1186_vm1, %v1487_v9  ;;  %v1493_v50 = vld [vmem:[#allocation3 + $0x70] ss:$2 sm:$0xff]  ;;  %v4640_v9 = vld [vmem:[#allocation3 + $0xbd] ss:$2 sm:$0xff] }
 0x189   : > { %13315 = vmatprep.mubr.msk.f32.mxu1 %vm1186_vm1, %v4378_v8  ;;  %14165 = vmatprep.subr.bf16.mxu1 %v15673_v5  ;;  %v1962_v8 = vld [vmem:[#allocation3 + $0xe2] ss:$2 sm:$0xff] }
 0x18a   : > { %v4876_v46 = vld [vmem:[#allocation3 + $0x7e] ss:$2 sm:$0xff] }
 0x18b   : > { %13011 = vmatmul.mubr.msk.f32.gmra.mrb[68].mxu0 %vm1186_vm1, %v1489_v31  ;;  %13316 = vmatmul.mubr.msk.f32.gmra.mrb[12].mxu1 %vm1186_vm1, %v4380_v10  ;;  %v4642_v31 = vld [vmem:[#allocation3 + $0xcd] ss:$2 sm:$0xff]  ;;  %v1964_v10 = vld [vmem:[#allocation3 + $0xf2] ss:$2 sm:$0xff] }
 0x18c   : > { %13013 = vmatprep.mubr.msk.f32.mxu0 %vm1186_vm1, %v1491_v11  ;;  %13318 = vmatprep.mubr.msk.f32.mxu1 %vm1186_vm1, %v4382_v12  ;;  %v4644_v11 = vld [vmem:[#allocation3 + $0xdd] ss:$2 sm:$0xff] }
 0x18d   : > { %v2178_v12 = vld [vmem:[#allocation3 + $0x3] ss:$2 sm:$0xff] }
 0x18f   : > { %13014 = vmatmul.mubr.msk.f32.gmra.mrb[70].mxu0 %vm1186_vm1, %v1493_v50  ;;  %13319 = vmatmul.mubr.msk.f32.gmra.mrb[14].mxu1 %vm1186_vm1, %v4384_v13  ;;  %v4646_v50 = vld [vmem:[#allocation3 + $0xed] ss:$2 sm:$0xff] }
 0x190   : > { %13016 = vmatprep.mubr.msk.f32.mxu0 %vm1186_vm1, %v1495_v14  ;;  %13321 = vmatprep.mubr.msk.f32.mxu1 %vm1186_vm1, %v4386_v15  ;;  %v11469_v13 = vld [vmem:[%s16913_s3 + $0x50] sm:$0xff]  ;;  %v11470_v14 = vld [vmem:[%s16913_s3 + $0x58] sm:$0xff] }
 0x191   : > { %v2180_v15 = vld [vmem:[#allocation3 + $0x13] ss:$2 sm:$0xff] }
 0x193   : > { %13017 = vmatmul.mubr.msk.f32.gmra.mrb[72].mxu0 %vm1186_vm1, %v1497_v16  ;;  %13322 = vmatmul.mubr.msk.f32.gmra.mrb[0].mxu1 %vm1186_vm1, %v4388_v22  ;;  %v4648_v16 = vld [vmem:[#allocation3 + $0xfd] ss:$2 sm:$0xff] }
 0x194   : > { %13019 = vmatprep.mubr.msk.f32.mxu0 %vm1186_vm1, %v1499_v26  ;;  %13324 = vmatprep.mubr.msk.f32.mxu1 %vm1186_vm1, %v4390_v27  ;;  %v11667_v22 = vld [vmem:[%s16913_s3 + $0x100] sm:$0xff]  ;;  %v11668_v26 = vld [vmem:[%s16913_s3 + $0x108] sm:$0xff]  ;;  %v15771_v27 = vpack.c.bf16 %v11470_v14, %v11469_v13 }
 0x195   : > { %v5116_v13 = vld [vmem:[#allocation3 + $0x5f] ss:$2 sm:$0xff]  ;;  %v2438_v14 = vld [vmem:[#allocation3 + $0x84] ss:$2 sm:$0xff] }
 0x197   : > { %13020 = vmatmul.mubr.msk.f32.gmra.mrb[74].mxu0 %vm1186_vm1, %v1501_v29  ;;  %13325 = vmatmul.mubr.msk.f32.gmra.mrb[2].mxu1 %vm1186_vm1, %v4392_v30  ;;  %v2182_v29 = vld [vmem:[#allocation3 + $0x23] ss:$2 sm:$0xff]  ;;  %v4862_v30 = vld [vmem:[#allocation3 + $0xe] ss:$2 sm:$0xff] }
 0x198   : > { %13022 = vmatprep.mubr.msk.f32.mxu0 %vm1186_vm1, %v1503_v33  ;;  %13327 = vmatprep.mubr.msk.f32.mxu1 %vm1186_vm1, %v4394_v34  ;;  %v15778_v33 = vpack.c.bf16 %v11668_v26, %v11667_v22  ;;  %v2184_v34 = vld [vmem:[#allocation3 + $0x33] ss:$2 sm:$0xff]  ;;  %v2442_v26 = vld [vmem:[#allocation3 + $0xa4] ss:$2 sm:$0xff] }
 0x199   : > { %v5120_v22 = vld [vmem:[#allocation3 + $0x7f] ss:$2 sm:$0xff] }
 0x19b   : > { %13023 = vmatmul.mubr.msk.f32.gmra.mrb[76].mxu0 %vm1186_vm1, %v1505_v35  ;;  %13328 = vmatmul.mubr.msk.f32.gmra.mrb[4].mxu1 %vm1186_vm1, %v4396_v36  ;;  %v4864_v35 = vld [vmem:[#allocation3 + $0x1e] ss:$2 sm:$0xff]  ;;  %v2186_v36 = vld [vmem:[#allocation3 + $0x43] ss:$2 sm:$0xff] }
 0x19c   : > { %13025 = vmatprep.mubr.msk.f32.mxu0 %vm1186_vm1, %v1507_v37  ;;  %13330 = vmatprep.mubr.msk.f32.mxu1 %vm1186_vm1, %v4398_v38  ;;  %v4866_v37 = vld [vmem:[#allocation3 + $0x2e] ss:$2 sm:$0xff]  ;;  %v2188_v38 = vld [vmem:[#allocation3 + $0x53] ss:$2 sm:$0xff] }
 0x19f   : > { %13026 = vmatmul.mubr.msk.f32.gmra.mrb[78].mxu0 %vm1186_vm1, %v1509_v39  ;;  %13331 = vmatmul.mubr.msk.f32.gmra.mrb[6].mxu1 %vm1186_vm1, %v4400_v40  ;;  %v4868_v39 = vld [vmem:[#allocation3 + $0x3e] ss:$2 sm:$0xff]  ;;  %v2190_v40 = vld [vmem:[#allocation3 + $0x63] ss:$2 sm:$0xff] }
 0x1a0   : > { %13032 = vmatprep.mubr.msk.f32.mxu0 %vm1186_vm1, %v1934_v41  ;;  %13333 = vmatprep.mubr.msk.f32.mxu1 %vm1186_vm1, %v4402_v42  ;;  %v4870_v41 = vld [vmem:[#allocation3 + $0x4e] ss:$2 sm:$0xff]  ;;  %v2192_v42 = vld [vmem:[#allocation3 + $0x73] ss:$2 sm:$0xff] }
 0x1a3   : > { %13033 = vmatmul.mubr.msk.f32.vlgmr.msra.gmra.mrb[64].mxu0 %vm1186_vm1, %v1936_v44  ;;  %13334 = vmatmul.mubr.msk.f32.gmra.mrb[8].mxu1 %vm1186_vm1, %v4404_v45  ;;  %v4874_v44 = vld [vmem:[#allocation3 + $0x6e] ss:$2 sm:$0xff]  ;;  %v2196_v45 = vld [vmem:[#allocation3 + $0x93] ss:$2 sm:$0xff] }
 0x1a4   : > { %13035 = vmatprep.mubr.msk.f32.mxu0 %vm1186_vm1, %v1938_v48  ;;  %13340 = vmatprep.mubr.msk.f32.mxu1 %vm1186_vm1, %v4618_v49  ;;  %v2200_v48 = vld [vmem:[#allocation3 + $0xb3] ss:$2 sm:$0xff]  ;;  %v4880_v49 = vld [vmem:[#allocation3 + $0x9e] ss:$2 sm:$0xff] }
 0x1a5   : > { %14123 = vmatpush3.bf16.msra.mxu0 %v15666_v1  ;;  %v4634_v1 = vld [vmem:[#allocation3 + $0x8d] ss:$2 sm:$0xff] }
 0x1a6   : > { %14125 = vmatprep.subr.bf16.mxu0 %v15718_v47 }
 0x1a7   : > { %13036 = vmatmul.mubr.msk.f32.gmra.mrb[66].mxu0 %vm1186_vm1, %v1940_v51  ;;  %13341 = vmatmul.mubr.msk.f32.vlgmr.msra.gmra.mrb[10].mxu1 %vm1186_vm1, %v4620_v52  ;;  %v4882_v51 = vld [vmem:[#allocation3 + $0xae] ss:$2 sm:$0xff]  ;;  %v2204_v52 = vld [vmem:[#allocation3 + $0xd3] ss:$2 sm:$0xff] }
 0x1a8   : > { %14167 = vmatpush3.bf16.msra.mxu1 %v15673_v5  ;;  %13038 = vmatprep.mubr.msk.f32.mxu0 %vm1186_vm1, %v1942_v53  ;;  %v1958_v5 = vld [vmem:[#allocation3 + $0xc2] ss:$2 sm:$0xff] }
 0x1a9   : > { %13343 = vmatprep.mubr.msk.f32.mxu1 %vm1186_vm1, %v4622_v32  ;;  %14169 = vmatprep.subr.bf16.mxu1 %v15725_v28  ;;  %v4884_v53 = vld [vmem:[#allocation3 + $0xbe] ss:$2 sm:$0xff]  ;;  %v2206_v32 = vld [vmem:[#allocation3 + $0xe3] ss:$2 sm:$0xff] }
 0x1ab   : > { %13039 = vmatmul.mubr.msk.f32.gmra.mrb[68].mxu0 %vm1186_vm1, %v1944_v54  ;;  %13344 = vmatmul.mubr.msk.f32.gmra.mrb[12].mxu1 %vm1186_vm1, %v4624_v55  ;;  %v4886_v54 = vld [vmem:[#allocation3 + $0xce] ss:$2 sm:$0xff]  ;;  %v2208_v55 = vld [vmem:[#allocation3 + $0xf3] ss:$2 sm:$0xff] }
 0x1ac   : > { %13041 = vmatprep.mubr.msk.f32.mxu0 %vm1186_vm1, %v1946_v56  ;;  %13346 = vmatprep.mubr.msk.f32.mxu1 %vm1186_vm1, %v4626_v57  ;;  %v4888_v56 = vld [vmem:[#allocation3 + $0xde] ss:$2 sm:$0xff] }
 0x1ad   : > { %v2422_v57 = vld [vmem:[#allocation3 + $0x4] ss:$2 sm:$0xff] }
 0x1af   : > { %13042 = vmatmul.mubr.msk.f32.gmra.mrb[70].mxu0 %vm1186_vm1, %v1948_v58  ;;  %13347 = vmatmul.mubr.msk.f32.gmra.mrb[14].mxu1 %vm1186_vm1, %v4628_v59  ;;  %v4890_v58 = vld [vmem:[#allocation3 + $0xee] ss:$2 sm:$0xff]  ;;  %v11487_v59 = vld [vmem:[%s16913_s3 + $0x60] sm:$0xff] }
 0x1b0   : > { %13044 = vmatprep.mubr.msk.f32.mxu0 %vm1186_vm1, %v1950_v60  ;;  %13349 = vmatprep.mubr.msk.f32.mxu1 %vm1186_vm1, %v4630_v61  ;;  %v11488_v60 = vld [vmem:[%s16913_s3 + $0x68] sm:$0xff]  ;;  %v2424_v61 = vld [vmem:[#allocation3 + $0x14] ss:$2 sm:$0xff] }
 0x1b3   : > { %13045 = vmatmul.mubr.msk.f32.gmra.mrb[72].mxu0 %vm1186_vm1, %v1952_v62  ;;  %13350 = vmatmul.mubr.msk.f32.gmra.mrb[0].mxu1 %vm1186_vm1, %v4632_v63  ;;  %v4892_v62 = vld [vmem:[#allocation3 + $0xfe] ss:$2 sm:$0xff]  ;;  %v11685_v63 = vld [vmem:[%s16913_s3 + $0x110] sm:$0xff] }
 0x1b4   : > { %13047 = vmatprep.mubr.msk.f32.mxu0 %vm1186_vm1, %v1954_v0  ;;  %13352 = vmatprep.mubr.msk.f32.mxu1 %vm1186_vm1, %v4634_v1  ;;  %v11686_v0 = vld [vmem:[%s16913_s3 + $0x118] sm:$0xff]  ;;  %v15823_v1 = vpack.c.bf16 %v11488_v60, %v11487_v59  ;;  %v5354_v59 = vld [vmem:[#allocation3 + $0x60] ss:$2 sm:$0xff]  ;;  %v2682_v60 = vld [vmem:[#allocation3 + $0x85] ss:$2 sm:$0xff] }
 0x1b7   : > { %13048 = vmatmul.mubr.msk.f32.gmra.mrb[74].mxu0 %vm1186_vm1, %v1956_v2  ;;  %13353 = vmatmul.mubr.msk.f32.gmra.mrb[2].mxu1 %vm1186_vm1, %v4636_v4  ;;  %v2426_v2 = vld [vmem:[#allocation3 + $0x24] ss:$2 sm:$0xff]  ;;  %v5106_v4 = vld [vmem:[#allocation3 + $0xf] ss:$2 sm:$0xff] }
 0x1b8   : > { %13050 = vmatprep.mubr.msk.f32.mxu0 %vm1186_vm1, %v1958_v5  ;;  %13355 = vmatprep.mubr.msk.f32.mxu1 %vm1186_vm1, %v4638_v6  ;;  %v15830_v5 = vpack.c.bf16 %v11686_v0, %v11685_v63  ;;  %v2428_v6 = vld [vmem:[#allocation3 + $0x34] ss:$2 sm:$0xff]  ;;  %v2686_v0 = vld [vmem:[#allocation3 + $0xa5] ss:$2 sm:$0xff] }
 0x1b9   : > { %v5356_v63 = vld [vmem:[#allocation3 + $0x80] ss:$2 sm:$0xff] }
 0x1bb   : > { %13051 = vmatmul.mubr.msk.f32.gmra.mrb[76].mxu0 %vm1186_vm1, %v1960_v7  ;;  %13356 = vmatmul.mubr.msk.f32.gmra.mrb[4].mxu1 %vm1186_vm1, %v4640_v9  ;;  %v5108_v7 = vld [vmem:[#allocation3 + $0x1f] ss:$2 sm:$0xff]  ;;  %v2430_v9 = vld [vmem:[#allocation3 + $0x44] ss:$2 sm:$0xff] }
 0x1bc   : > { %13053 = vmatprep.mubr.msk.f32.mxu0 %vm1186_vm1, %v1962_v8  ;;  %13358 = vmatprep.mubr.msk.f32.mxu1 %vm1186_vm1, %v4642_v31  ;;  %v5110_v8 = vld [vmem:[#allocation3 + $0x2f] ss:$2 sm:$0xff]  ;;  %v2432_v31 = vld [vmem:[#allocation3 + $0x54] ss:$2 sm:$0xff] }
 0x1bf   : > { %13054 = vmatmul.mubr.msk.f32.gmra.mrb[78].mxu0 %vm1186_vm1, %v1964_v10  ;;  %13359 = vmatmul.mubr.msk.f32.gmra.mrb[6].mxu1 %vm1186_vm1, %v4644_v11  ;;  %v5112_v10 = vld [vmem:[#allocation3 + $0x3f] ss:$2 sm:$0xff]  ;;  %v2434_v11 = vld [vmem:[#allocation3 + $0x64] ss:$2 sm:$0xff] }
 0x1c0   : > { %13060 = vmatprep.mubr.msk.f32.mxu0 %vm1186_vm1, %v2178_v12  ;;  %13361 = vmatprep.mubr.msk.f32.mxu1 %vm1186_vm1, %v4646_v50  ;;  %v5114_v12 = vld [vmem:[#allocation3 + $0x4f] ss:$2 sm:$0xff]  ;;  %v2436_v50 = vld [vmem:[#allocation3 + $0x74] ss:$2 sm:$0xff] }
 0x1c3   : > { %13061 = vmatmul.mubr.msk.f32.vlgmr.msra.gmra.mrb[64].mxu0 %vm1186_vm1, %v2180_v15  ;;  %13362 = vmatmul.mubr.msk.f32.gmra.mrb[8].mxu1 %vm1186_vm1, %v4648_v16  ;;  %v5118_v15 = vld [vmem:[#allocation3 + $0x6f] ss:$2 sm:$0xff]  ;;  %v2440_v16 = vld [vmem:[#allocation3 + $0x94] ss:$2 sm:$0xff] }
 0x1c4   : > { %13063 = vmatprep.mubr.msk.f32.mxu0 %vm1186_vm1, %v2182_v29  ;;  %13368 = vmatprep.mubr.msk.f32.mxu1 %vm1186_vm1, %v4862_v30  ;;  %v2444_v29 = vld [vmem:[#allocation3 + $0xb4] ss:$2 sm:$0xff]  ;;  %v5124_v30 = vld [vmem:[#allocation3 + $0x9f] ss:$2 sm:$0xff] }
 0x1c5   : > { %14127 = vmatpush3.bf16.msra.mxu0 %v15718_v47  ;;  %v4878_v47 = vld [vmem:[#allocation3 + $0x8e] ss:$2 sm:$0xff] }
 0x1c6   : > { %14129 = vmatprep.subr.bf16.mxu0 %v15771_v27 }
 0x1c7   : > { %13064 = vmatmul.mubr.msk.f32.gmra.mrb[66].mxu0 %vm1186_vm1, %v2184_v34  ;;  %13369 = vmatmul.mubr.msk.f32.vlgmr.msra.gmra.mrb[10].mxu1 %vm1186_vm1, %v4864_v35  ;;  %v5126_v34 = vld [vmem:[#allocation3 + $0xaf] ss:$2 sm:$0xff]  ;;  %v2448_v35 = vld [vmem:[#allocation3 + $0xd4] ss:$2 sm:$0xff] }
 0x1c8   : > { %14171 = vmatpush3.bf16.msra.mxu1 %v15725_v28  ;;  %13066 = vmatprep.mubr.msk.f32.mxu0 %vm1186_vm1, %v2186_v36  ;;  %v2202_v28 = vld [vmem:[#allocation3 + $0xc3] ss:$2 sm:$0xff] }
 0x1c9   : > { %13371 = vmatprep.mubr.msk.f32.mxu1 %vm1186_vm1, %v4866_v37  ;;  %14173 = vmatprep.subr.bf16.mxu1 %v15778_v33  ;;  %v5128_v36 = vld [vmem:[#allocation3 + $0xbf] ss:$2 sm:$0xff]  ;;  %v2450_v37 = vld [vmem:[#allocation3 + $0xe4] ss:$2 sm:$0xff] }
 0x1cb   : > { %13067 = vmatmul.mubr.msk.f32.gmra.mrb[68].mxu0 %vm1186_vm1, %v2188_v38  ;;  %13372 = vmatmul.mubr.msk.f32.gmra.mrb[12].mxu1 %vm1186_vm1, %v4868_v39  ;;  %v5130_v38 = vld [vmem:[#allocation3 + $0xcf] ss:$2 sm:$0xff]  ;;  %v2452_v39 = vld [vmem:[#allocation3 + $0xf4] ss:$2 sm:$0xff] }
 0x1cc   : > { %13069 = vmatprep.mubr.msk.f32.mxu0 %vm1186_vm1, %v2190_v40  ;;  %13374 = vmatprep.mubr.msk.f32.mxu1 %vm1186_vm1, %v4870_v41  ;;  %v5132_v40 = vld [vmem:[#allocation3 + $0xdf] ss:$2 sm:$0xff] }
 0x1cd   : > { %v2666_v41 = vld [vmem:[#allocation3 + $0x5] ss:$2 sm:$0xff] }
 0x1cf   : > { %13070 = vmatmul.mubr.msk.f32.gmra.mrb[70].mxu0 %vm1186_vm1, %v2192_v42  ;;  %13375 = vmatmul.mubr.msk.f32.gmra.mrb[14].mxu1 %vm1186_vm1, %v4872_v43  ;;  %v5134_v42 = vld [vmem:[#allocation3 + $0xef] ss:$2 sm:$0xff] }
 0x1d0   : > { %13072 = vmatprep.mubr.msk.f32.mxu0 %vm1186_vm1, %v2194_v23  ;;  %13377 = vmatprep.mubr.msk.f32.mxu1 %vm1186_vm1, %v4874_v44  ;;  %v11505_v43 = vld [vmem:[%s16913_s3 + $0x70] sm:$0xff]  ;;  %v11506_v23 = vld [vmem:[%s16913_s3 + $0x78] sm:$0xff] }
 0x1d1   : > { %v2668_v44 = vld [vmem:[#allocation3 + $0x15] ss:$2 sm:$0xff] }
 0x1d3   : > { %13073 = vmatmul.mubr.msk.f32.gmra.mrb[72].mxu0 %vm1186_vm1, %v2196_v45  ;;  %13378 = vmatmul.mubr.msk.f32.gmra.mrb[0].mxu1 %vm1186_vm1, %v4876_v46  ;;  %v5136_v45 = vld [vmem:[#allocation3 + $0xff] ss:$2 sm:$0xff] }
 0x1d4   : > { %13075 = vmatprep.mubr.msk.f32.mxu0 %vm1186_vm1, %v2198_v17  ;;  %13380 = vmatprep.mubr.msk.f32.mxu1 %vm1186_vm1, %v4878_v47  ;;  %v11703_v46 = vld [vmem:[%s16913_s3 + $0x120] sm:$0xff]  ;;  %v11704_v17 = vld [vmem:[%s16913_s3 + $0x128] sm:$0xff]  ;;  %v15875_v47 = vpack.c.bf16 %v11506_v23, %v11505_v43 }
 0x1d5   : > { %v5583_v43 = vld [vmem:[#allocation3 + $0x61] ss:$2 sm:$0xff]  ;;  %v2926_v23 = vld [vmem:[#allocation3 + $0x86] ss:$2 sm:$0xff] }
 0x1d7   : > { %13076 = vmatmul.mubr.msk.f32.gmra.mrb[74].mxu0 %vm1186_vm1, %v2200_v48  ;;  %13381 = vmatmul.mubr.msk.f32.gmra.mrb[2].mxu1 %vm1186_vm1, %v4880_v49  ;;  %v2670_v48 = vld [vmem:[#allocation3 + $0x25] ss:$2 sm:$0xff]  ;;  %v5349_v49 = vld [vmem:[#allocation3 + $0x10] ss:$2 sm:$0xff] }
 0x1d8   : > { %13078 = vmatprep.mubr.msk.f32.mxu0 %vm1186_vm1, %v2202_v28  ;;  %13383 = vmatprep.mubr.msk.f32.mxu1 %vm1186_vm1, %v4882_v51  ;;  %v15882_v28 = vpack.c.bf16 %v11704_v17, %v11703_v46  ;;  %v2672_v51 = vld [vmem:[#allocation3 + $0x35] ss:$2 sm:$0xff]  ;;  %v2930_v17 = vld [vmem:[#allocation3 + $0xa6] ss:$2 sm:$0xff] }
 0x1d9   : > { %v5585_v46 = vld [vmem:[#allocation3 + $0x81] ss:$2 sm:$0xff] }
 0x1db   : > { %13079 = vmatmul.mubr.msk.f32.gmra.mrb[76].mxu0 %vm1186_vm1, %v2204_v52  ;;  %13384 = vmatmul.mubr.msk.f32.gmra.mrb[4].mxu1 %vm1186_vm1, %v4884_v53  ;;  %v5350_v52 = vld [vmem:[#allocation3 + $0x20] ss:$2 sm:$0xff]  ;;  %v2674_v53 = vld [vmem:[#allocation3 + $0x45] ss:$2 sm:$0xff] }
 0x1dc   : > { %13081 = vmatprep.mubr.msk.f32.mxu0 %vm1186_vm1, %v2206_v32  ;;  %13386 = vmatprep.mubr.msk.f32.mxu1 %vm1186_vm1, %v4886_v54  ;;  %v5351_v32 = vld [vmem:[#allocation3 + $0x30] ss:$2 sm:$0xff]  ;;  %v2676_v54 = vld [vmem:[#allocation3 + $0x55] ss:$2 sm:$0xff] }
 0x1df   : > { %13082 = vmatmul.mubr.msk.f32.gmra.mrb[78].mxu0 %vm1186_vm1, %v2208_v55  ;;  %13387 = vmatmul.mubr.msk.f32.gmra.mrb[6].mxu1 %vm1186_vm1, %v4888_v56  ;;  %v5352_v55 = vld [vmem:[#allocation3 + $0x40] ss:$2 sm:$0xff]  ;;  %v2678_v56 = vld [vmem:[#allocation3 + $0x65] ss:$2 sm:$0xff] }
 0x1e0   : > { %13088 = vmatprep.mubr.msk.f32.mxu0 %vm1186_vm1, %v2422_v57  ;;  %13389 = vmatprep.mubr.msk.f32.mxu1 %vm1186_vm1, %v4890_v58  ;;  %v5353_v57 = vld [vmem:[#allocation3 + $0x50] ss:$2 sm:$0xff]  ;;  %v2680_v58 = vld [vmem:[#allocation3 + $0x75] ss:$2 sm:$0xff] }
 0x1e3   : > { %13089 = vmatmul.mubr.msk.f32.vlgmr.msra.gmra.mrb[64].mxu0 %vm1186_vm1, %v2424_v61  ;;  %13390 = vmatmul.mubr.msk.f32.gmra.mrb[8].mxu1 %vm1186_vm1, %v4892_v62  ;;  %v5355_v61 = vld [vmem:[#allocation3 + $0x70] ss:$2 sm:$0xff]  ;;  %v2684_v62 = vld [vmem:[#allocation3 + $0x95] ss:$2 sm:$0xff] }
 0x1e4   : > { %13091 = vmatprep.mubr.msk.f32.mxu0 %vm1186_vm1, %v2426_v2  ;;  %13396 = vmatprep.mubr.msk.f32.mxu1 %vm1186_vm1, %v5106_v4  ;;  %v2688_v2 = vld [vmem:[#allocation3 + $0xb5] ss:$2 sm:$0xff]  ;;  %v5358_v4 = vld [vmem:[#allocation3 + $0xa0] ss:$2 sm:$0xff] }
 0x1e5   : > { %14131 = vmatpush3.bf16.msra.mxu0 %v15771_v27  ;;  %v5122_v27 = vld [vmem:[#allocation3 + $0x8f] ss:$2 sm:$0xff] }
 0x1e6   : > { %14133 = vmatprep.subr.bf16.mxu0 %v15823_v1 }
 0x1e7   : > { %13092 = vmatmul.mubr.msk.f32.gmra.mrb[66].mxu0 %vm1186_vm1, %v2428_v6  ;;  %13397 = vmatmul.mubr.msk.f32.vlgmr.msra.gmra.mrb[10].mxu1 %vm1186_vm1, %v5108_v7  ;;  %v5359_v6 = vld [vmem:[#allocation3 + $0xb0] ss:$2 sm:$0xff]  ;;  %v2692_v7 = vld [vmem:[#allocation3 + $0xd5] ss:$2 sm:$0xff] }
 0x1e8   : > { %14175 = vmatpush3.bf16.msra.mxu1 %v15778_v33  ;;  %13094 = vmatprep.mubr.msk.f32.mxu0 %vm1186_vm1, %v2430_v9  ;;  %v2446_v33 = vld [vmem:[#allocation3 + $0xc4] ss:$2 sm:$0xff] }
 0x1e9   : > { %13399 = vmatprep.mubr.msk.f32.mxu1 %vm1186_vm1, %v5110_v8  ;;  %14177 = vmatprep.subr.bf16.mxu1 %v15830_v5  ;;  %v5360_v9 = vld [vmem:[#allocation3 + $0xc0] ss:$2 sm:$0xff]  ;;  %v2694_v8 = vld [vmem:[#allocation3 + $0xe5] ss:$2 sm:$0xff] }
 0x1eb   : > { %13095 = vmatmul.mubr.msk.f32.gmra.mrb[68].mxu0 %vm1186_vm1, %v2432_v31  ;;  %13400 = vmatmul.mubr.msk.f32.gmra.mrb[12].mxu1 %vm1186_vm1, %v5112_v10  ;;  %v5361_v31 = vld [vmem:[#allocation3 + $0xd0] ss:$2 sm:$0xff]  ;;  %v2696_v10 = vld [vmem:[#allocation3 + $0xf5] ss:$2 sm:$0xff] }
 0x1ec   : > { %13097 = vmatprep.mubr.msk.f32.mxu0 %vm1186_vm1, %v2434_v11  ;;  %13402 = vmatprep.mubr.msk.f32.mxu1 %vm1186_vm1, %v5114_v12  ;;  %v5362_v11 = vld [vmem:[#allocation3 + $0xe0] ss:$2 sm:$0xff] }
 0x1ed   : > { %v2910_v12 = vld [vmem:[#allocation3 + $0x6] ss:$2 sm:$0xff] }
 0x1ef   : > { %13098 = vmatmul.mubr.msk.f32.gmra.mrb[70].mxu0 %vm1186_vm1, %v2436_v50  ;;  %13403 = vmatmul.mubr.msk.f32.gmra.mrb[14].mxu1 %vm1186_vm1, %v5116_v13  ;;  %v5363_v50 = vld [vmem:[#allocation3 + $0xf0] ss:$2 sm:$0xff]  ;;  %v11523_v13 = vld [vmem:[%s16913_s3 + $0x80] sm:$0xff] }
 0x1f0   : > { %13100 = vmatprep.mubr.msk.f32.mxu0 %vm1186_vm1, %v2438_v14  ;;  %13405 = vmatprep.mubr.msk.f32.mxu1 %vm1186_vm1, %v5118_v15  ;;  %v11524_v14 = vld [vmem:[%s16913_s3 + $0x88] sm:$0xff]  ;;  %v2912_v15 = vld [vmem:[#allocation3 + $0x16] ss:$2 sm:$0xff] }
 0x1f3   : > { %13101 = vmatmul.mubr.msk.f32.gmra.mrb[72].mxu0 %vm1186_vm1, %v2440_v16  ;;  %13406 = vmatmul.mubr.msk.f32.gmra.mrb[0].mxu1 %vm1186_vm1, %v5120_v22  ;;  %v5365_v16 = vld [vmem:[#allocation3 + $0x100] ss:$2 sm:$0xff]  ;;  %v11721_v22 = vld [vmem:[%s16913_s3 + $0x130] sm:$0xff] }
 0x1f4   : > { %13103 = vmatprep.mubr.msk.f32.mxu0 %vm1186_vm1, %v2442_v26  ;;  %13408 = vmatprep.mubr.msk.f32.mxu1 %vm1186_vm1, %v5122_v27  ;;  %v11722_v26 = vld [vmem:[%s16913_s3 + $0x138] sm:$0xff]  ;;  %v15927_v27 = vpack.c.bf16 %v11524_v14, %v11523_v13  ;;  %v5812_v13 = vld [vmem:[#allocation3 + $0x62] ss:$2 sm:$0xff]  ;;  %v3170_v14 = vld [vmem:[#allocation3 + $0x87] ss:$2 sm:$0xff] }
 0x1f7   : > { %13104 = vmatmul.mubr.msk.f32.gmra.mrb[74].mxu0 %vm1186_vm1, %v2444_v29  ;;  %13409 = vmatmul.mubr.msk.f32.gmra.mrb[2].mxu1 %vm1186_vm1, %v5124_v30  ;;  %v2914_v29 = vld [vmem:[#allocation3 + $0x26] ss:$2 sm:$0xff]  ;;  %v5578_v30 = vld [vmem:[#allocation3 + $0x11] ss:$2 sm:$0xff] }
 0x1f8   : > { %13106 = vmatprep.mubr.msk.f32.mxu0 %vm1186_vm1, %v2446_v33  ;;  %13411 = vmatprep.mubr.msk.f32.mxu1 %vm1186_vm1, %v5126_v34  ;;  %v15934_v33 = vpack.c.bf16 %v11722_v26, %v11721_v22  ;;  %v2916_v34 = vld [vmem:[#allocation3 + $0x36] ss:$2 sm:$0xff]  ;;  %v3174_v26 = vld [vmem:[#allocation3 + $0xa7] ss:$2 sm:$0xff] }
 0x1f9   : > { %v5814_v22 = vld [vmem:[#allocation3 + $0x82] ss:$2 sm:$0xff] }
 0x1fb   : > { %13107 = vmatmul.mubr.msk.f32.gmra.mrb[76].mxu0 %vm1186_vm1, %v2448_v35  ;;  %13412 = vmatmul.mubr.msk.f32.gmra.mrb[4].mxu1 %vm1186_vm1, %v5128_v36  ;;  %v5579_v35 = vld [vmem:[#allocation3 + $0x21] ss:$2 sm:$0xff]  ;;  %v2918_v36 = vld [vmem:[#allocation3 + $0x46] ss:$2 sm:$0xff] }
 0x1fc   : > { %13109 = vmatprep.mubr.msk.f32.mxu0 %vm1186_vm1, %v2450_v37  ;;  %13414 = vmatprep.mubr.msk.f32.mxu1 %vm1186_vm1, %v5130_v38  ;;  %v5580_v37 = vld [vmem:[#allocation3 + $0x31] ss:$2 sm:$0xff]  ;;  %v2920_v38 = vld [vmem:[#allocation3 + $0x56] ss:$2 sm:$0xff] }
 0x1ff   : > { %13110 = vmatmul.mubr.msk.f32.gmra.mrb[78].mxu0 %vm1186_vm1, %v2452_v39  ;;  %13415 = vmatmul.mubr.msk.f32.gmra.mrb[6].mxu1 %vm1186_vm1, %v5132_v40  ;;  %v5581_v39 = vld [vmem:[#allocation3 + $0x41] ss:$2 sm:$0xff]  ;;  %v2922_v40 = vld [vmem:[#allocation3 + $0x66] ss:$2 sm:$0xff] }
 0x200   : > { %13116 = vmatprep.mubr.msk.f32.mxu0 %vm1186_vm1, %v2666_v41  ;;  %13417 = vmatprep.mubr.msk.f32.mxu1 %vm1186_vm1, %v5134_v42  ;;  %v5582_v41 = vld [vmem:[#allocation3 + $0x51] ss:$2 sm:$0xff]  ;;  %v2924_v42 = vld [vmem:[#allocation3 + $0x76] ss:$2 sm:$0xff] }
 0x203   : > { %13117 = vmatmul.mubr.msk.f32.vlgmr.msra.gmra.mrb[64].mxu0 %vm1186_vm1, %v2668_v44  ;;  %13418 = vmatmul.mubr.msk.f32.gmra.mrb[8].mxu1 %vm1186_vm1, %v5136_v45  ;;  %v5584_v44 = vld [vmem:[#allocation3 + $0x71] ss:$2 sm:$0xff]  ;;  %v2928_v45 = vld [vmem:[#allocation3 + $0x96] ss:$2 sm:$0xff] }
 0x204   : > { %13119 = vmatprep.mubr.msk.f32.mxu0 %vm1186_vm1, %v2670_v48  ;;  %13424 = vmatprep.mubr.msk.f32.mxu1 %vm1186_vm1, %v5349_v49  ;;  %v2932_v48 = vld [vmem:[#allocation3 + $0xb6] ss:$2 sm:$0xff]  ;;  %v5587_v49 = vld [vmem:[#allocation3 + $0xa1] ss:$2 sm:$0xff] }
 0x205   : > { %14135 = vmatpush3.bf16.msra.mxu0 %v15823_v1  ;;  %v5357_v1 = vld [vmem:[#allocation3 + $0x90] ss:$2 sm:$0xff] }
 0x206   : > { %14137 = vmatprep.subr.bf16.mxu0 %v15875_v47 }
 0x207   : > { %13120 = vmatmul.mubr.msk.f32.gmra.mrb[66].mxu0 %vm1186_vm1, %v2672_v51  ;;  %13425 = vmatmul.mubr.msk.f32.vlgmr.msra.gmra.mrb[10].mxu1 %vm1186_vm1, %v5350_v52  ;;  %v5588_v51 = vld [vmem:[#allocation3 + $0xb1] ss:$2 sm:$0xff]  ;;  %v2936_v52 = vld [vmem:[#allocation3 + $0xd6] ss:$2 sm:$0xff] }
 0x208   : > { %14179 = vmatpush3.bf16.msra.mxu1 %v15830_v5  ;;  %13122 = vmatprep.mubr.msk.f32.mxu0 %vm1186_vm1, %v2674_v53  ;;  %v2690_v5 = vld [vmem:[#allocation3 + $0xc5] ss:$2 sm:$0xff] }
 0x209   : > { %13427 = vmatprep.mubr.msk.f32.mxu1 %vm1186_vm1, %v5351_v32  ;;  %14181 = vmatprep.subr.bf16.mxu1 %v15882_v28  ;;  %v5589_v53 = vld [vmem:[#allocation3 + $0xc1] ss:$2 sm:$0xff]  ;;  %v2938_v32 = vld [vmem:[#allocation3 + $0xe6] ss:$2 sm:$0xff] }
 0x20b   : > { %13123 = vmatmul.mubr.msk.f32.gmra.mrb[68].mxu0 %vm1186_vm1, %v2676_v54  ;;  %13428 = vmatmul.mubr.msk.f32.gmra.mrb[12].mxu1 %vm1186_vm1, %v5352_v55  ;;  %v5590_v54 = vld [vmem:[#allocation3 + $0xd1] ss:$2 sm:$0xff]  ;;  %v2940_v55 = vld [vmem:[#allocation3 + $0xf6] ss:$2 sm:$0xff] }
 0x20c   : > { %13125 = vmatprep.mubr.msk.f32.mxu0 %vm1186_vm1, %v2678_v56  ;;  %13430 = vmatprep.mubr.msk.f32.mxu1 %vm1186_vm1, %v5353_v57  ;;  %v5591_v56 = vld [vmem:[#allocation3 + $0xe1] ss:$2 sm:$0xff] }
 0x20d   : > { %v3154_v57 = vld [vmem:[#allocation3 + $0x7] ss:$2 sm:$0xff] }
 0x20f   : > { %13126 = vmatmul.mubr.msk.f32.gmra.mrb[70].mxu0 %vm1186_vm1, %v2680_v58  ;;  %13431 = vmatmul.mubr.msk.f32.gmra.mrb[14].mxu1 %vm1186_vm1, %v5354_v59  ;;  %v5592_v58 = vld [vmem:[#allocation3 + $0xf1] ss:$2 sm:$0xff] }
 0x210   : > { %13128 = vmatprep.mubr.msk.f32.mxu0 %vm1186_vm1, %v2682_v60  ;;  %13433 = vmatprep.mubr.msk.f32.mxu1 %vm1186_vm1, %v5355_v61  ;;  %v11541_v59 = vld [vmem:[%s16913_s3 + $0x90] sm:$0xff]  ;;  %v11542_v60 = vld [vmem:[%s16913_s3 + $0x98] sm:$0xff] }
 0x211   : > { %v3156_v61 = vld [vmem:[#allocation3 + $0x17] ss:$2 sm:$0xff] }
 0x213   : > { %13129 = vmatmul.mubr.msk.f32.gmra.mrb[72].mxu0 %vm1186_vm1, %v2684_v62  ;;  %13434 = vmatmul.mubr.msk.f32.gmra.mrb[0].mxu1 %vm1186_vm1, %v5356_v63  ;;  %v5594_v62 = vld [vmem:[#allocation3 + $0x101] ss:$2 sm:$0xff] }
 0x214   : > { %13131 = vmatprep.mubr.msk.f32.mxu0 %vm1186_vm1, %v2686_v0  ;;  %13436 = vmatprep.mubr.msk.f32.mxu1 %vm1186_vm1, %v5357_v1  ;;  %v11739_v63 = vld [vmem:[%s16913_s3 + $0x140] sm:$0xff]  ;;  %v11740_v0 = vld [vmem:[%s16913_s3 + $0x148] sm:$0xff]  ;;  %v15979_v1 = vpack.c.bf16 %v11542_v60, %v11541_v59 }
 0x215   : > { %v6041_v59 = vld [vmem:[#allocation3 + $0x63] ss:$2 sm:$0xff]  ;;  %v3414_v60 = vld [vmem:[#allocation3 + $0x88] ss:$2 sm:$0xff] }
 0x217   : > { %13132 = vmatmul.mubr.msk.f32.gmra.mrb[74].mxu0 %vm1186_vm1, %v2688_v2  ;;  %13437 = vmatmul.mubr.msk.f32.gmra.mrb[2].mxu1 %vm1186_vm1, %v5358_v4  ;;  %v3158_v2 = vld [vmem:[#allocation3 + $0x27] ss:$2 sm:$0xff]  ;;  %v5807_v4 = vld [vmem:[#allocation3 + $0x12] ss:$2 sm:$0xff] }
 0x218   : > { %13134 = vmatprep.mubr.msk.f32.mxu0 %vm1186_vm1, %v2690_v5  ;;  %13439 = vmatprep.mubr.msk.f32.mxu1 %vm1186_vm1, %v5359_v6  ;;  %v15986_v5 = vpack.c.bf16 %v11740_v0, %v11739_v63  ;;  %v3160_v6 = vld [vmem:[#allocation3 + $0x37] ss:$2 sm:$0xff]  ;;  %v3418_v0 = vld [vmem:[#allocation3 + $0xa8] ss:$2 sm:$0xff] }
 0x219   : > { %v6043_v63 = vld [vmem:[#allocation3 + $0x83] ss:$2 sm:$0xff] }
 0x21b   : > { %13135 = vmatmul.mubr.msk.f32.gmra.mrb[76].mxu0 %vm1186_vm1, %v2692_v7  ;;  %13440 = vmatmul.mubr.msk.f32.gmra.mrb[4].mxu1 %vm1186_vm1, %v5360_v9  ;;  %v5808_v7 = vld [vmem:[#allocation3 + $0x22] ss:$2 sm:$0xff]  ;;  %v3162_v9 = vld [vmem:[#allocation3 + $0x47] ss:$2 sm:$0xff] }
 0x21c   : > { %13137 = vmatprep.mubr.msk.f32.mxu0 %vm1186_vm1, %v2694_v8  ;;  %13442 = vmatprep.mubr.msk.f32.mxu1 %vm1186_vm1, %v5361_v31  ;;  %v5809_v8 = vld [vmem:[#allocation3 + $0x32] ss:$2 sm:$0xff]  ;;  %v3164_v31 = vld [vmem:[#allocation3 + $0x57] ss:$2 sm:$0xff] }
 0x21f   : > { %13138 = vmatmul.mubr.msk.f32.gmra.mrb[78].mxu0 %vm1186_vm1, %v2696_v10  ;;  %13443 = vmatmul.mubr.msk.f32.gmra.mrb[6].mxu1 %vm1186_vm1, %v5362_v11  ;;  %v5810_v10 = vld [vmem:[#allocation3 + $0x42] ss:$2 sm:$0xff]  ;;  %v3166_v11 = vld [vmem:[#allocation3 + $0x67] ss:$2 sm:$0xff] }
 0x220   : > { %13144 = vmatprep.mubr.msk.f32.mxu0 %vm1186_vm1, %v2910_v12  ;;  %13445 = vmatprep.mubr.msk.f32.mxu1 %vm1186_vm1, %v5363_v50  ;;  %v5811_v12 = vld [vmem:[#allocation3 + $0x52] ss:$2 sm:$0xff]  ;;  %v3168_v50 = vld [vmem:[#allocation3 + $0x77] ss:$2 sm:$0xff] }
 0x223   : > { %13145 = vmatmul.mubr.msk.f32.vlgmr.msra.gmra.mrb[64].mxu0 %vm1186_vm1, %v2912_v15  ;;  %13446 = vmatmul.mubr.msk.f32.gmra.mrb[8].mxu1 %vm1186_vm1, %v5365_v16  ;;  %v5813_v15 = vld [vmem:[#allocation3 + $0x72] ss:$2 sm:$0xff]  ;;  %v3172_v16 = vld [vmem:[#allocation3 + $0x97] ss:$2 sm:$0xff] }
 0x224   : > { %13147 = vmatprep.mubr.msk.f32.mxu0 %vm1186_vm1, %v2914_v29  ;;  %13452 = vmatprep.mubr.msk.f32.mxu1 %vm1186_vm1, %v5578_v30  ;;  %v3176_v29 = vld [vmem:[#allocation3 + $0xb7] ss:$2 sm:$0xff]  ;;  %v5816_v30 = vld [vmem:[#allocation3 + $0xa2] ss:$2 sm:$0xff] }
 0x225   : > { %14139 = vmatpush3.bf16.msra.mxu0 %v15875_v47  ;;  %v5586_v47 = vld [vmem:[#allocation3 + $0x91] ss:$2 sm:$0xff] }
 0x226   : > { %14141 = vmatprep.subr.bf16.mxu0 %v15927_v27 }
 0x227   : > { %13148 = vmatmul.mubr.msk.f32.gmra.mrb[66].mxu0 %vm1186_vm1, %v2916_v34  ;;  %13453 = vmatmul.mubr.msk.f32.vlgmr.msra.gmra.mrb[10].mxu1 %vm1186_vm1, %v5579_v35  ;;  %v5817_v34 = vld [vmem:[#allocation3 + $0xb2] ss:$2 sm:$0xff]  ;;  %v3180_v35 = vld [vmem:[#allocation3 + $0xd7] ss:$2 sm:$0xff] }
 0x228   : > { %14183 = vmatpush3.bf16.msra.mxu1 %v15882_v28  ;;  %13150 = vmatprep.mubr.msk.f32.mxu0 %vm1186_vm1, %v2918_v36  ;;  %v2934_v28 = vld [vmem:[#allocation3 + $0xc6] ss:$2 sm:$0xff] }
 0x229   : > { %13455 = vmatprep.mubr.msk.f32.mxu1 %vm1186_vm1, %v5580_v37  ;;  %14185 = vmatprep.subr.bf16.mxu1 %v15934_v33  ;;  %v5818_v36 = vld [vmem:[#allocation3 + $0xc2] ss:$2 sm:$0xff]  ;;  %v3182_v37 = vld [vmem:[#allocation3 + $0xe7] ss:$2 sm:$0xff] }
 0x22b   : > { %13151 = vmatmul.mubr.msk.f32.gmra.mrb[68].mxu0 %vm1186_vm1, %v2920_v38  ;;  %13456 = vmatmul.mubr.msk.f32.gmra.mrb[12].mxu1 %vm1186_vm1, %v5581_v39  ;;  %v5819_v38 = vld [vmem:[#allocation3 + $0xd2] ss:$2 sm:$0xff]  ;;  %v3184_v39 = vld [vmem:[#allocation3 + $0xf7] ss:$2 sm:$0xff] }
 0x22c   : > { %13153 = vmatprep.mubr.msk.f32.mxu0 %vm1186_vm1, %v2922_v40  ;;  %13458 = vmatprep.mubr.msk.f32.mxu1 %vm1186_vm1, %v5582_v41  ;;  %v5820_v40 = vld [vmem:[#allocation3 + $0xe2] ss:$2 sm:$0xff] }
 0x22d   : > { %v3398_v41 = vld [vmem:[#allocation3 + $0x8] ss:$2 sm:$0xff] }
 0x22f   : > { %13154 = vmatmul.mubr.msk.f32.gmra.mrb[70].mxu0 %vm1186_vm1, %v2924_v42  ;;  %13459 = vmatmul.mubr.msk.f32.gmra.mrb[14].mxu1 %vm1186_vm1, %v5583_v43  ;;  %v5821_v42 = vld [vmem:[#allocation3 + $0xf2] ss:$2 sm:$0xff] }
 0x230   : > { %13156 = vmatprep.mubr.msk.f32.mxu0 %vm1186_vm1, %v2926_v23  ;;  %13461 = vmatprep.mubr.msk.f32.mxu1 %vm1186_vm1, %v5584_v44  ;;  %v11559_v43 = vld [vmem:[%s16913_s3 + $0xa0] sm:$0xff]  ;;  %v11560_v23 = vld [vmem:[%s16913_s3 + $0xa8] sm:$0xff] }
 0x231   : > { %v3400_v44 = vld [vmem:[#allocation3 + $0x18] ss:$2 sm:$0xff] }
 0x233   : > { %13157 = vmatmul.mubr.msk.f32.gmra.mrb[72].mxu0 %vm1186_vm1, %v2928_v45  ;;  %13462 = vmatmul.mubr.msk.f32.gmra.mrb[0].mxu1 %vm1186_vm1, %v5585_v46  ;;  %v5823_v45 = vld [vmem:[#allocation3 + $0x102] ss:$2 sm:$0xff] }
 0x234   : > { %13159 = vmatprep.mubr.msk.f32.mxu0 %vm1186_vm1, %v2930_v17  ;;  %13464 = vmatprep.mubr.msk.f32.mxu1 %vm1186_vm1, %v5586_v47  ;;  %v11757_v46 = vld [vmem:[%s16913_s3 + $0x150] sm:$0xff]  ;;  %v11758_v17 = vld [vmem:[%s16913_s3 + $0x158] sm:$0xff]  ;;  %v16031_v47 = vpack.c.bf16 %v11560_v23, %v11559_v43 }
 0x235   : > { %v3660_v43 = vld [vmem:[#allocation3 + $0x99] ss:$2 sm:$0xff]  ;;  %v6272_v23 = vld [vmem:[#allocation3 + $0x84] ss:$2 sm:$0xff] }
 0x237   : > { %13160 = vmatmul.mubr.msk.f32.gmra.mrb[74].mxu0 %vm1186_vm1, %v2932_v48  ;;  %13465 = vmatmul.mubr.msk.f32.gmra.mrb[2].mxu1 %vm1186_vm1, %v5587_v49  ;;  %v3402_v48 = vld [vmem:[#allocation3 + $0x28] ss:$2 sm:$0xff]  ;;  %v6036_v49 = vld [vmem:[#allocation3 + $0x13] ss:$2 sm:$0xff] }
 0x238   : > { %13162 = vmatprep.mubr.msk.f32.mxu0 %vm1186_vm1, %v2934_v28  ;;  %13467 = vmatprep.mubr.msk.f32.mxu1 %vm1186_vm1, %v5588_v51  ;;  %v16038_v28 = vpack.c.bf16 %v11758_v17, %v11757_v46  ;;  %v3404_v51 = vld [vmem:[#allocation3 + $0x38] ss:$2 sm:$0xff]  ;;  %v3664_v46 = vld [vmem:[#allocation3 + $0xb9] ss:$2 sm:$0xff] }
 0x239   : > { %v6274_v17 = vld [vmem:[#allocation3 + $0xa4] ss:$2 sm:$0xff] }
 0x23b   : > { %13163 = vmatmul.mubr.msk.f32.gmra.mrb[76].mxu0 %vm1186_vm1, %v2936_v52  ;;  %13468 = vmatmul.mubr.msk.f32.gmra.mrb[4].mxu1 %vm1186_vm1, %v5589_v53  ;;  %v6037_v52 = vld [vmem:[#allocation3 + $0x23] ss:$2 sm:$0xff]  ;;  %v3406_v53 = vld [vmem:[#allocation3 + $0x48] ss:$2 sm:$0xff] }
 0x23c   : > { %13165 = vmatprep.mubr.msk.f32.mxu0 %vm1186_vm1, %v2938_v32  ;;  %13470 = vmatprep.mubr.msk.f32.mxu1 %vm1186_vm1, %v5590_v54  ;;  %v6038_v32 = vld [vmem:[#allocation3 + $0x33] ss:$2 sm:$0xff]  ;;  %v3408_v54 = vld [vmem:[#allocation3 + $0x58] ss:$2 sm:$0xff] }
 0x23f   : > { %13166 = vmatmul.mubr.msk.f32.gmra.mrb[78].mxu0 %vm1186_vm1, %v2940_v55  ;;  %13471 = vmatmul.mubr.msk.f32.gmra.mrb[6].mxu1 %vm1186_vm1, %v5591_v56  ;;  %v6039_v55 = vld [vmem:[#allocation3 + $0x43] ss:$2 sm:$0xff]  ;;  %v3410_v56 = vld [vmem:[#allocation3 + $0x68] ss:$2 sm:$0xff] }
 0x240   : > { %13172 = vmatprep.mubr.msk.f32.mxu0 %vm1186_vm1, %v3154_v57  ;;  %13473 = vmatprep.mubr.msk.f32.mxu1 %vm1186_vm1, %v5592_v58  ;;  %v6040_v57 = vld [vmem:[#allocation3 + $0x53] ss:$2 sm:$0xff]  ;;  %v3412_v58 = vld [vmem:[#allocation3 + $0x78] ss:$2 sm:$0xff] }
 0x243   : > { %13173 = vmatmul.mubr.msk.f32.vlgmr.msra.gmra.mrb[64].mxu0 %vm1186_vm1, %v3156_v61  ;;  %13474 = vmatmul.mubr.msk.f32.gmra.mrb[8].mxu1 %vm1186_vm1, %v5594_v62  ;;  %v6042_v61 = vld [vmem:[#allocation3 + $0x73] ss:$2 sm:$0xff]  ;;  %v3416_v62 = vld [vmem:[#allocation3 + $0x98] ss:$2 sm:$0xff] }
 0x244   : > { %13175 = vmatprep.mubr.msk.f32.mxu0 %vm1186_vm1, %v3158_v2  ;;  %13480 = vmatprep.mubr.msk.f32.mxu1 %vm1186_vm1, %v5807_v4  ;;  %v3420_v2 = vld [vmem:[#allocation3 + $0xb8] ss:$2 sm:$0xff]  ;;  %v6045_v4 = vld [vmem:[#allocation3 + $0xa3] ss:$2 sm:$0xff] }
 0x245   : > { %14143 = vmatpush3.bf16.msra.mxu0 %v15927_v27  ;;  %v5815_v27 = vld [vmem:[#allocation3 + $0x92] ss:$2 sm:$0xff] }
 0x246   : > { %14145 = vmatprep.subr.bf16.mxu0 %v15979_v1 }
 0x247   : > { %13176 = vmatmul.mubr.msk.f32.gmra.mrb[66].mxu0 %vm1186_vm1, %v3160_v6  ;;  %13481 = vmatmul.mubr.msk.f32.vlgmr.msra.gmra.mrb[10].mxu1 %vm1186_vm1, %v5808_v7  ;;  %v6046_v6 = vld [vmem:[#allocation3 + $0xb3] ss:$2 sm:$0xff]  ;;  %v3424_v7 = vld [vmem:[#allocation3 + $0xd8] ss:$2 sm:$0xff] }
 0x248   : > { %14187 = vmatpush3.bf16.msra.mxu1 %v15934_v33  ;;  %13178 = vmatprep.mubr.msk.f32.mxu0 %vm1186_vm1, %v3162_v9  ;;  %v3178_v33 = vld [vmem:[#allocation3 + $0xc7] ss:$2 sm:$0xff] }
 0x249   : > { %13483 = vmatprep.mubr.msk.f32.mxu1 %vm1186_vm1, %v5809_v8  ;;  %14189 = vmatprep.subr.bf16.mxu1 %v15986_v5  ;;  %v6047_v9 = vld [vmem:[#allocation3 + $0xc3] ss:$2 sm:$0xff]  ;;  %v3426_v8 = vld [vmem:[#allocation3 + $0xe8] ss:$2 sm:$0xff] }
 0x24b   : > { %13179 = vmatmul.mubr.msk.f32.gmra.mrb[68].mxu0 %vm1186_vm1, %v3164_v31  ;;  %13484 = vmatmul.mubr.msk.f32.gmra.mrb[12].mxu1 %vm1186_vm1, %v5810_v10  ;;  %v6048_v31 = vld [vmem:[#allocation3 + $0xd3] ss:$2 sm:$0xff]  ;;  %v3428_v10 = vld [vmem:[#allocation3 + $0xf8] ss:$2 sm:$0xff] }
 0x24c   : > { %13181 = vmatprep.mubr.msk.f32.mxu0 %vm1186_vm1, %v3166_v11  ;;  %13486 = vmatprep.mubr.msk.f32.mxu1 %vm1186_vm1, %v5811_v12  ;;  %v6049_v11 = vld [vmem:[#allocation3 + $0xe3] ss:$2 sm:$0xff] }
 0x24d   : > { %v3642_v12 = vld [vmem:[#allocation3 + $0x9] ss:$2 sm:$0xff] }
 0x24f   : > { %13182 = vmatmul.mubr.msk.f32.gmra.mrb[70].mxu0 %vm1186_vm1, %v3168_v50  ;;  %13487 = vmatmul.mubr.msk.f32.gmra.mrb[14].mxu1 %vm1186_vm1, %v5812_v13  ;;  %v6050_v50 = vld [vmem:[#allocation3 + $0xf3] ss:$2 sm:$0xff] }
 0x250   : > { %13184 = vmatprep.mubr.msk.f32.mxu0 %vm1186_vm1, %v3170_v14  ;;  %13489 = vmatprep.mubr.msk.f32.mxu1 %vm1186_vm1, %v5813_v15  ;;  %v3644_v13 = vld [vmem:[#allocation3 + $0x19] ss:$2 sm:$0xff] }
 0x251   : > { %v6052_v14 = vld [vmem:[#allocation3 + $0x103] ss:$2 sm:$0xff] }
 0x252   : > { %v11775_v15 = vld [vmem:[%s16913_s3 + $0x160] sm:$0xff] }
 0x253   : > { %13185 = vmatmul.mubr.msk.f32.gmra.mrb[72].mxu0 %vm1186_vm1, %v3172_v16  ;;  %13490 = vmatmul.mubr.msk.f32.gmra.mrb[0].mxu1 %vm1186_vm1, %v5814_v22  ;;  %v11776_v16 = vld [vmem:[%s16913_s3 + $0x168] sm:$0xff] }
 0x254   : > { %13187 = vmatprep.mubr.msk.f32.mxu0 %vm1186_vm1, %v3174_v26  ;;  %13492 = vmatprep.mubr.msk.f32.mxu1 %vm1186_vm1, %v5815_v27  ;;  %v3646_v22 = vld [vmem:[#allocation3 + $0x29] ss:$2 sm:$0xff]  ;;  %v6265_v26 = vld [vmem:[#allocation3 + $0x14] ss:$2 sm:$0xff]  ;;  %v16082_v27 = vpack.c.bf16 %v11776_v16, %v11775_v15 }
 0x255   : > { %v3910_v15 = vld [vmem:[#allocation3 + $0xca] ss:$2 sm:$0xff]  ;;  %v6504_v16 = vld [vmem:[#allocation3 + $0xb5] ss:$2 sm:$0xff] }
 0x257   : > { %13188 = vmatmul.mubr.msk.f32.gmra.mrb[74].mxu0 %vm1186_vm1, %v3176_v29  ;;  %13493 = vmatmul.mubr.msk.f32.gmra.mrb[2].mxu1 %vm1186_vm1, %v5816_v30  ;;  %v3648_v29 = vld [vmem:[#allocation3 + $0x39] ss:$2 sm:$0xff]  ;;  %v6266_v30 = vld [vmem:[#allocation3 + $0x24] ss:$2 sm:$0xff] }
 0x258   : > { %13190 = vmatprep.mubr.msk.f32.mxu0 %vm1186_vm1, %v3178_v33  ;;  %13495 = vmatprep.mubr.msk.f32.mxu1 %vm1186_vm1, %v5817_v34  ;;  %v3650_v33 = vld [vmem:[#allocation3 + $0x49] ss:$2 sm:$0xff]  ;;  %v6267_v34 = vld [vmem:[#allocation3 + $0x34] ss:$2 sm:$0xff] }
 0x25b   : > { %13191 = vmatmul.mubr.msk.f32.gmra.mrb[76].mxu0 %vm1186_vm1, %v3180_v35  ;;  %13496 = vmatmul.mubr.msk.f32.gmra.mrb[4].mxu1 %vm1186_vm1, %v5818_v36  ;;  %v3652_v35 = vld [vmem:[#allocation3 + $0x59] ss:$2 sm:$0xff]  ;;  %v6268_v36 = vld [vmem:[#allocation3 + $0x44] ss:$2 sm:$0xff] }
 0x25c   : > { %13193 = vmatprep.mubr.msk.f32.mxu0 %vm1186_vm1, %v3182_v37  ;;  %13498 = vmatprep.mubr.msk.f32.mxu1 %vm1186_vm1, %v5819_v38  ;;  %v3654_v37 = vld [vmem:[#allocation3 + $0x69] ss:$2 sm:$0xff]  ;;  %v6269_v38 = vld [vmem:[#allocation3 + $0x54] ss:$2 sm:$0xff] }
 0x25f   : > { %13194 = vmatmul.mubr.msk.f32.gmra.mrb[78].mxu0 %vm1186_vm1, %v3184_v39  ;;  %13499 = vmatmul.mubr.msk.f32.gmra.mrb[6].mxu1 %vm1186_vm1, %v5820_v40  ;;  %v3656_v39 = vld [vmem:[#allocation3 + $0x79] ss:$2 sm:$0xff]  ;;  %v6270_v40 = vld [vmem:[#allocation3 + $0x64] ss:$2 sm:$0xff] }
 0x260   : > { %13200 = vmatprep.mubr.msk.f32.mxu0 %vm1186_vm1, %v3398_v41  ;;  %13501 = vmatprep.mubr.msk.f32.mxu1 %vm1186_vm1, %v5821_v42  ;;  %v3658_v41 = vld [vmem:[#allocation3 + $0x89] ss:$2 sm:$0xff]  ;;  %v6271_v42 = vld [vmem:[#allocation3 + $0x74] ss:$2 sm:$0xff] }
 0x263   : > { %13201 = vmatmul.mubr.msk.f32.vlgmr.msra.gmra.mrb[64].mxu0 %vm1186_vm1, %v3400_v44  ;;  %13502 = vmatmul.mubr.msk.f32.gmra.mrb[8].mxu1 %vm1186_vm1, %v5823_v45  ;;  %v3662_v44 = vld [vmem:[#allocation3 + $0xa9] ss:$2 sm:$0xff]  ;;  %v6273_v45 = vld [vmem:[#allocation3 + $0x94] ss:$2 sm:$0xff] }
 0x264   : > { %13203 = vmatprep.mubr.msk.f32.mxu0 %vm1186_vm1, %v3402_v48  ;;  %13508 = vmatprep.mubr.msk.f32.mxu1 %vm1186_vm1, %v6036_v49  ;;  %v6275_v48 = vld [vmem:[#allocation3 + $0xb4] ss:$2 sm:$0xff]  ;;  %v3668_v49 = vld [vmem:[#allocation3 + $0xd9] ss:$2 sm:$0xff] }
 0x265   : > { %14147 = vmatpush3.bf16.msra.mxu0 %v15979_v1  ;;  %v6044_v1 = vld [vmem:[#allocation3 + $0x93] ss:$2 sm:$0xff] }
 0x266   : > { %14149 = vmatprep.subr.bf16.mxu0 %v16031_v47 }
 0x267   : > { %13204 = vmatmul.mubr.msk.f32.gmra.mrb[66].mxu0 %vm1186_vm1, %v3404_v51  ;;  %13509 = vmatmul.mubr.msk.f32.vlgmr.msra.gmra.mrb[10].mxu1 %vm1186_vm1, %v6037_v52  ;;  %v3670_v51 = vld [vmem:[#allocation3 + $0xe9] ss:$2 sm:$0xff]  ;;  %v6277_v52 = vld [vmem:[#allocation3 + $0xd4] ss:$2 sm:$0xff] }
 0x268   : > { %14191 = vmatpush3.bf16.msra.mxu1 %v15986_v5  ;;  %13206 = vmatprep.mubr.msk.f32.mxu0 %vm1186_vm1, %v3406_v53  ;;  %v3422_v5 = vld [vmem:[#allocation3 + $0xc8] ss:$2 sm:$0xff]  ;;  %v3672_v53 = vld [vmem:[#allocation3 + $0xf9] ss:$2 sm:$0xff] }
 0x269   : > { %13511 = vmatprep.mubr.msk.f32.mxu1 %vm1186_vm1, %v6038_v32  ;;  %14193 = vmatprep.subr.bf16.mxu1 %v16038_v28  ;;  %v6278_v32 = vld [vmem:[#allocation3 + $0xe4] ss:$2 sm:$0xff] }
 0x26b   : > { %13207 = vmatmul.mubr.msk.f32.gmra.mrb[68].mxu0 %vm1186_vm1, %v3408_v54  ;;  %13512 = vmatmul.mubr.msk.f32.gmra.mrb[12].mxu1 %vm1186_vm1, %v6039_v55  ;;  %v3886_v54 = vld [vmem:[#allocation3 + $0xa] ss:$2 sm:$0xff] }
 0x26c   : > { %13209 = vmatprep.mubr.msk.f32.mxu0 %vm1186_vm1, %v3410_v56  ;;  %13514 = vmatprep.mubr.msk.f32.mxu1 %vm1186_vm1, %v6040_v57  ;;  %v6279_v55 = vld [vmem:[#allocation3 + $0xf4] ss:$2 sm:$0xff]  ;;  %v6281_v57 = vld [vmem:[#allocation3 + $0x104] ss:$2 sm:$0xff] }
 0x26d   : > { %v3888_v56 = vld [vmem:[#allocation3 + $0x1a] ss:$2 sm:$0xff] }
 0x26f   : > { %13210 = vmatmul.mubr.msk.f32.gmra.mrb[70].mxu0 %vm1186_vm1, %v3412_v58  ;;  %13515 = vmatmul.mubr.msk.f32.gmra.mrb[14].mxu1 %vm1186_vm1, %v6041_v59  ;;  %v11793_v58 = vld [vmem:[%s16913_s3 + $0x170] sm:$0xff]  ;;  %v11794_v59 = vld [vmem:[%s16913_s3 + $0x178] sm:$0xff] }
 0x270   : > { %13212 = vmatprep.mubr.msk.f32.mxu0 %vm1186_vm1, %v3414_v60  ;;  %13517 = vmatprep.mubr.msk.f32.mxu1 %vm1186_vm1, %v6042_v61  ;;  %v3890_v60 = vld [vmem:[#allocation3 + $0x2a] ss:$2 sm:$0xff]  ;;  %v6494_v61 = vld [vmem:[#allocation3 + $0x15] ss:$2 sm:$0xff] }
 0x273   : > { %13213 = vmatmul.mubr.msk.f32.gmra.mrb[72].mxu0 %vm1186_vm1, %v3416_v62  ;;  %13518 = vmatmul.mubr.msk.f32.gmra.mrb[0].mxu1 %vm1186_vm1, %v6043_v63  ;;  %v16126_v62 = vpack.c.bf16 %v11794_v59, %v11793_v58  ;;  %v3892_v63 = vld [vmem:[#allocation3 + $0x3a] ss:$2 sm:$0xff]  ;;  %v11829_v58 = vld [vmem:[%s16913_s3 + $0x190] sm:$0xff] }
 0x274   : > { %13215 = vmatprep.mubr.msk.f32.mxu0 %vm1186_vm1, %v3418_v0  ;;  %13520 = vmatprep.mubr.msk.f32.mxu1 %vm1186_vm1, %v6044_v1  ;;  %v6495_v0 = vld [vmem:[#allocation3 + $0x25] ss:$2 sm:$0xff]  ;;  %v3894_v1 = vld [vmem:[#allocation3 + $0x4a] ss:$2 sm:$0xff] }
 0x275   : > { %v11830_v59 = vld [vmem:[%s16913_s3 + $0x198] sm:$0xff] }
 0x277   : > { %13216 = vmatmul.mubr.msk.f32.gmra.mrb[74].mxu0 %vm1186_vm1, %v3420_v2  ;;  %13521 = vmatmul.mubr.msk.f32.gmra.mrb[2].mxu1 %vm1186_vm1, %v6045_v4  ;;  %v6496_v2 = vld [vmem:[#allocation3 + $0x35] ss:$2 sm:$0xff]  ;;  %v3896_v4 = vld [vmem:[#allocation3 + $0x5a] ss:$2 sm:$0xff] }
 0x278   : > { %13218 = vmatprep.mubr.msk.f32.mxu0 %vm1186_vm1, %v3422_v5  ;;  %13523 = vmatprep.mubr.msk.f32.mxu1 %vm1186_vm1, %v6046_v6  ;;  %v3898_v5 = vld [vmem:[#allocation3 + $0x6a] ss:$2 sm:$0xff]  ;;  %v6498_v6 = vld [vmem:[#allocation3 + $0x55] ss:$2 sm:$0xff] }
 0x27b   : > { %13219 = vmatmul.mubr.msk.f32.gmra.mrb[76].mxu0 %vm1186_vm1, %v3424_v7  ;;  %13524 = vmatmul.mubr.msk.f32.gmra.mrb[4].mxu1 %vm1186_vm1, %v6047_v9  ;;  %v3900_v7 = vld [vmem:[#allocation3 + $0x7a] ss:$2 sm:$0xff]  ;;  %v6499_v9 = vld [vmem:[#allocation3 + $0x65] ss:$2 sm:$0xff] }
 0x27c   : > { %13221 = vmatprep.mubr.msk.f32.mxu0 %vm1186_vm1, %v3426_v8  ;;  %13526 = vmatprep.mubr.msk.f32.mxu1 %vm1186_vm1, %v6048_v31  ;;  %v3902_v8 = vld [vmem:[#allocation3 + $0x8a] ss:$2 sm:$0xff]  ;;  %v6500_v31 = vld [vmem:[#allocation3 + $0x75] ss:$2 sm:$0xff] }
 0x27f   : > { %13222 = vmatmul.mubr.msk.f32.gmra.mrb[78].mxu0 %vm1186_vm1, %v3428_v10  ;;  %13527 = vmatmul.mubr.msk.f32.gmra.mrb[6].mxu1 %vm1186_vm1, %v6049_v11  ;;  %v3904_v10 = vld [vmem:[#allocation3 + $0x9a] ss:$2 sm:$0xff]  ;;  %v6501_v11 = vld [vmem:[#allocation3 + $0x85] ss:$2 sm:$0xff] }
 0x280   : > { %13228 = vmatprep.mubr.msk.f32.mxu0 %vm1186_vm1, %v3642_v12  ;;  %13529 = vmatprep.mubr.msk.f32.mxu1 %vm1186_vm1, %v6050_v50  ;;  %v3906_v12 = vld [vmem:[#allocation3 + $0xaa] ss:$2 sm:$0xff]  ;;  %v6502_v50 = vld [vmem:[#allocation3 + $0x95] ss:$2 sm:$0xff] }
 0x283   : > { %13229 = vmatmul.mubr.msk.f32.vlgmr.msra.gmra.mrb[64].mxu0 %vm1186_vm1, %v3644_v13  ;;  %13530 = vmatmul.mubr.msk.f32.gmra.mrb[8].mxu1 %vm1186_vm1, %v6052_v14  ;;  %v3908_v13 = vld [vmem:[#allocation3 + $0xba] ss:$2 sm:$0xff]  ;;  %v6503_v14 = vld [vmem:[#allocation3 + $0xa5] ss:$2 sm:$0xff] }
 0x284   : > { %13231 = vmatprep.mubr.msk.f32.mxu0 %vm1186_vm1, %v3646_v22  ;;  %13536 = vmatprep.mubr.msk.f32.mxu1 %vm1186_vm1, %v6265_v26  ;;  %v3912_v22 = vld [vmem:[#allocation3 + $0xda] ss:$2 sm:$0xff]  ;;  %v6505_v26 = vld [vmem:[#allocation3 + $0xc5] ss:$2 sm:$0xff] }
 0x285   : > { %14151 = vmatpush3.bf16.msra.mxu0 %v16031_v47  ;;  %v3666_v47 = vld [vmem:[#allocation3 + $0xc9] ss:$2 sm:$0xff] }
 0x286   : > { %14153 = vmatprep.subr.bf16.mxu0 %v15274_v18 }
 0x287   : > { %13232 = vmatmul.mubr.msk.f32.gmra.mrb[66].mxu0 %vm1186_vm1, %v3648_v29  ;;  %13537 = vmatmul.mubr.msk.f32.vlgmr.msra.gmra.mrb[10].mxu1 %vm1186_vm1, %v6266_v30  ;;  %v6506_v29 = vld [vmem:[#allocation3 + $0xd5] ss:$2 sm:$0xff]  ;;  %v3916_v30 = vld [vmem:[#allocation3 + $0xfa] ss:$2 sm:$0xff] }
 0x288   : > { %14195 = vmatpush3.bf16.msra.mxu1 %v16038_v28  ;;  %13234 = vmatprep.mubr.msk.f32.mxu0 %vm1186_vm1, %v3650_v33  ;;  %v6276_v28 = vld [vmem:[#allocation3 + $0xc4] ss:$2 sm:$0xff]  ;;  %v6507_v33 = vld [vmem:[#allocation3 + $0xe5] ss:$2 sm:$0xff] }
 0x289   : > { %13539 = vmatprep.mubr.msk.f32.mxu1 %vm1186_vm1, %v6267_v34  ;;  %14197 = vmatprep.subr.bf16.mxu1 %v16082_v27  ;;  %v4130_v34 = vld [vmem:[#allocation3 + $0xb] ss:$2 sm:$0xff] }
 0x28b   : > { %13235 = vmatmul.mubr.msk.f32.gmra.mrb[68].mxu0 %vm1186_vm1, %v3652_v35  ;;  %13540 = vmatmul.mubr.msk.f32.gmra.mrb[12].mxu1 %vm1186_vm1, %v6268_v36  ;;  %v6508_v35 = vld [vmem:[#allocation3 + $0xf5] ss:$2 sm:$0xff] }
 0x28c   : > { %13237 = vmatprep.mubr.msk.f32.mxu0 %vm1186_vm1, %v3654_v37  ;;  %13542 = vmatprep.mubr.msk.f32.mxu1 %vm1186_vm1, %v6269_v38  ;;  %v4132_v36 = vld [vmem:[#allocation3 + $0x1b] ss:$2 sm:$0xff] }
 0x28d   : > { %v6510_v37 = vld [vmem:[#allocation3 + $0x105] ss:$2 sm:$0xff] }
 0x28e   : > { %v11811_v38 = vld [vmem:[%s16913_s3 + $0x180] sm:$0xff] }
 0x28f   : > { %13238 = vmatmul.mubr.msk.f32.gmra.mrb[70].mxu0 %vm1186_vm1, %v3656_v39  ;;  %13543 = vmatmul.mubr.msk.f32.gmra.mrb[14].mxu1 %vm1186_vm1, %v6270_v40  ;;  %v11812_v39 = vld [vmem:[%s16913_s3 + $0x188] sm:$0xff] }
 0x290   : > { %13240 = vmatprep.mubr.msk.f32.mxu0 %vm1186_vm1, %v3658_v41  ;;  %13545 = vmatprep.mubr.msk.f32.mxu1 %vm1186_vm1, %v6271_v42  ;;  %v4134_v40 = vld [vmem:[#allocation3 + $0x2b] ss:$2 sm:$0xff]  ;;  %v6723_v41 = vld [vmem:[#allocation3 + $0x16] ss:$2 sm:$0xff]  ;;  %v14204_v42 = vpack.c.bf16 %v11812_v39, %v11811_v38 }
 0x291   : > { %v7194_v38 = vld [vmem:[#allocation3 + $0xe8] ss:$2 sm:$0xff]  ;;  %v7195_v39 = vld [vmem:[#allocation3 + $0xf8] ss:$2 sm:$0xff] }
 0x293   : > { %13241 = vmatmul.mubr.msk.f32.gmra.mrb[72].mxu0 %vm1186_vm1, %v3660_v43  ;;  %13546 = vmatmul.mubr.msk.f32.gmra.mrb[0].mxu1 %vm1186_vm1, %v6272_v23  ;;  %v4136_v43 = vld [vmem:[#allocation3 + $0x3b] ss:$2 sm:$0xff]  ;;  %v6724_v23 = vld [vmem:[#allocation3 + $0x26] ss:$2 sm:$0xff] }
 0x294   : > { %13243 = vmatprep.mubr.msk.f32.mxu0 %vm1186_vm1, %v3662_v44  ;;  %13548 = vmatprep.mubr.msk.f32.mxu1 %vm1186_vm1, %v6273_v45  ;;  %v4138_v44 = vld [vmem:[#allocation3 + $0x4b] ss:$2 sm:$0xff]  ;;  %v6725_v45 = vld [vmem:[#allocation3 + $0x36] ss:$2 sm:$0xff] }
 0x297   : > { %13244 = vmatmul.mubr.msk.f32.gmra.mrb[74].mxu0 %vm1186_vm1, %v3664_v46  ;;  %13549 = vmatmul.mubr.msk.f32.gmra.mrb[2].mxu1 %vm1186_vm1, %v6274_v17  ;;  %v4140_v46 = vld [vmem:[#allocation3 + $0x5b] ss:$2 sm:$0xff]  ;;  %v6726_v17 = vld [vmem:[#allocation3 + $0x46] ss:$2 sm:$0xff] }
 0x298   : > { %13246 = vmatprep.mubr.msk.f32.mxu0 %vm1186_vm1, %v3666_v47  ;;  %13551 = vmatprep.mubr.msk.f32.mxu1 %vm1186_vm1, %v6275_v48  ;;  %v6727_v47 = vld [vmem:[#allocation3 + $0x56] ss:$2 sm:$0xff]  ;;  %v6728_v48 = vld [vmem:[#allocation3 + $0x66] ss:$2 sm:$0xff] }
 0x29b   : > { %13247 = vmatmul.mubr.msk.f32.gmra.mrb[76].mxu0 %vm1186_vm1, %v3668_v49  ;;  %13552 = vmatmul.mubr.msk.f32.gmra.mrb[4].mxu1 %vm1186_vm1, %v6276_v28  ;;  %v6729_v49 = vld [vmem:[#allocation3 + $0x76] ss:$2 sm:$0xff]  ;;  %v6730_v28 = vld [vmem:[#allocation3 + $0x86] ss:$2 sm:$0xff] }
 0x29c   : > { %13249 = vmatprep.mubr.msk.f32.mxu0 %vm1186_vm1, %v3670_v51  ;;  %13554 = vmatprep.mubr.msk.f32.mxu1 %vm1186_vm1, %v6277_v52  ;;  %v6731_v51 = vld [vmem:[#allocation3 + $0x96] ss:$2 sm:$0xff]  ;;  %v6732_v52 = vld [vmem:[#allocation3 + $0xa6] ss:$2 sm:$0xff] }
 0x29f   : > { %13250 = vmatmul.mubr.msk.f32.gmra.mrb[78].mxu0 %vm1186_vm1, %v3672_v53  ;;  %13555 = vmatmul.mubr.msk.f32.gmra.mrb[6].mxu1 %vm1186_vm1, %v6278_v32  ;;  %v6733_v53 = vld [vmem:[#allocation3 + $0xb6] ss:$2 sm:$0xff]  ;;  %v6734_v32 = vld [vmem:[#allocation3 + $0xc6] ss:$2 sm:$0xff] }
 0x2a0   : > { %13256 = vmatprep.mubr.msk.f32.mxu0 %vm1186_vm1, %v3886_v54  ;;  %13557 = vmatprep.mubr.msk.f32.mxu1 %vm1186_vm1, %v6279_v55  ;;  %v6735_v54 = vld [vmem:[#allocation3 + $0xd6] ss:$2 sm:$0xff]  ;;  %v6736_v55 = vld [vmem:[#allocation3 + $0xe6] ss:$2 sm:$0xff] }
 0x2a3   : > { %13257 = vmatmul.mubr.msk.f32.vlgmr.msra.gmra.mrb[64].mxu0 %vm1186_vm1, %v3888_v56  ;;  %13558 = vmatmul.mubr.msk.f32.gmra.mrb[8].mxu1 %vm1186_vm1, %v6281_v57  ;;  %v6737_v56 = vld [vmem:[#allocation3 + $0xf6] ss:$2 sm:$0xff]  ;;  %v6739_v57 = vld [vmem:[#allocation3 + $0x106] ss:$2 sm:$0xff] }
 0x2a4   : > { %13259 = vmatprep.mubr.msk.f32.mxu0 %vm1186_vm1, %v3890_v60  ;;  %13564 = vmatprep.mubr.msk.f32.mxu1 %vm1186_vm1, %v6494_v61  ;;  %v6952_v60 = vld [vmem:[#allocation3 + $0x17] ss:$2 sm:$0xff]  ;;  %v14208_v61 = vpack.c.bf16 %v11830_v59, %v11829_v58  ;;  %v11884_v58 = vld [vmem:[%s16913_s3 + $0x1c8] sm:$0xff] }
 0x2a5   : > { %14155 = vmatpush3.bf16.msra.mxu0 %v15274_v18  ;;  %v6497_v18 = vld [vmem:[#allocation3 + $0x45] ss:$2 sm:$0xff]  ;;  %v7639_v59 = vld [vmem:[#allocation3 + $0x1a] ss:$2 sm:$0xff] }
 0x2a7   : > { %13260 = vmatmul.mubr.msk.f32.gmra.mrb[66].mxu0 %vm1186_vm1, %v3892_v63  ;;  %13565 = vmatmul.mubr.msk.f32.vlgmr.msra.gmra.mrb[10].mxu1 %vm1186_vm1, %v6495_v0  ;;  %v6954_v63 = vld [vmem:[#allocation3 + $0x37] ss:$2 sm:$0xff]  ;;  %v6955_v0 = vld [vmem:[#allocation3 + $0x47] ss:$2 sm:$0xff] }
 0x2a8   : > { %14199 = vmatpush3.bf16.msra.mxu1 %v16082_v27  ;;  %13262 = vmatprep.mubr.msk.f32.mxu0 %vm1186_vm1, %v3894_v1  ;;  %v3914_v27 = vld [vmem:[#allocation3 + $0xea] ss:$2 sm:$0xff]  ;;  %v6956_v1 = vld [vmem:[#allocation3 + $0x57] ss:$2 sm:$0xff] }
 0x2a9   : > { %13567 = vmatprep.mubr.msk.f32.mxu1 %vm1186_vm1, %v6496_v2  ;;  %14201 = vmatprep.subr.bf16.mxu1 %v16126_v62  ;;  %v6957_v2 = vld [vmem:[#allocation3 + $0x67] ss:$2 sm:$0xff] }
 0x2ab   : > { %13263 = vmatmul.mubr.msk.f32.gmra.mrb[68].mxu0 %vm1186_vm1, %v3896_v4  ;;  %13568 = vmatmul.mubr.msk.f32.gmra.mrb[12].mxu1 %vm1186_vm1, %v6497_v18  ;;  %v6958_v4 = vld [vmem:[#allocation3 + $0x77] ss:$2 sm:$0xff]  ;;  %v6959_v18 = vld [vmem:[#allocation3 + $0x87] ss:$2 sm:$0xff] }
 0x2ac   : > { %13265 = vmatprep.mubr.msk.f32.mxu0 %vm1186_vm1, %v3898_v5  ;;  %13570 = vmatprep.mubr.msk.f32.mxu1 %vm1186_vm1, %v6498_v6  ;;  %v6960_v5 = vld [vmem:[#allocation3 + $0x97] ss:$2 sm:$0xff]  ;;  %v6961_v6 = vld [vmem:[#allocation3 + $0xa7] ss:$2 sm:$0xff] }
 0x2af   : > { %13266 = vmatmul.mubr.msk.f32.gmra.mrb[70].mxu0 %vm1186_vm1, %v3900_v7  ;;  %13571 = vmatmul.mubr.msk.f32.gmra.mrb[14].mxu1 %vm1186_vm1, %v6499_v9  ;;  %v6962_v7 = vld [vmem:[#allocation3 + $0xb7] ss:$2 sm:$0xff]  ;;  %v6963_v9 = vld [vmem:[#allocation3 + $0xc7] ss:$2 sm:$0xff] }
 0x2b0   : > { %13268 = vmatprep.mubr.msk.f32.mxu0 %vm1186_vm1, %v3902_v8  ;;  %13573 = vmatprep.mubr.msk.f32.mxu1 %vm1186_vm1, %v6500_v31  ;;  %v6964_v8 = vld [vmem:[#allocation3 + $0xd7] ss:$2 sm:$0xff]  ;;  %v6965_v31 = vld [vmem:[#allocation3 + $0xe7] ss:$2 sm:$0xff] }
 0x2b3   : > { %13269 = vmatmul.mubr.msk.f32.gmra.mrb[72].mxu0 %vm1186_vm1, %v3904_v10  ;;  %13574 = vmatmul.mubr.msk.f32.gmra.mrb[0].mxu1 %vm1186_vm1, %v6501_v11  ;;  %v6966_v10 = vld [vmem:[#allocation3 + $0xf7] ss:$2 sm:$0xff]  ;;  %v6968_v11 = vld [vmem:[#allocation3 + $0x107] ss:$2 sm:$0xff] }
 0x2b4   : > { %13271 = vmatprep.mubr.msk.f32.mxu0 %vm1186_vm1, %v3906_v12  ;;  %13576 = vmatprep.mubr.msk.f32.mxu1 %vm1186_vm1, %v6502_v50  ;;  %v11847_v12 = vld [vmem:[%s16913_s3 + $0x1a0] sm:$0xff]  ;;  %v11848_v50 = vld [vmem:[%s16913_s3 + $0x1a8] sm:$0xff] }
 0x2b7   : > { %13272 = vmatmul.mubr.msk.f32.gmra.mrb[74].mxu0 %vm1186_vm1, %v3908_v13  ;;  %13577 = vmatmul.mubr.msk.f32.gmra.mrb[2].mxu1 %vm1186_vm1, %v6503_v14  ;;  %v7181_v13 = vld [vmem:[#allocation3 + $0x18] ss:$2 sm:$0xff]  ;;  %v14212_v14 = vpack.c.bf16 %v11848_v50, %v11847_v12  ;;  %v7868_v50 = vld [vmem:[#allocation3 + $0x1b] ss:$2 sm:$0xff] }
 0x2b8   : > { %13274 = vmatprep.mubr.msk.f32.mxu0 %vm1186_vm1, %v3910_v15  ;;  %13579 = vmatprep.mubr.msk.f32.mxu1 %vm1186_vm1, %v6504_v16  ;;  %v7182_v15 = vld [vmem:[#allocation3 + $0x28] ss:$2 sm:$0xff]  ;;  %v7183_v16 = vld [vmem:[#allocation3 + $0x38] ss:$2 sm:$0xff] }
 0x2b9   : > { %v11902_v12 = vld [vmem:[%s16913_s3 + $0x1d8] sm:$0xff] }
 0x2bb   : > { %13275 = vmatmul.mubr.msk.f32.gmra.mrb[76].mxu0 %vm1186_vm1, %v3912_v22  ;;  %13580 = vmatmul.mubr.msk.f32.gmra.mrb[4].mxu1 %vm1186_vm1, %v6505_v26  ;;  %v7184_v22 = vld [vmem:[#allocation3 + $0x48] ss:$2 sm:$0xff]  ;;  %v7185_v26 = vld [vmem:[#allocation3 + $0x58] ss:$2 sm:$0xff] }
 0x2bc   : > { %13277 = vmatprep.mubr.msk.f32.mxu0 %vm1186_vm1, %v3914_v27  ;;  %13582 = vmatprep.mubr.msk.f32.mxu1 %vm1186_vm1, %v6506_v29  ;;  %v7186_v27 = vld [vmem:[#allocation3 + $0x68] ss:$2 sm:$0xff]  ;;  %v7187_v29 = vld [vmem:[#allocation3 + $0x78] ss:$2 sm:$0xff] }
 0x2bf   : > { %13278 = vmatmul.mubr.msk.f32.gmra.mrb[78].mxu0 %vm1186_vm1, %v3916_v30  ;;  %13583 = vmatmul.mubr.msk.f32.gmra.mrb[6].mxu1 %vm1186_vm1, %v6507_v33  ;;  %v7188_v30 = vld [vmem:[#allocation3 + $0x88] ss:$2 sm:$0xff]  ;;  %v7189_v33 = vld [vmem:[#allocation3 + $0x98] ss:$2 sm:$0xff] }
 0x2c0   : > { %13284 = vmatprep.mubr.msk.f32.mxu0 %vm1186_vm1, %v4130_v34  ;;  %13585 = vmatprep.mubr.msk.f32.mxu1 %vm1186_vm1, %v6508_v35  ;;  %v7190_v34 = vld [vmem:[#allocation3 + $0xa8] ss:$2 sm:$0xff]  ;;  %v7191_v35 = vld [vmem:[#allocation3 + $0xb8] ss:$2 sm:$0xff] }
 0x2c3   : > { %13285 = vmatmul.mubr.msk.f32.vlgmr.msra.gmra.mrb[64].mxu0 %vm1186_vm1, %v4132_v36  ;;  %13586 = vmatmul.mubr.msk.f32.gmra.mrb[8].mxu1 %vm1186_vm1, %v6510_v37  ;;  %v7192_v36 = vld [vmem:[#allocation3 + $0xc8] ss:$2 sm:$0xff]  ;;  %v7193_v37 = vld [vmem:[#allocation3 + $0xd8] ss:$2 sm:$0xff] }
 0x2c4   : > { %13287 = vmatprep.mubr.msk.f32.mxu0 %vm1186_vm1, %v4134_v40  ;;  %13592 = vmatprep.mubr.msk.f32.mxu1 %vm1186_vm1, %v6723_v41  ;;  %v7197_v40 = vld [vmem:[#allocation3 + $0x108] ss:$2 sm:$0xff] }
 0x2c5   : > { %v11865_v41 = vld [vmem:[%s16913_s3 + $0x1b0] sm:$0xff] }
 0x2c7   : > { %13288 = vmatmul.mubr.msk.f32.gmra.mrb[66].mxu0 %vm1186_vm1, %v4136_v43  ;;  %13593 = vmatmul.mubr.msk.f32.vlgmr.msra.gmra.mrb[10].mxu1 %vm1186_vm1, %v6724_v23  ;;  %v7410_v43 = vld [vmem:[#allocation3 + $0x19] ss:$2 sm:$0xff] }
 0x2c8   : > { %14203 = vmatpush3.bf16.msra.mxu1 %v16126_v62  ;;  %13290 = vmatprep.mubr.msk.f32.mxu0 %vm1186_vm1, %v4138_v44  ;;  %v6953_v62 = vld [vmem:[#allocation3 + $0x27] ss:$2 sm:$0xff] }
 0x2c9   : > { %13595 = vmatprep.mubr.msk.f32.mxu1 %vm1186_vm1, %v6725_v45  ;;  %14205 = vmatprep.subr.bf16.mxu1 %v14204_v42  ;;  %v7411_v44 = vld [vmem:[#allocation3 + $0x29] ss:$2 sm:$0xff]  ;;  %v7412_v45 = vld [vmem:[#allocation3 + $0x39] ss:$2 sm:$0xff] }
 0x2cb   : > { %13291 = vmatmul.mubr.msk.f32.gmra.mrb[68].mxu0 %vm1186_vm1, %v4140_v46  ;;  %13596 = vmatmul.mubr.msk.f32.gmra.mrb[12].mxu1 %vm1186_vm1, %v6726_v17  ;;  %v7413_v46 = vld [vmem:[#allocation3 + $0x49] ss:$2 sm:$0xff]  ;;  %v7414_v17 = vld [vmem:[#allocation3 + $0x59] ss:$2 sm:$0xff] }
 0x2cc   : > { %13598 = vmatprep.mubr.msk.f32.mxu1 %vm1186_vm1, %v6727_v47  ;;  %v7415_v47 = vld [vmem:[#allocation3 + $0x69] ss:$2 sm:$0xff] }
 0x2cf   : > { %13599 = vmatmul.mubr.msk.f32.gmra.mrb[14].mxu1 %vm1186_vm1, %v6728_v48  ;;  %v7416_v48 = vld [vmem:[#allocation3 + $0x79] ss:$2 sm:$0xff] }
 0x2d0   : > { %13601 = vmatprep.mubr.msk.f32.mxu1 %vm1186_vm1, %v6729_v49  ;;  %v7417_v49 = vld [vmem:[#allocation3 + $0x89] ss:$2 sm:$0xff] }
 0x2d3   : > { %13602 = vmatmul.mubr.msk.f32.gmra.mrb[0].mxu1 %vm1186_vm1, %v6730_v28  ;;  %v7418_v28 = vld [vmem:[#allocation3 + $0x99] ss:$2 sm:$0xff] }
 0x2d4   : > { %13604 = vmatprep.mubr.msk.f32.mxu1 %vm1186_vm1, %v6731_v51  ;;  %v7419_v51 = vld [vmem:[#allocation3 + $0xa9] ss:$2 sm:$0xff] }
 0x2d7   : > { %13605 = vmatmul.mubr.msk.f32.gmra.mrb[2].mxu1 %vm1186_vm1, %v6732_v52  ;;  %v7420_v52 = vld [vmem:[#allocation3 + $0xb9] ss:$2 sm:$0xff] }
 0x2d8   : > { %13607 = vmatprep.mubr.msk.f32.mxu1 %vm1186_vm1, %v6733_v53  ;;  %v7421_v53 = vld [vmem:[#allocation3 + $0xc9] ss:$2 sm:$0xff] }
 0x2db   : > { %13608 = vmatmul.mubr.msk.f32.gmra.mrb[4].mxu1 %vm1186_vm1, %v6734_v32  ;;  %v7422_v32 = vld [vmem:[#allocation3 + $0xd9] ss:$2 sm:$0xff] }
 0x2dc   : > { %13610 = vmatprep.mubr.msk.f32.mxu1 %vm1186_vm1, %v6735_v54  ;;  %v7423_v54 = vld [vmem:[#allocation3 + $0xe9] ss:$2 sm:$0xff] }
 0x2df   : > { %13611 = vmatmul.mubr.msk.f32.gmra.mrb[6].mxu1 %vm1186_vm1, %v6736_v55  ;;  %v7424_v55 = vld [vmem:[#allocation3 + $0xf9] ss:$2 sm:$0xff] }
 0x2e0   : > { %13613 = vmatprep.mubr.msk.f32.mxu1 %vm1186_vm1, %v6737_v56  ;;  %v7426_v56 = vld [vmem:[#allocation3 + $0x109] ss:$2 sm:$0xff] }
 0x2e3   : > { %13614 = vmatmul.mubr.msk.f32.gmra.mrb[8].mxu1 %vm1186_vm1, %v6739_v57  ;;  %v11883_v57 = vld [vmem:[%s16913_s3 + $0x1c0] sm:$0xff] }
 0x2e4   : > { %13620 = vmatprep.mubr.msk.f32.mxu1 %vm1186_vm1, %v6952_v60  ;;  %v14220_v60 = vpack.c.bf16 %v11884_v58, %v11883_v57  ;;  %v8105_v58 = vld [vmem:[#allocation3 + $0x9c] ss:$2 sm:$0xff] }
 0x2e7   : > { %13621 = vmatmul.mubr.msk.f32.vlgmr.msra.gmra.mrb[10].mxu1 %vm1186_vm1, %v6953_v62  ;;  %v7641_v62 = vld [vmem:[#allocation3 + $0x3a] ss:$2 sm:$0xff] }
 0x2e8   : > { %14207 = vmatpush3.bf16.msra.mxu1 %v14204_v42  ;;  %13623 = vmatprep.mubr.msk.f32.mxu1 %vm1186_vm1, %v6954_v63  ;;  %v11866_v42 = vld [vmem:[%s16913_s3 + $0x1b8] sm:$0xff] }
 0x2e9   : > { %14209 = vmatprep.subr.bf16.mxu1 %v14208_v61  ;;  %v14216_v23 = vpack.c.bf16 %v11866_v42, %v11865_v41  ;;  %v7642_v63 = vld [vmem:[#allocation3 + $0x4a] ss:$2 sm:$0xff]  ;;  %v11919_v41 = vld [vmem:[%s16913_s3 + $0x1e0] sm:$0xff] }
 0x2ea   : > { %v11920_v42 = vld [vmem:[%s16913_s3 + $0x1e8] sm:$0xff] }
 0x2eb   : > { %13624 = vmatmul.mubr.msk.f32.gmra.mrb[12].mxu1 %vm1186_vm1, %v6955_v0  ;;  %v7643_v0 = vld [vmem:[#allocation3 + $0x5a] ss:$2 sm:$0xff] }
 0x2ec   : > { %13626 = vmatprep.mubr.msk.f32.mxu1 %vm1186_vm1, %v6956_v1  ;;  %v7644_v1 = vld [vmem:[#allocation3 + $0x6a] ss:$2 sm:$0xff] }
 0x2ef   : > { %13627 = vmatmul.mubr.msk.f32.gmra.mrb[14].mxu1 %vm1186_vm1, %v6957_v2  ;;  %v7645_v2 = vld [vmem:[#allocation3 + $0x7a] ss:$2 sm:$0xff] }
 0x2f0   : > { %13629 = vmatprep.mubr.msk.f32.mxu1 %vm1186_vm1, %v6958_v4  ;;  %v7646_v4 = vld [vmem:[#allocation3 + $0x8a] ss:$2 sm:$0xff] }
 0x2f3   : > { %13630 = vmatmul.mubr.msk.f32.gmra.mrb[0].mxu1 %vm1186_vm1, %v6959_v18  ;;  %v7647_v18 = vld [vmem:[#allocation3 + $0x9a] ss:$2 sm:$0xff] }
 0x2f4   : > { %13632 = vmatprep.mubr.msk.f32.mxu1 %vm1186_vm1, %v6960_v5  ;;  %v7648_v5 = vld [vmem:[#allocation3 + $0xaa] ss:$2 sm:$0xff] }
 0x2f7   : > { %13633 = vmatmul.mubr.msk.f32.gmra.mrb[2].mxu1 %vm1186_vm1, %v6961_v6  ;;  %v7649_v6 = vld [vmem:[#allocation3 + $0xba] ss:$2 sm:$0xff] }
 0x2f8   : > { %13635 = vmatprep.mubr.msk.f32.mxu1 %vm1186_vm1, %v6962_v7  ;;  %v7650_v7 = vld [vmem:[#allocation3 + $0xca] ss:$2 sm:$0xff] }
 0x2fb   : > { %13636 = vmatmul.mubr.msk.f32.gmra.mrb[4].mxu1 %vm1186_vm1, %v6963_v9  ;;  %v7651_v9 = vld [vmem:[#allocation3 + $0xda] ss:$2 sm:$0xff] }
 0x2fc   : > { %13638 = vmatprep.mubr.msk.f32.mxu1 %vm1186_vm1, %v6964_v8  ;;  %v7652_v8 = vld [vmem:[#allocation3 + $0xea] ss:$2 sm:$0xff] }
 0x2ff   : > { %13639 = vmatmul.mubr.msk.f32.gmra.mrb[6].mxu1 %vm1186_vm1, %v6965_v31  ;;  %v7653_v31 = vld [vmem:[#allocation3 + $0xfa] ss:$2 sm:$0xff] }
 0x300   : > { %13641 = vmatprep.mubr.msk.f32.mxu1 %vm1186_vm1, %v6966_v10  ;;  %v7655_v10 = vld [vmem:[#allocation3 + $0x10a] ss:$2 sm:$0xff] }
 0x303   : > { %13642 = vmatmul.mubr.msk.f32.gmra.mrb[8].mxu1 %vm1186_vm1, %v6968_v11  ;;  %v11901_v11 = vld [vmem:[%s16913_s3 + $0x1d0] sm:$0xff] }
 0x304   : > { %13648 = vmatprep.mubr.msk.f32.mxu1 %vm1186_vm1, %v7181_v13  ;;  %v14224_v13 = vpack.c.bf16 %v11902_v12, %v11901_v11  ;;  %v8327_v11 = vld [vmem:[#allocation3 + $0x2d] ss:$2 sm:$0xff]  ;;  %v8328_v12 = vld [vmem:[#allocation3 + $0x3d] ss:$2 sm:$0xff] }
 0x307   : > { %13649 = vmatmul.mubr.msk.f32.vlgmr.msra.gmra.mrb[10].mxu1 %vm1186_vm1, %v7182_v15  ;;  %v7870_v15 = vld [vmem:[#allocation3 + $0x3b] ss:$2 sm:$0xff] }
 0x308   : > { %14211 = vmatpush3.bf16.msra.mxu1 %v14208_v61  ;;  %13651 = vmatprep.mubr.msk.f32.mxu1 %vm1186_vm1, %v7183_v16  ;;  %v7640_v61 = vld [vmem:[#allocation3 + $0x2a] ss:$2 sm:$0xff]  ;;  %v7871_v16 = vld [vmem:[#allocation3 + $0x4b] ss:$2 sm:$0xff] }
 0x309   : > { %14213 = vmatprep.subr.bf16.mxu1 %v14212_v14 }
 0x30b   : > { %13652 = vmatmul.mubr.msk.f32.gmra.mrb[12].mxu1 %vm1186_vm1, %v7184_v22  ;;  %v7872_v22 = vld [vmem:[#allocation3 + $0x5b] ss:$2 sm:$0xff] }
 0x30c   : > { %13654 = vmatprep.mubr.msk.f32.mxu1 %vm1186_vm1, %v7185_v26  ;;  %v7873_v26 = vld [vmem:[#allocation3 + $0x6b] ss:$2 sm:$0xff] }
 0x30f   : > { %13655 = vmatmul.mubr.msk.f32.gmra.mrb[14].mxu1 %vm1186_vm1, %v7186_v27  ;;  %v7874_v27 = vld [vmem:[#allocation3 + $0x7b] ss:$2 sm:$0xff] }
 0x310   : > { %13657 = vmatprep.mubr.msk.f32.mxu1 %vm1186_vm1, %v7187_v29  ;;  %v7875_v29 = vld [vmem:[#allocation3 + $0x8b] ss:$2 sm:$0xff] }
 0x313   : > { %13658 = vmatmul.mubr.msk.f32.gmra.mrb[0].mxu1 %vm1186_vm1, %v7188_v30  ;;  %v7876_v30 = vld [vmem:[#allocation3 + $0x9b] ss:$2 sm:$0xff] }
 0x314   : > { %13660 = vmatprep.mubr.msk.f32.mxu1 %vm1186_vm1, %v7189_v33  ;;  %v7877_v33 = vld [vmem:[#allocation3 + $0xab] ss:$2 sm:$0xff] }
 0x317   : > { %13661 = vmatmul.mubr.msk.f32.gmra.mrb[2].mxu1 %vm1186_vm1, %v7190_v34  ;;  %v7878_v34 = vld [vmem:[#allocation3 + $0xbb] ss:$2 sm:$0xff] }
 0x318   : > { %13663 = vmatprep.mubr.msk.f32.mxu1 %vm1186_vm1, %v7191_v35  ;;  %v7879_v35 = vld [vmem:[#allocation3 + $0xcb] ss:$2 sm:$0xff] }
 0x31b   : > { %13664 = vmatmul.mubr.msk.f32.gmra.mrb[4].mxu1 %vm1186_vm1, %v7192_v36  ;;  %v7880_v36 = vld [vmem:[#allocation3 + $0xdb] ss:$2 sm:$0xff] }
 0x31c   : > { %13666 = vmatprep.mubr.msk.f32.mxu1 %vm1186_vm1, %v7193_v37  ;;  %v7881_v37 = vld [vmem:[#allocation3 + $0xeb] ss:$2 sm:$0xff] }
 0x31f   : > { %13667 = vmatmul.mubr.msk.f32.gmra.mrb[6].mxu1 %vm1186_vm1, %v7194_v38  ;;  %v7882_v38 = vld [vmem:[#allocation3 + $0xfb] ss:$2 sm:$0xff] }
 0x320   : > { %13669 = vmatprep.mubr.msk.f32.mxu1 %vm1186_vm1, %v7195_v39 }
 0x323   : > { %13670 = vmatmul.mubr.msk.f32.gmra.mrb[8].mxu1 %vm1186_vm1, %v7197_v40  ;;  %v7884_v40 = vld [vmem:[#allocation3 + $0x10b] ss:$2 sm:$0xff] }
 0x324   : > { %13676 = vmatprep.mubr.msk.f32.mxu1 %vm1186_vm1, %v7410_v43 }
 0x327   : > { %13677 = vmatmul.mubr.msk.f32.vlgmr.msra.gmra.mrb[10].mxu1 %vm1186_vm1, %v7411_v44  ;;  %v14228_v44 = vpack.c.bf16 %v11920_v42, %v11919_v41  ;;  %v8559_v41 = vld [vmem:[#allocation3 + $0x5e] ss:$2 sm:$0xff]  ;;  %v8560_v42 = vld [vmem:[#allocation3 + $0x6e] ss:$2 sm:$0xff] }
 0x328   : > { %14215 = vmatpush3.bf16.msra.mxu1 %v14212_v14  ;;  %13679 = vmatprep.mubr.msk.f32.mxu1 %vm1186_vm1, %v7412_v45  ;;  %v7869_v14 = vld [vmem:[#allocation3 + $0x2b] ss:$2 sm:$0xff] }
 0x329   : > { %14217 = vmatprep.subr.bf16.mxu1 %v14216_v23 }
 0x32b   : > { %13680 = vmatmul.mubr.msk.f32.gmra.mrb[12].mxu1 %vm1186_vm1, %v7413_v46  ;;  %v8098_v46 = vld [vmem:[#allocation3 + $0x2c] ss:$2 sm:$0xff] }
 0x32c   : > { %13682 = vmatprep.mubr.msk.f32.mxu1 %vm1186_vm1, %v7414_v17 }
 0x32f   : > { %13683 = vmatmul.mubr.msk.f32.gmra.mrb[14].mxu1 %vm1186_vm1, %v7415_v47  ;;  %v8099_v47 = vld [vmem:[#allocation3 + $0x3c] ss:$2 sm:$0xff] }
 0x330   : > { %13685 = vmatprep.mubr.msk.f32.mxu1 %vm1186_vm1, %v7416_v48 }
 0x333   : > { %13686 = vmatmul.mubr.msk.f32.gmra.mrb[0].mxu1 %vm1186_vm1, %v7417_v49  ;;  %v8100_v49 = vld [vmem:[#allocation3 + $0x4c] ss:$2 sm:$0xff] }
 0x334   : > { %13688 = vmatprep.mubr.msk.f32.mxu1 %vm1186_vm1, %v7418_v28 }
 0x337   : > { %13689 = vmatmul.mubr.msk.f32.gmra.mrb[2].mxu1 %vm1186_vm1, %v7419_v51  ;;  %v8101_v51 = vld [vmem:[#allocation3 + $0x5c] ss:$2 sm:$0xff] }
 0x338   : > { %13691 = vmatprep.mubr.msk.f32.mxu1 %vm1186_vm1, %v7420_v52 }
 0x33b   : > { %13692 = vmatmul.mubr.msk.f32.gmra.mrb[4].mxu1 %vm1186_vm1, %v7421_v53  ;;  %v8102_v53 = vld [vmem:[#allocation3 + $0x6c] ss:$2 sm:$0xff] }
 0x33c   : > { %13694 = vmatprep.mubr.msk.f32.mxu1 %vm1186_vm1, %v7422_v32 }
 0x33f   : > { %13695 = vmatmul.mubr.msk.f32.gmra.mrb[6].mxu1 %vm1186_vm1, %v7423_v54  ;;  %v8103_v54 = vld [vmem:[#allocation3 + $0x7c] ss:$2 sm:$0xff] }
 0x340   : > { %13697 = vmatprep.mubr.msk.f32.mxu1 %vm1186_vm1, %v7424_v55 }
 0x343   : > { %13698 = vmatmul.mubr.msk.f32.gmra.mrb[8].mxu1 %vm1186_vm1, %v7426_v56  ;;  %v8104_v56 = vld [vmem:[#allocation3 + $0x8c] ss:$2 sm:$0xff] }
 0x344   : > { %13704 = vmatprep.mubr.msk.f32.mxu1 %vm1186_vm1, %v7639_v59 }
 0x347   : > { %13705 = vmatmul.mubr.msk.f32.vlgmr.msra.gmra.mrb[10].mxu1 %vm1186_vm1, %v7640_v61 }
 0x348   : > { %14219 = vmatpush3.bf16.msra.mxu1 %v14216_v23  ;;  %13707 = vmatprep.mubr.msk.f32.mxu1 %vm1186_vm1, %v7641_v62  ;;  %v8097_v23 = vld [vmem:[#allocation3 + $0x1c] ss:$2 sm:$0xff] }
 0x349   : > { %14221 = vmatprep.subr.bf16.mxu1 %v14220_v60  ;;  %v8107_v62 = vld [vmem:[#allocation3 + $0xbc] ss:$2 sm:$0xff] }
 0x34b   : > { %13708 = vmatmul.mubr.msk.f32.gmra.mrb[12].mxu1 %vm1186_vm1, %v7642_v63 }
 0x34c   : > { %13710 = vmatprep.mubr.msk.f32.mxu1 %vm1186_vm1, %v7643_v0  ;;  %v8108_v0 = vld [vmem:[#allocation3 + $0xcc] ss:$2 sm:$0xff] }
 0x34f   : > { %13711 = vmatmul.mubr.msk.f32.gmra.mrb[14].mxu1 %vm1186_vm1, %v7644_v1 }
 0x350   : > { %13713 = vmatprep.mubr.msk.f32.mxu1 %vm1186_vm1, %v7645_v2  ;;  %v8109_v2 = vld [vmem:[#allocation3 + $0xdc] ss:$2 sm:$0xff] }
 0x353   : > { %13714 = vmatmul.mubr.msk.f32.gmra.mrb[0].mxu1 %vm1186_vm1, %v7646_v4 }
 0x354   : > { %13716 = vmatprep.mubr.msk.f32.mxu1 %vm1186_vm1, %v7647_v18  ;;  %v8110_v18 = vld [vmem:[#allocation3 + $0xec] ss:$2 sm:$0xff] }
 0x357   : > { %13717 = vmatmul.mubr.msk.f32.gmra.mrb[2].mxu1 %vm1186_vm1, %v7648_v5 }
 0x358   : > { %13719 = vmatprep.mubr.msk.f32.mxu1 %vm1186_vm1, %v7649_v6  ;;  %v8111_v6 = vld [vmem:[#allocation3 + $0xfc] ss:$2 sm:$0xff] }
 0x35b   : > { %13720 = vmatmul.mubr.msk.f32.gmra.mrb[4].mxu1 %vm1186_vm1, %v7650_v7  ;;  %v8113_v7 = vld [vmem:[#allocation3 + $0x10c] ss:$2 sm:$0xff] }
 0x35c   : > { %13722 = vmatprep.mubr.msk.f32.mxu1 %vm1186_vm1, %v7651_v9  ;;  %v11937_v9 = vld [vmem:[%s16913_s3 + $0x1f0] sm:$0xff] }
 0x35f   : > { %13723 = vmatmul.mubr.msk.f32.gmra.mrb[6].mxu1 %vm1186_vm1, %v7652_v8  ;;  %v11938_v8 = vld [vmem:[%s16913_s3 + $0x1f8] sm:$0xff] }
 0x360   : > { %13725 = vmatprep.mubr.msk.f32.mxu1 %vm1186_vm1, %v7653_v31  ;;  %v8326_v31 = vld [vmem:[#allocation3 + $0x1d] ss:$2 sm:$0xff] }
 0x363   : > { %13726 = vmatmul.mubr.msk.f32.gmra.mrb[8].mxu1 %vm1186_vm1, %v7655_v10  ;;  %v14232_v10 = vpack.c.bf16 %v11938_v8, %v11937_v9  ;;  %v8791_v9 = vld [vmem:[#allocation3 + $0x8f] ss:$2 sm:$0xff]  ;;  %v8792_v8 = vld [vmem:[#allocation3 + $0x9f] ss:$2 sm:$0xff] }
 0x364   : > { %13732 = vmatprep.mubr.msk.f32.mxu1 %vm1186_vm1, %v7868_v50  ;;  %v8329_v50 = vld [vmem:[#allocation3 + $0x4d] ss:$2 sm:$0xff] }
 0x367   : > { %13733 = vmatmul.mubr.msk.f32.vlgmr.msra.gmra.mrb[10].mxu1 %vm1186_vm1, %v7869_v14  ;;  %v8331_v14 = vld [vmem:[#allocation3 + $0x6d] ss:$2 sm:$0xff] }
 0x368   : > { %14223 = vmatpush3.bf16.msra.mxu1 %v14220_v60  ;;  %13735 = vmatprep.mubr.msk.f32.mxu1 %vm1186_vm1, %v7870_v15  ;;  %v8106_v60 = vld [vmem:[#allocation3 + $0xac] ss:$2 sm:$0xff]  ;;  %v8332_v15 = vld [vmem:[#allocation3 + $0x7d] ss:$2 sm:$0xff] }
 0x369   : > { %14225 = vmatprep.subr.bf16.mxu1 %v14224_v13 }
 0x36b   : > { %13736 = vmatmul.mubr.msk.f32.gmra.mrb[12].mxu1 %vm1186_vm1, %v7871_v16  ;;  %v8333_v16 = vld [vmem:[#allocation3 + $0x8d] ss:$2 sm:$0xff] }
 0x36c   : > { %13738 = vmatprep.mubr.msk.f32.mxu1 %vm1186_vm1, %v7872_v22  ;;  %v8334_v22 = vld [vmem:[#allocation3 + $0x9d] ss:$2 sm:$0xff] }
 0x36f   : > { %13739 = vmatmul.mubr.msk.f32.gmra.mrb[14].mxu1 %vm1186_vm1, %v7873_v26  ;;  %v8335_v26 = vld [vmem:[#allocation3 + $0xad] ss:$2 sm:$0xff] }
 0x370   : > { %13741 = vmatprep.mubr.msk.f32.mxu1 %vm1186_vm1, %v7874_v27  ;;  %v8336_v27 = vld [vmem:[#allocation3 + $0xbd] ss:$2 sm:$0xff] }
 0x373   : > { %13742 = vmatmul.mubr.msk.f32.gmra.mrb[0].mxu1 %vm1186_vm1, %v7875_v29  ;;  %v8337_v29 = vld [vmem:[#allocation3 + $0xcd] ss:$2 sm:$0xff] }
 0x374   : > { %13744 = vmatprep.mubr.msk.f32.mxu1 %vm1186_vm1, %v7876_v30  ;;  %v8338_v30 = vld [vmem:[#allocation3 + $0xdd] ss:$2 sm:$0xff] }
 0x377   : > { %13745 = vmatmul.mubr.msk.f32.gmra.mrb[2].mxu1 %vm1186_vm1, %v7877_v33  ;;  %v8339_v33 = vld [vmem:[#allocation3 + $0xed] ss:$2 sm:$0xff] }
 0x378   : > { %13747 = vmatprep.mubr.msk.f32.mxu1 %vm1186_vm1, %v7878_v34  ;;  %v8340_v34 = vld [vmem:[#allocation3 + $0xfd] ss:$2 sm:$0xff] }
 0x37b   : > { %13748 = vmatmul.mubr.msk.f32.gmra.mrb[4].mxu1 %vm1186_vm1, %v7879_v35  ;;  %v8342_v35 = vld [vmem:[#allocation3 + $0x10d] ss:$2 sm:$0xff] }
 0x37c   : > { %13750 = vmatprep.mubr.msk.f32.mxu1 %vm1186_vm1, %v7880_v36  ;;  %v8555_v36 = vld [vmem:[#allocation3 + $0x1e] ss:$2 sm:$0xff] }
 0x37f   : > { %13751 = vmatmul.mubr.msk.f32.gmra.mrb[6].mxu1 %vm1186_vm1, %v7881_v37  ;;  %v8556_v37 = vld [vmem:[#allocation3 + $0x2e] ss:$2 sm:$0xff] }
 0x380   : > { %13753 = vmatprep.mubr.msk.f32.mxu1 %vm1186_vm1, %v7882_v38  ;;  %v8557_v38 = vld [vmem:[#allocation3 + $0x3e] ss:$2 sm:$0xff] }
 0x382   : > { %v16296_v39 = vpop.f32.mrb[70].mxu0 }
 0x383   : > { %v16304_v43 = vpop.f32.mrb[71].mxu0  ;;  %13754 = vmatmul.mubr.msk.f32.gmra.mrb[8].mxu1 %vm1186_vm1, %v7884_v40  ;;  %v8558_v40 = vld [vmem:[#allocation3 + $0x4e] ss:$2 sm:$0xff] }
 0x384   : > { %13760 = vmatprep.mubr.msk.f32.mxu1 %vm1186_vm1, %v8097_v23  ;;  %v8561_v23 = vld [vmem:[#allocation3 + $0x7e] ss:$2 sm:$0xff] }
 0x386   : > { %v16308_v45 = vpop.f32.mrb[72].mxu0 }
 0x387   : > { %v16310_v17 = vpop.f32.mrb[73].mxu0  ;;  %13761 = vmatmul.mubr.msk.f32.vlgmr.msra.gmra.mrb[10].mxu1 %vm1186_vm1, %v8098_v46  ;;  %v8563_v46 = vld [vmem:[#allocation3 + $0x9e] ss:$2 sm:$0xff] }
 0x388   : > { %14227 = vmatpush3.bf16.msra.mxu1 %v14224_v13  ;;  %13763 = vmatprep.mubr.msk.f32.mxu1 %vm1186_vm1, %v8099_v47  ;;  %v8330_v13 = vld [vmem:[#allocation3 + $0x5d] ss:$2 sm:$0xff]  ;;  %v8564_v47 = vld [vmem:[#allocation3 + $0xae] ss:$2 sm:$0xff] }
 0x389   : > { %14229 = vmatprep.subr.bf16.mxu1 %v14228_v44 }
 0x38a   : > { %v16314_v48 = vpop.f32.mrb[74].mxu0 }
 0x38b   : > { %v16316_v28 = vpop.f32.mrb[75].mxu0  ;;  %13764 = vmatmul.mubr.msk.f32.gmra.mrb[12].mxu1 %vm1186_vm1, %v8100_v49  ;;  %v8565_v49 = vld [vmem:[#allocation3 + $0xbe] ss:$2 sm:$0xff] }
 0x38c   : > { %13766 = vmatprep.mubr.msk.f32.mxu1 %vm1186_vm1, %v8101_v51  ;;  %v8566_v51 = vld [vmem:[#allocation3 + $0xce] ss:$2 sm:$0xff] }
 0x38e   : > { %v16320_v52 = vpop.f32.mrb[76].mxu0 }
 0x38f   : > { %v16322_v32 = vpop.f32.mrb[77].mxu0  ;;  %13767 = vmatmul.mubr.msk.f32.gmra.mrb[14].mxu1 %vm1186_vm1, %v8102_v53  ;;  %v8567_v53 = vld [vmem:[#allocation3 + $0xde] ss:$2 sm:$0xff] }
 0x390   : > { %13769 = vmatprep.mubr.msk.f32.mxu1 %vm1186_vm1, %v8103_v54  ;;  %v8568_v54 = vld [vmem:[#allocation3 + $0xee] ss:$2 sm:$0xff] }
 0x392   : > { %v16326_v55 = vpop.f32.mrb[78].mxu0 }
 0x393   : > { %v16328_v57 = vpop.f32.mrb[79].mxu0  ;;  %13770 = vmatmul.mubr.msk.f32.gmra.mrb[0].mxu1 %vm1186_vm1, %v8104_v56  ;;  %v8569_v56 = vld [vmem:[#allocation3 + $0xfe] ss:$2 sm:$0xff] }
 0x394   : > { %13772 = vmatprep.mubr.msk.f32.mxu1 %vm1186_vm1, %v8105_v58  ;;  %v8571_v58 = vld [vmem:[#allocation3 + $0x10e] ss:$2 sm:$0xff] }
 0x396   : > { %v16332_v59 = vpop.f32.mrb[64].mxu0 }
 0x397   : > { %v16334_v61 = vpop.f32.mrb[65].mxu0  ;;  %13773 = vmatmul.mubr.msk.f32.gmra.mrb[2].mxu1 %vm1186_vm1, %v8106_v60  ;;  %v8784_v60 = vld [vmem:[#allocation3 + $0x1f] ss:$2 sm:$0xff] }
 0x398   : > { %13775 = vmatprep.mubr.msk.f32.mxu1 %vm1186_vm1, %v8107_v62  ;;  %v8785_v62 = vld [vmem:[#allocation3 + $0x2f] ss:$2 sm:$0xff] }
 0x39a   : > { %v16338_v63 = vpop.f32.mrb[66].mxu0 }
 0x39b   : > { %v16340_v1 = vpop.f32.mrb[67].mxu0  ;;  %13776 = vmatmul.mubr.msk.f32.gmra.mrb[4].mxu1 %vm1186_vm1, %v8108_v0  ;;  %v8786_v0 = vld [vmem:[#allocation3 + $0x3f] ss:$2 sm:$0xff] }
 0x39c   : > { %13778 = vmatprep.mubr.msk.f32.mxu1 %vm1186_vm1, %v8109_v2  ;;  %v8787_v2 = vld [vmem:[#allocation3 + $0x4f] ss:$2 sm:$0xff] }
 0x39e   : > { %v16344_v4 = vpop.f32.mrb[68].mxu0 }
 0x39f   : > { %v16346_v5 = vpop.f32.mrb[69].mxu0  ;;  %13779 = vmatmul.mubr.msk.f32.gmra.mrb[6].mxu1 %vm1186_vm1, %v8110_v18  ;;  %v8788_v18 = vld [vmem:[#allocation3 + $0x5f] ss:$2 sm:$0xff] }
 0x3a0   : > { %13781 = vmatprep.mubr.msk.f32.mxu1 %vm1186_vm1, %v8111_v6  ;;  %v8789_v6 = vld [vmem:[#allocation3 + $0x6f] ss:$2 sm:$0xff] }
 0x3a3   : > { %13782 = vmatmul.mubr.msk.f32.gmra.mrb[8].mxu1 %vm1186_vm1, %v8113_v7  ;;  %v8790_v7 = vld [vmem:[#allocation3 + $0x7f] ss:$2 sm:$0xff] }
 0x3a4   : > { %13788 = vmatprep.mubr.msk.f32.mxu1 %vm1186_vm1, %v8326_v31  ;;  %v8793_v31 = vld [vmem:[#allocation3 + $0xaf] ss:$2 sm:$0xff] }
 0x3a7   : > { %13789 = vmatmul.mubr.msk.f32.vlgmr.msra.gmra.mrb[10].mxu1 %vm1186_vm1, %v8327_v11  ;;  %v8795_v11 = vld [vmem:[#allocation3 + $0xcf] ss:$2 sm:$0xff] }
 0x3a8   : > { %14231 = vmatpush3.bf16.msra.mxu1 %v14228_v44  ;;  %13791 = vmatprep.mubr.msk.f32.mxu1 %vm1186_vm1, %v8328_v12  ;;  %v8562_v44 = vld [vmem:[#allocation3 + $0x8e] ss:$2 sm:$0xff]  ;;  %v8796_v12 = vld [vmem:[#allocation3 + $0xdf] ss:$2 sm:$0xff] }
 0x3a9   : > { %14233 = vmatprep.subr.bf16.mxu1 %v14232_v10 }
 0x3ab   : > { %13792 = vmatmul.mubr.msk.f32.gmra.mrb[12].mxu1 %vm1186_vm1, %v8329_v50  ;;  %v8797_v50 = vld [vmem:[#allocation3 + $0xef] ss:$2 sm:$0xff] }
 0x3ac   : > { %13794 = vmatprep.mubr.msk.f32.mxu1 %vm1186_vm1, %v8330_v13  ;;  %v8798_v13 = vld [vmem:[#allocation3 + $0xff] ss:$2 sm:$0xff] }
 0x3af   : > { %13795 = vmatmul.mubr.msk.f32.gmra.mrb[14].mxu1 %vm1186_vm1, %v8331_v14  ;;  %v8800_v14 = vld [vmem:[#allocation3 + $0x10f] ss:$2 sm:$0xff] }
 0x3b0   : > { %13797 = vmatprep.mubr.msk.f32.mxu1 %vm1186_vm1, %v8332_v15  ;;  %v11955_v15 = vld [vmem:[%s16915_s5 + $0x20] sm:$0xff] }
 0x3b3   : > { %13798 = vmatmul.mubr.msk.f32.gmra.mrb[0].mxu1 %vm1186_vm1, %v8333_v16  ;;  %v11956_v16 = vld [vmem:[%s16915_s5 + $0x28] sm:$0xff] }
 0x3b4   : > { %13800 = vmatprep.mubr.msk.f32.mxu1 %vm1186_vm1, %v8334_v22  ;;  %v11957_v22 = vld [vmem:[%s16915_s5 + $0x30] sm:$0xff] }
 0x3b7   : > { %13801 = vmatmul.mubr.msk.f32.gmra.mrb[2].mxu1 %vm1186_vm1, %v8335_v26  ;;  %v14236_v26 = vpack.c.bf16 %v11956_v16, %v11955_v15 }
 0x3b8   : > { %13803 = vmatprep.mubr.msk.f32.mxu1 %vm1186_vm1, %v8336_v27  ;;  %v11958_v27 = vld [vmem:[%s16915_s5 + $0x38] sm:$0xff] }
 0x3b9   : > { %14237 = vmatprep.subr.bf16.mxu0 %v14236_v26 }
 0x3ba   : > { %14239 = vmatpush3.bf16.msra.mxu0 %v14236_v26 }
 0x3bb   : > { %13804 = vmatmul.mubr.msk.f32.gmra.mrb[4].mxu1 %vm1186_vm1, %v8337_v29  ;;  %v14240_v29 = vpack.c.bf16 %v11958_v27, %v11957_v22 }
 0x3bc   : > { %13806 = vmatprep.mubr.msk.f32.mxu1 %vm1186_vm1, %v8338_v30  ;;  %v9172_v30 = vld [vmem:[%s16915_s5] sm:$0xff] }
 0x3bd   : > { %14241 = vmatprep.subr.bf16.mxu0 %v14240_v29 }
 0x3be   : > { %14243 = vmatpush3.bf16.msra.mxu0 %v14240_v29 }
 0x3bf   : > { %13807 = vmatmul.mubr.msk.f32.gmra.mrb[6].mxu1 %vm1186_vm1, %v8339_v33  ;;  %v9173_v33 = vld [vmem:[%s16915_s5 + $0x8] sm:$0xff] }
 0x3c0   : > { %13809 = vmatprep.mubr.msk.f32.mxu1 %vm1186_vm1, %v8340_v34  ;;  %v16441_v34 = vpack.c.bf16 %v9173_v33, %v9172_v30 }
 0x3c2   : > { %14245 = vmatprep.subr.bf16.mxu0 %v16441_v34 }
 0x3c3   : > { %13810 = vmatmul.mubr.msk.f32.gmra.mrb[8].mxu1 %vm1186_vm1, %v8342_v35  ;;  %v9013_v35 = vld [vmem:[%s16914_s4] sm:$0x7] }
 0x3c4   : > { %13816 = vmatprep.mubr.msk.f32.mxu1 %vm1186_vm1, %v8555_v36  ;;  %v16448_v36 = vrot.slane %v9013_v35, %v15282_v21 }
 0x3c7   : > { %13817 = vmatmul.mubr.msk.f32.vlgmr.msra.gmra.mrb[10].mxu1 %vm1186_vm1, %v8556_v37 }
 0x3c8   : > { %14235 = vmatpush3.bf16.msra.mxu1 %v14232_v10  ;;  %13819 = vmatprep.mubr.msk.f32.mxu1 %vm1186_vm1, %v8557_v38  ;;  %v8794_v10 = vld [vmem:[#allocation3 + $0xbf] ss:$2 sm:$0xff] }
 0x3cb   : > { %13820 = vmatmul.mubr.msk.f32.gmra.mrb[12].mxu1 %vm1186_vm1, %v8558_v40 }
 0x3cc   : > { %13822 = vmatprep.mubr.msk.f32.mxu1 %vm1186_vm1, %v8559_v41 }
 0x3cf   : > { %13823 = vmatmul.mubr.msk.f32.gmra.mrb[14].mxu1 %vm1186_vm1, %v8560_v42 }
 0x3d0   : > { %13825 = vmatprep.mubr.msk.f32.mxu1 %vm1186_vm1, %v8561_v23  ;;  %v16454_v23 = vrot.slane %v9013_v35, %v15291_v24 }
 0x3d3   : > { %13826 = vmatmul.mubr.msk.f32.gmra.mrb[0].mxu1 %vm1186_vm1, %v8562_v44 }
 0x3d4   : > { %13828 = vmatprep.mubr.msk.f32.mxu1 %vm1186_vm1, %v8563_v46 }
 0x3d7   : > { %13829 = vmatmul.mubr.msk.f32.gmra.mrb[2].mxu1 %vm1186_vm1, %v8564_v47 }
 0x3d8   : > { %13831 = vmatprep.mubr.msk.f32.mxu1 %vm1186_vm1, %v8565_v49  ;;  %v16458_v49 = vrot.slane %v9013_v35, %v15294_v25 }
 0x3db   : > { %13832 = vmatmul.mubr.msk.f32.gmra.mrb[4].mxu1 %vm1186_vm1, %v8566_v51 }
 0x3dc   : > { %13834 = vmatprep.mubr.msk.f32.mxu1 %vm1186_vm1, %v8567_v53 }
 0x3df   : > { %13835 = vmatmul.mubr.msk.f32.gmra.mrb[6].mxu1 %vm1186_vm1, %v8568_v54 }
 0x3e0   : > { %13837 = vmatprep.mubr.msk.f32.mxu1 %vm1186_vm1, %v8569_v56 }
 0x3e3   : > { %13838 = vmatmul.mubr.msk.f32.gmra.mrb[8].mxu1 %vm1186_vm1, %v8571_v58 }
 0x3e4   : > { %13844 = vmatprep.mubr.msk.f32.mxu1 %vm1186_vm1, %v8784_v60 }
 0x3e7   : > { %13845 = vmatmul.mubr.msk.f32.vlgmr.msra.gmra.mrb[10].mxu1 %vm1186_vm1, %v8785_v62 }
 0x3e8   : > { %13847 = vmatprep.mubr.msk.f32.mxu1 %vm1186_vm1, %v8786_v0 }
 0x3eb   : > { %13848 = vmatmul.mubr.msk.f32.gmra.mrb[12].mxu1 %vm1186_vm1, %v8787_v2 }
 0x3ec   : > { %13850 = vmatprep.mubr.msk.f32.mxu1 %vm1186_vm1, %v8788_v18 }
 0x3ef   : > { %13851 = vmatmul.mubr.msk.f32.gmra.mrb[14].mxu1 %vm1186_vm1, %v8789_v6 }
 0x3f0   : > { %13853 = vmatprep.mubr.msk.f32.mxu1 %vm1186_vm1, %v8790_v7 }
 0x3f3   : > { %13854 = vmatmul.mubr.msk.f32.gmra.mrb[0].mxu1 %vm1186_vm1, %v8791_v9 }
 0x3f4   : > { %13856 = vmatprep.mubr.msk.f32.mxu1 %vm1186_vm1, %v8792_v8 }
 0x3f7   : > { %13857 = vmatmul.mubr.msk.f32.gmra.mrb[2].mxu1 %vm1186_vm1, %v8793_v31 }
 0x3f8   : > { %13859 = vmatprep.mubr.msk.f32.mxu1 %vm1186_vm1, %v8794_v10 }
 0x3fb   : > { %13860 = vmatmul.mubr.msk.f32.gmra.mrb[4].mxu1 %vm1186_vm1, %v8795_v11 }
 0x3fc   : > { %13862 = vmatprep.mubr.msk.f32.mxu1 %vm1186_vm1, %v8796_v12 }
 0x3ff   : > { %13863 = vmatmul.mubr.msk.f32.gmra.mrb[6].mxu1 %vm1186_vm1, %v8797_v50 }
 0x400   : > { %13865 = vmatprep.mubr.msk.f32.mxu1 %vm1186_vm1, %v8798_v13 }
 0x403   : > { %13866 = vmatmul.mubr.msk.f32.gmra.mrb[8].mxu1 %vm1186_vm1, %v8800_v14 }
 0x4ba   : > { %v13846_v37 = vpop.f32.mrb[10].mxu1 }
 0x4bb   : > { %v14398_v38 = vadd.f32 %v13846_v37, %v16332_v59  ;;  %v8918_v40 = vpop.f32.mrb[11].mxu1 }
 0x4bc   : > { %v14399_v41 = vadd.f32 %v8918_v40, %v16334_v61 }
 0x4bd   : > { %v9019_v42 = vadd.f32 %v14398_v38, %v16448_v36 }
 0x4be   : > { %v9018_v44 = vadd.f32 %v14399_v41, %v16448_v36  ;;  %v13849_v46 = vpop.f32.mrb[12].mxu1 }
 0x4bf   : > { %v9035_v47 = vmax.f32 %v9019_v42, 0.0  ;;  %v14400_v51 = vadd.f32 %v13849_v46, %v16338_v63  ;;  %v8928_v53 = vpop.f32.mrb[13].mxu1 }
 0x4c0   : > { %v9034_v54 = vmax.f32 %v9018_v44, 0.0  ;;  %v14401_v59 = vadd.f32 %v8928_v53, %v16340_v1 }
 0x4c1   : > { %v9055_v61 = vmul.f32 %v16454_v23, %v9035_v47  ;;  %v9021_v56 = vadd.f32 %v14400_v51, %v16448_v36 }
 0x4c2   : > { %v9054_v58 = vmul.f32 %v16454_v23, %v9034_v54  ;;  %v9020_v60 = vadd.f32 %v14401_v59, %v16448_v36  ;;  %v13852_v62 = vpop.f32.mrb[14].mxu1 }
 0x4c3   : > { %v9075_v0 = vadd.f32 %v16458_v49, %v9055_v61  ;;  %v9037_v2 = vmax.f32 %v9021_v56, 0.0  ;;  %v14402_v18 = vadd.f32 %v13852_v62, %v16344_v4  ;;  %v8938_v63 = vpop.f32.mrb[15].mxu1 }
 0x4c4   : > { %v9074_v1 = vadd.f32 %v16458_v49, %v9054_v58  ;;  %v9036_v6 = vmax.f32 %v9020_v60, 0.0  ;;  %v14403_v7 = vadd.f32 %v8938_v63, %v16346_v5 }
 0x4c5   : > { %9092 = vst.msk [vmem:[#allocation4 + $0x8] sm:$0xff] %vm9090_vm3, %v9075_v0  ;;  %v9057_v9 = vmul.f32 %v16454_v23, %v9037_v2  ;;  %v9023_v8 = vadd.f32 %v14402_v18, %v16448_v36 }
 0x4c6   : > { %9091 = vst.msk [vmem:[#allocation4] sm:$0xff] %vm9090_vm3, %v9074_v1  ;;  %v9056_v31 = vmul.f32 %v16454_v23, %v9036_v6  ;;  %v9022_v4 = vadd.f32 %v14403_v7, %v16448_v36  ;;  %v13855_v10 = vpop.f32.mrb[0].mxu1 }
 0x4c7   : > { %v9077_v11 = vadd.f32 %v16458_v49, %v9057_v9  ;;  %v9039_v12 = vmax.f32 %v9023_v8, 0.0  ;;  %v14404_v50 = vadd.f32 %v13855_v10, %v16296_v39  ;;  %v8948_v13 = vpop.f32.mrb[1].mxu1 }
 0x4c8   : > { %v9076_v5 = vadd.f32 %v16458_v49, %v9056_v31  ;;  %v9038_v14 = vmax.f32 %v9022_v4, 0.0  ;;  %v14405_v15 = vadd.f32 %v8948_v13, %v16304_v43 }
 0x4c9   : > { %9094 = vst.msk [vmem:[#allocation4 + $0x18] sm:$0xff] %vm9090_vm3, %v9077_v11  ;;  %v9059_v16 = vmul.f32 %v16454_v23, %v9039_v12  ;;  %v9025_v22 = vadd.f32 %v14404_v50, %v16448_v36 }
 0x4ca   : > { %9093 = vst.msk [vmem:[#allocation4 + $0x10] sm:$0xff] %vm9090_vm3, %v9076_v5  ;;  %v9058_v26 = vmul.f32 %v16454_v23, %v9038_v14  ;;  %v9024_v27 = vadd.f32 %v14405_v15, %v16448_v36  ;;  %v13858_v29 = vpop.f32.mrb[2].mxu1 }
 0x4cb   : > { %v9079_v39 = vadd.f32 %v16458_v49, %v9059_v16  ;;  %v9041_v30 = vmax.f32 %v9025_v22, 0.0  ;;  %v14406_v33 = vadd.f32 %v13858_v29, %v16308_v45  ;;  %v8958_v35 = vpop.f32.mrb[3].mxu1 }
 0x4cc   : > { %v9078_v43 = vadd.f32 %v16458_v49, %v9058_v26  ;;  %v9040_v37 = vmax.f32 %v9024_v27, 0.0  ;;  %v14407_v38 = vadd.f32 %v8958_v35, %v16310_v17 }
 0x4cd   : > { %v9118_v40 = vld [vmem:[#allocation4] ss:$2 sm:$0xff]  ;;  %v9134_v41 = vld [vmem:[#allocation4 + $0x1] ss:$2 sm:$0xff]  ;;  %9096 = vst.msk [vmem:[#allocation4 + $0x28] sm:$0xff] %vm9090_vm3, %v9079_v39  ;;  %v9061_v42 = vmul.f32 %v16454_v23, %v9041_v30  ;;  %v9027_v44 = vadd.f32 %v14406_v33, %v16448_v36 }
 0x4ce   : > { %v9149_v46 = vmax.f32 %v9118_v40, %v9134_v41  ;;  %9095 = vst.msk [vmem:[#allocation4 + $0x20] sm:$0xff] %vm9090_vm3, %v9078_v43  ;;  %v9060_v47 = vmul.f32 %v16454_v23, %v9040_v37  ;;  %v9026_v45 = vadd.f32 %v14407_v38, %v16448_v36  ;;  %v13861_v51 = vpop.f32.mrb[4].mxu1 }
 0x4cf   : > { %v9081_v53 = vadd.f32 %v16458_v49, %v9061_v42  ;;  %v9043_v54 = vmax.f32 %v9027_v44, 0.0  ;;  %v14408_v17 = vadd.f32 %v13861_v51, %v16314_v48  ;;  %v8968_v59 = vpop.f32.mrb[5].mxu1 }
 0x4d0   : > { %9157 = vst.msk [vmem:[#allocation5 + $0x7] sm:$0xff] %vm9090_vm3, %v9149_v46  ;;  %v9080_v61 = vadd.f32 %v16458_v49, %v9060_v47  ;;  %v9042_v56 = vmax.f32 %v9026_v45, 0.0  ;;  %v14409_v58 = vadd.f32 %v8968_v59, %v16316_v28 }
 0x4d1   : > { %v9120_v60 = vld [vmem:[#allocation4 + $0x10] ss:$2 sm:$0xff]  ;;  %v9136_v62 = vld [vmem:[#allocation4 + $0x11] ss:$2 sm:$0xff]  ;;  %9098 = vst.msk [vmem:[#allocation4 + $0x38] sm:$0xff] %vm9090_vm3, %v9081_v53  ;;  %v9063_v0 = vmul.f32 %v16454_v23, %v9043_v54  ;;  %v9029_v2 = vadd.f32 %v14408_v17, %v16448_v36 }
 0x4d2   : > { %v9150_v18 = vmax.f32 %v9120_v60, %v9136_v62  ;;  %9097 = vst.msk [vmem:[#allocation4 + $0x30] sm:$0xff] %vm9090_vm3, %v9080_v61  ;;  %v9062_v48 = vmul.f32 %v16454_v23, %v9042_v56  ;;  %v9028_v63 = vadd.f32 %v14409_v58, %v16448_v36  ;;  %v13864_v1 = vpop.f32.mrb[6].mxu1  ;;  %v9174_v53 = vld [vmem:[%s16915_s5 + $0x10] sm:$0xff]  ;;  %v9175_v54 = vld [vmem:[%s16915_s5 + $0x18] sm:$0xff]  ;;  %v11967_v60 = vld [vmem:[%s16915_s5 + $0x40] sm:$0xff] }
 0x4d3   : > { %v9083_v6 = vadd.f32 %v16458_v49, %v9063_v0  ;;  %v9045_v7 = vmax.f32 %v9029_v2, 0.0  ;;  %v14410_v28 = vadd.f32 %v13864_v1, %v16320_v52  ;;  %v8978_v9 = vpop.f32.mrb[7].mxu1  ;;  %v11968_v62 = vld [vmem:[%s16915_s5 + $0x48] sm:$0xff] }
 0x4d4   : > { %9158 = vst.msk [vmem:[#allocation5 + $0xf] sm:$0xff] %vm9090_vm3, %v9150_v18  ;;  %v9082_v8 = vadd.f32 %v16458_v49, %v9062_v48  ;;  %v9044_v31 = vmax.f32 %v9028_v63, 0.0  ;;  %v14411_v4 = vadd.f32 %v8978_v9, %v16322_v32  ;;  %v14252_v18 = vpack.c.bf16 %v11968_v62, %v11967_v60 }
 0x4d5   : > { %v9122_v10 = vld [vmem:[#allocation4 + $0x20] ss:$2 sm:$0xff]  ;;  %v9138_v11 = vld [vmem:[#allocation4 + $0x21] ss:$2 sm:$0xff]  ;;  %9100 = vst.msk [vmem:[#allocation4 + $0x48] sm:$0xff] %vm9090_vm3, %v9083_v6  ;;  %v9065_v12 = vmul.f32 %v16454_v23, %v9045_v7  ;;  %v9031_v50 = vadd.f32 %v14410_v28, %v16448_v36  ;;  %v11970_v28 = vld [vmem:[%s16915_s5 + $0x58] sm:$0xff] }
 0x4d6   : > { %v9151_v13 = vmax.f32 %v9122_v10, %v9138_v11  ;;  %9099 = vst.msk [vmem:[#allocation4 + $0x40] sm:$0xff] %vm9090_vm3, %v9082_v8  ;;  %v9064_v52 = vmul.f32 %v16454_v23, %v9044_v31  ;;  %v9030_v5 = vadd.f32 %v14411_v4, %v16448_v36  ;;  %v13867_v14 = vpop.f32.mrb[8].mxu1  ;;  %v11975_v4 = vld [vmem:[%s16915_s5 + $0x60] sm:$0xff]  ;;  %v11976_v10 = vld [vmem:[%s16915_s5 + $0x68] sm:$0xff] }
 0x4d7   : > { %v9085_v15 = vadd.f32 %v16458_v49, %v9065_v12  ;;  %v9047_v16 = vmax.f32 %v9031_v50, 0.0  ;;  %v14412_v32 = vadd.f32 %v13867_v14, %v16326_v55  ;;  %v8988_v22 = vpop.f32.mrb[9].mxu1  ;;  %v9165_v9 = vld [vmem:[#allocation5] ss:$2 sm:$0xff]  ;;  %v14260_v12 = vpack.c.bf16 %v11976_v10, %v11975_v4 }
 0x4d8   : > { %9159 = vst.msk [vmem:[#allocation5 + $0x17] sm:$0xff] %vm9090_vm3, %v9151_v13  ;;  %v9084_v26 = vadd.f32 %v16458_v49, %v9064_v52  ;;  %v9046_v27 = vmax.f32 %v9030_v5, 0.0  ;;  %v14413_v29 = vadd.f32 %v8988_v22, %v16328_v57  ;;  %v11977_v13 = vld [vmem:[%s16915_s5 + $0x70] sm:$0xff]  ;;  %v11978_v52 = vld [vmem:[%s16915_s5 + $0x78] sm:$0xff] }
 0x4d9   : > { %v9124_v39 = vld [vmem:[#allocation4 + $0x30] ss:$2 sm:$0xff]  ;;  %v9140_v30 = vld [vmem:[#allocation4 + $0x31] ss:$2 sm:$0xff]  ;;  %9102 = vst.msk [vmem:[#allocation4 + $0x58] sm:$0xff] %vm9090_vm3, %v9085_v15  ;;  %v9067_v33 = vmul.f32 %v16454_v23, %v9047_v16  ;;  %v9033_v35 = vadd.f32 %v14412_v32, %v16448_v36  ;;  %v14264_v14 = vpack.c.bf16 %v11978_v52, %v11977_v13  ;;  %v11983_v16 = vld [vmem:[%s16915_s5 + $0x80] sm:$0xff] }
 0x4da   : > { %v9152_v43 = vmax.f32 %v9124_v39, %v9140_v30  ;;  %9101 = vst.msk [vmem:[#allocation4 + $0x50] sm:$0xff] %vm9090_vm3, %v9084_v26  ;;  %v9066_v55 = vmul.f32 %v16454_v23, %v9046_v27  ;;  %v9032_v37 = vadd.f32 %v14413_v29, %v16448_v36  ;;  %v11984_v32 = vld [vmem:[%s16915_s5 + $0x88] sm:$0xff]  ;;  %v11985_v29 = vld [vmem:[%s16915_s5 + $0x90] sm:$0xff]  ;;  %v11986_v39 = vld [vmem:[%s16915_s5 + $0x98] sm:$0xff] }
 0x4db   : > { %v9087_v38 = vadd.f32 %v16458_v49, %v9067_v33  ;;  %v9049_v40 = vmax.f32 %v9033_v35, 0.0  ;;  %v9177_v41 = vld [vmem:[#allocation5 + $0x1] ss:$2 sm:$0xff]  ;;  %v9384_v5 = vld [vmem:[#allocation5 + $0x2] ss:$2 sm:$0xff]  ;;  %v14268_v26 = vpack.c.bf16 %v11984_v32, %v11983_v16  ;;  %v14272_v33 = vpack.c.bf16 %v11986_v39, %v11985_v29 }
 0x4dc   : > { %9160 = vst.msk [vmem:[#allocation5 + $0x1f] sm:$0xff] %vm9090_vm3, %v9152_v43  ;;  %v9086_v57 = vadd.f32 %v16458_v49, %v9066_v55  ;;  %v9048_v42 = vmax.f32 %v9032_v37, 0.0  ;;  %13876 = vmatprep.mubr.msk.f32.mxu0 %vm9090_vm3, %v9177_v41  ;;  %v9498_v30 = vld [vmem:[#allocation5 + $0x3] ss:$2 sm:$0xff] }
 0x4dd   : > { %v9126_v44 = vld [vmem:[#allocation4 + $0x40] ss:$2 sm:$0xff]  ;;  %v9142_v46 = vld [vmem:[#allocation4 + $0x41] ss:$2 sm:$0xff]  ;;  %9104 = vst.msk [vmem:[#allocation4 + $0x68] sm:$0xff] %vm9090_vm3, %v9087_v38  ;;  %v9069_v47 = vmul.f32 %v16454_v23, %v9049_v40  ;;  %v11993_v41 = vld [vmem:[%s16915_s5 + $0xb0] sm:$0xff] }
 0x4de   : > { %v9153_v45 = vmax.f32 %v9126_v44, %v9142_v46  ;;  %9103 = vst.msk [vmem:[#allocation4 + $0x60] sm:$0xff] %vm9090_vm3, %v9086_v57  ;;  %v9068_v36 = vmul.f32 %v16454_v23, %v9048_v42  ;;  %v14248_v23 = vpack.c.bf16 %v9175_v54, %v9174_v53  ;;  %v11991_v43 = vld [vmem:[%s16915_s5 + $0xa0] sm:$0xff]  ;;  %v11992_v55 = vld [vmem:[%s16915_s5 + $0xa8] sm:$0xff]  ;;  %v11994_v57 = vld [vmem:[%s16915_s5 + $0xb8] sm:$0xff] }
 0x4df   : > { %v9089_v51 = vadd.f32 %v16458_v49, %v9069_v47  ;;  %v9167_v31 = vld [vmem:[#allocation5 + $0x10] ss:$2 sm:$0xff]  ;;  %v14276_v38 = vpack.c.bf16 %v11992_v55, %v11991_v43  ;;  %v14280_v44 = vpack.c.bf16 %v11994_v57, %v11993_v41  ;;  %v11999_v47 = vld [vmem:[%s16915_s5 + $0xc0] sm:$0xff] }
 0x4e0   : > { %9161 = vst.msk [vmem:[#allocation5 + $0x27] sm:$0xff] %vm9090_vm3, %v9153_v45  ;;  %v9088_v17 = vadd.f32 %v16458_v49, %v9068_v36  ;;  %v9612_v42 = vld [vmem:[#allocation5 + $0x4] ss:$2 sm:$0xff] }
 0x4e1   : > { %v9128_v59 = vld [vmem:[#allocation4 + $0x50] ss:$2 sm:$0xff]  ;;  %v9144_v61 = vld [vmem:[#allocation4 + $0x51] ss:$2 sm:$0xff]  ;;  %9106 = vst.msk [vmem:[#allocation4 + $0x78] sm:$0xff] %vm9090_vm3, %v9089_v51  ;;  %v12000_v45 = vld [vmem:[%s16915_s5 + $0xc8] sm:$0xff] }
 0x4e2   : > { %v9154_v56 = vmax.f32 %v9128_v59, %v9144_v61  ;;  %9105 = vst.msk [vmem:[#allocation4 + $0x70] sm:$0xff] %vm9090_vm3, %v9088_v17  ;;  %v14284_v51 = vpack.c.bf16 %v12000_v45, %v11999_v47  ;;  %v12001_v54 = vld [vmem:[%s16915_s5 + $0xd0] sm:$0xff]  ;;  %v12002_v17 = vld [vmem:[%s16915_s5 + $0xd8] sm:$0xff] }
 0x4e3   : > { %v9179_v58 = vld [vmem:[#allocation5 + $0x11] ss:$2 sm:$0xff]  ;;  %v9386_v15 = vld [vmem:[#allocation5 + $0x12] ss:$2 sm:$0xff]  ;;  %v14288_v61 = vpack.c.bf16 %v12002_v17, %v12001_v54 }
 0x4e4   : > { %9162 = vst.msk [vmem:[#allocation5 + $0x2f] sm:$0xff] %vm9090_vm3, %v9154_v56  ;;  %13877 = vmatmul.mubr.msk.f32.vlgmr.msra.gmra.mrb[80].mxu0 %vm9090_vm3, %v9179_v58  ;;  %v9500_v35 = vld [vmem:[#allocation5 + $0x13] ss:$2 sm:$0xff]  ;;  %v9614_v46 = vld [vmem:[#allocation5 + $0x14] ss:$2 sm:$0xff]  ;;  %v12008_v58 = vld [vmem:[%s16915_s5 + $0xe8] sm:$0xff] }
 0x4e5   : > { %v9130_v49 = vld [vmem:[#allocation4 + $0x60] ss:$2 sm:$0xff]  ;;  %v9146_v0 = vld [vmem:[#allocation4 + $0x61] ss:$2 sm:$0xff]  ;;  %14247 = vmatpush3.bf16.msra.mxu0 %v16441_v34  ;;  %v11969_v34 = vld [vmem:[%s16915_s5 + $0x50] sm:$0xff] }
 0x4e6   : > { %v9155_v2 = vmax.f32 %v9130_v49, %v9146_v0  ;;  %14249 = vmatprep.subr.bf16.mxu0 %v14248_v23  ;;  %v14256_v8 = vpack.c.bf16 %v11970_v28, %v11969_v34  ;;  %v9726_v59 = vld [vmem:[#allocation5 + $0x5] ss:$2 sm:$0xff]  ;;  %v9728_v56 = vld [vmem:[#allocation5 + $0x15] ss:$2 sm:$0xff]  ;;  %v10070_v32 = vld [vmem:[#allocation5 + $0x18] ss:$2 sm:$0xff] }
 0x4e7   : > { %v9169_v11 = vld [vmem:[#allocation5 + $0x20] ss:$2 sm:$0xff]  ;;  %v12009_v0 = vld [vmem:[%s16915_s5 + $0xf0] sm:$0xff]  ;;  %v10184_v55 = vld [vmem:[#allocation5 + $0x19] ss:$2 sm:$0xff] }
 0x4e8   : > { %9163 = vst.msk [vmem:[#allocation5 + $0x37] sm:$0xff] %vm9090_vm3, %v9155_v2  ;;  %v12010_v2 = vld [vmem:[%s16915_s5 + $0xf8] sm:$0xff] }
 0x4e9   : > { %v9132_v48 = vld [vmem:[#allocation4 + $0x70] ss:$2 sm:$0xff]  ;;  %v9148_v63 = vld [vmem:[#allocation4 + $0x71] ss:$2 sm:$0xff]  ;;  %14251 = vmatpush3.bf16.msra.mxu0 %v14248_v23  ;;  %v12007_v23 = vld [vmem:[%s16915_s5 + $0xe0] sm:$0xff] }
 0x4ea   : > { %v9156_v1 = vmax.f32 %v9132_v48, %v9148_v63  ;;  %14253 = vmatprep.subr.bf16.mxu0 %v14252_v18  ;;  %v14292_v62 = vpack.c.bf16 %v12008_v58, %v12007_v23  ;;  %v14296_v48 = vpack.c.bf16 %v12010_v2, %v12009_v0  ;;  %v9842_v63 = vld [vmem:[#allocation5 + $0x16] ss:$2 sm:$0xff]  ;;  %v9956_v10 = vld [vmem:[#allocation5 + $0x17] ss:$2 sm:$0xff] }
 0x4eb   : > { %v9181_v6 = vld [vmem:[#allocation5 + $0x21] ss:$2 sm:$0xff]  ;;  %v9388_v22 = vld [vmem:[#allocation5 + $0x22] ss:$2 sm:$0xff] }
 0x4ec   : > { %9164 = vst.msk [vmem:[#allocation5 + $0x3f] sm:$0xff] %vm9090_vm3, %v9156_v1  ;;  %13879 = vmatprep.mubr.msk.f32.mxu0 %vm9090_vm3, %v9181_v6  ;;  %v9502_v37 = vld [vmem:[#allocation5 + $0x23] ss:$2 sm:$0xff]  ;;  %v9616_v36 = vld [vmem:[#allocation5 + $0x24] ss:$2 sm:$0xff] }
 0x4ed   : > { %v9730_v60 = vld [vmem:[#allocation5 + $0x25] ss:$2 sm:$0xff]  ;;  %v10298_v45 = vld [vmem:[#allocation5 + $0x1a] ss:$2 sm:$0xff] }
 0x4ee   : > { %v12015_v1 = vld [vmem:[%s16915_s5 + $0x100] sm:$0xff]  ;;  %v12016_v6 = vld [vmem:[%s16915_s5 + $0x108] sm:$0xff] }
 0x4ef   : > { %v9171_v50 = vld [vmem:[#allocation5 + $0x30] ss:$2 sm:$0xff]  ;;  %v14300_v34 = vpack.c.bf16 %v12016_v6, %v12015_v1  ;;  %v10412_v58 = vld [vmem:[#allocation5 + $0x1b] ss:$2 sm:$0xff] }
 0x4f0   : > { %v10526_v6 = vld [vmem:[#allocation5 + $0x1c] ss:$2 sm:$0xff] }
 0x4f3   : > { %v9183_v7 = vld [vmem:[#allocation5 + $0x31] ss:$2 sm:$0xff]  ;;  %v9390_v27 = vld [vmem:[#allocation5 + $0x32] ss:$2 sm:$0xff] }
 0x4f4   : > { %13880 = vmatmul.mubr.msk.f32.gmra.mrb[82].mxu0 %vm9090_vm3, %v9183_v7  ;;  %v9504_v40 = vld [vmem:[#allocation5 + $0x33] ss:$2 sm:$0xff]  ;;  %v9618_v53 = vld [vmem:[#allocation5 + $0x34] ss:$2 sm:$0xff] }
 0x4f5   : > { %13890 = vmatprep.mubr.msk.f32.mxu0 %vm9090_vm3, %v9165_v9  ;;  %v9732_v49 = vld [vmem:[#allocation5 + $0x35] ss:$2 sm:$0xff]  ;;  %v9844_v7 = vld [vmem:[#allocation5 + $0x26] ss:$2 sm:$0xff]  ;;  %v9846_v28 = vld [vmem:[#allocation5 + $0x36] ss:$2 sm:$0xff] }
 0x4f6   : > { %v12017_v9 = vld [vmem:[%s16915_s5 + $0x110] sm:$0xff]  ;;  %v10074_v39 = vld [vmem:[#allocation5 + $0x38] ss:$2 sm:$0xff]  ;;  %v10188_v57 = vld [vmem:[#allocation5 + $0x39] ss:$2 sm:$0xff] }
 0x4f7   : > { %v9960_v52 = vld [vmem:[#allocation5 + $0x37] ss:$2 sm:$0xff]  ;;  %v10302_v17 = vld [vmem:[#allocation5 + $0x3a] ss:$2 sm:$0xff] }
 0x4f8   : > { %13891 = vmatmul.mubr.msk.f32.vlgmr.msra.gmra.mrb[80].mxu0 %vm9090_vm3, %v9167_v31  ;;  %v9954_v31 = vld [vmem:[#allocation5 + $0x7] ss:$2 sm:$0xff] }
 0x4f9   : > { %14255 = vmatpush3.bf16.msra.mxu0 %v14252_v18  ;;  %13893 = vmatprep.mubr.msk.f32.mxu0 %vm9090_vm3, %v9169_v11  ;;  %v9840_v18 = vld [vmem:[#allocation5 + $0x6] ss:$2 sm:$0xff]  ;;  %v10416_v2 = vld [vmem:[#allocation5 + $0x3b] ss:$2 sm:$0xff] }
 0x4fa   : > { %14257 = vmatprep.subr.bf16.mxu0 %v14256_v8  ;;  %v12023_v11 = vld [vmem:[%s16915_s5 + $0x120] sm:$0xff] }
 0x4fc   : > { %13894 = vmatmul.mubr.msk.f32.gmra.mrb[82].mxu0 %vm9090_vm3, %v9171_v50  ;;  %v9958_v50 = vld [vmem:[#allocation5 + $0x27] ss:$2 sm:$0xff] }
 0x4fd   : > { %14259 = vmatpush3.bf16.msra.mxu0 %v14256_v8  ;;  %13904 = vmatprep.mubr.msk.f32.mxu0 %vm9090_vm3, %v9384_v5  ;;  %v12018_v8 = vld [vmem:[%s16915_s5 + $0x118] sm:$0xff]  ;;  %v12025_v5 = vld [vmem:[%s16915_s5 + $0x130] sm:$0xff] }
 0x4fe   : > { %14261 = vmatprep.subr.bf16.mxu0 %v14260_v12  ;;  %v14304_v4 = vpack.c.bf16 %v12018_v8, %v12017_v9  ;;  %v10530_v8 = vld [vmem:[#allocation5 + $0x3c] ss:$2 sm:$0xff] }
 0x500   : > { %13905 = vmatmul.mubr.msk.f32.vlgmr.msra.gmra.mrb[80].mxu0 %vm9090_vm3, %v9386_v15  ;;  %v10068_v15 = vld [vmem:[#allocation5 + $0x8] ss:$2 sm:$0xff] }
 0x501   : > { %14263 = vmatpush3.bf16.msra.mxu0 %v14260_v12  ;;  %13907 = vmatprep.mubr.msk.f32.mxu0 %vm9090_vm3, %v9388_v22  ;;  %v12024_v12 = vld [vmem:[%s16915_s5 + $0x128] sm:$0xff]  ;;  %v12031_v22 = vld [vmem:[%s16915_s5 + $0x140] sm:$0xff] }
 0x502   : > { %14265 = vmatprep.subr.bf16.mxu0 %v14264_v14  ;;  %v14308_v13 = vpack.c.bf16 %v12024_v12, %v12023_v11  ;;  %v10640_v12 = vld [vmem:[#allocation5 + $0x1d] ss:$2 sm:$0xff] }
 0x504   : > { %13908 = vmatmul.mubr.msk.f32.gmra.mrb[82].mxu0 %vm9090_vm3, %v9390_v27  ;;  %v10072_v27 = vld [vmem:[#allocation5 + $0x28] ss:$2 sm:$0xff] }
 0x505   : > { %14267 = vmatpush3.bf16.msra.mxu0 %v14264_v14  ;;  %13918 = vmatprep.mubr.msk.f32.mxu0 %vm9090_vm3, %v9498_v30  ;;  %v12026_v14 = vld [vmem:[%s16915_s5 + $0x138] sm:$0xff]  ;;  %v12033_v30 = vld [vmem:[%s16915_s5 + $0x150] sm:$0xff] }
 0x506   : > { %14269 = vmatprep.subr.bf16.mxu0 %v14268_v26  ;;  %v14312_v16 = vpack.c.bf16 %v12026_v14, %v12025_v5  ;;  %v10644_v14 = vld [vmem:[#allocation5 + $0x3d] ss:$2 sm:$0xff] }
 0x508   : > { %13919 = vmatmul.mubr.msk.f32.vlgmr.msra.gmra.mrb[80].mxu0 %vm9090_vm3, %v9500_v35  ;;  %v10182_v35 = vld [vmem:[#allocation5 + $0x9] ss:$2 sm:$0xff] }
 0x509   : > { %14271 = vmatpush3.bf16.msra.mxu0 %v14268_v26  ;;  %13921 = vmatprep.mubr.msk.f32.mxu0 %vm9090_vm3, %v9502_v37  ;;  %v12032_v26 = vld [vmem:[%s16915_s5 + $0x148] sm:$0xff]  ;;  %v12039_v37 = vld [vmem:[%s16915_s5 + $0x160] sm:$0xff] }
 0x50a   : > { %14273 = vmatprep.subr.bf16.mxu0 %v14272_v33  ;;  %v14316_v29 = vpack.c.bf16 %v12032_v26, %v12031_v22  ;;  %v10754_v26 = vld [vmem:[#allocation5 + $0x1e] ss:$2 sm:$0xff] }
 0x50c   : > { %13922 = vmatmul.mubr.msk.f32.gmra.mrb[82].mxu0 %vm9090_vm3, %v9504_v40  ;;  %v10186_v40 = vld [vmem:[#allocation5 + $0x29] ss:$2 sm:$0xff] }
 0x50d   : > { %14275 = vmatpush3.bf16.msra.mxu0 %v14272_v33  ;;  %13932 = vmatprep.mubr.msk.f32.mxu0 %vm9090_vm3, %v9612_v42  ;;  %v12034_v33 = vld [vmem:[%s16915_s5 + $0x158] sm:$0xff]  ;;  %v12041_v42 = vld [vmem:[%s16915_s5 + $0x170] sm:$0xff] }
 0x50e   : > { %14277 = vmatprep.subr.bf16.mxu0 %v14276_v38  ;;  %v14320_v43 = vpack.c.bf16 %v12034_v33, %v12033_v30  ;;  %v10868_v30 = vld [vmem:[#allocation5 + $0x1f] ss:$2 sm:$0xff]  ;;  %v10870_v33 = vld [vmem:[#allocation5 + $0x2f] ss:$2 sm:$0xff] }
 0x510   : > { %13933 = vmatmul.mubr.msk.f32.vlgmr.msra.gmra.mrb[80].mxu0 %vm9090_vm3, %v9614_v46  ;;  %v10296_v46 = vld [vmem:[#allocation5 + $0xa] ss:$2 sm:$0xff] }
 0x511   : > { %14279 = vmatpush3.bf16.msra.mxu0 %v14276_v38  ;;  %13935 = vmatprep.mubr.msk.f32.mxu0 %vm9090_vm3, %v9616_v36  ;;  %v12040_v38 = vld [vmem:[%s16915_s5 + $0x168] sm:$0xff]  ;;  %v12047_v36 = vld [vmem:[%s16915_s5 + $0x180] sm:$0xff] }
 0x512   : > { %14281 = vmatprep.subr.bf16.mxu0 %v14280_v44  ;;  %v14324_v41 = vpack.c.bf16 %v12040_v38, %v12039_v37  ;;  %v11023_v37 = vld [vmem:[%s16917_s7] sm:$0xff] }
 0x514   : > { %13936 = vmatmul.mubr.msk.f32.gmra.mrb[82].mxu0 %vm9090_vm3, %v9618_v53  ;;  %v10300_v53 = vld [vmem:[#allocation5 + $0x2a] ss:$2 sm:$0xff] }
 0x515   : > { %14283 = vmatpush3.bf16.msra.mxu0 %v14280_v44  ;;  %13946 = vmatprep.mubr.msk.f32.mxu0 %vm9090_vm3, %v9726_v59  ;;  %v12042_v44 = vld [vmem:[%s16915_s5 + $0x178] sm:$0xff]  ;;  %v12049_v59 = vld [vmem:[%s16915_s5 + $0x190] sm:$0xff] }
 0x516   : > { %14285 = vmatprep.subr.bf16.mxu0 %v14284_v51  ;;  %v14328_v47 = vpack.c.bf16 %v12042_v44, %v12041_v42 }
 0x518   : > { %13947 = vmatmul.mubr.msk.f32.vlgmr.msra.gmra.mrb[80].mxu0 %vm9090_vm3, %v9728_v56  ;;  %v10410_v56 = vld [vmem:[#allocation5 + $0xb] ss:$2 sm:$0xff] }
 0x519   : > { %14287 = vmatpush3.bf16.msra.mxu0 %v14284_v51  ;;  %13949 = vmatprep.mubr.msk.f32.mxu0 %vm9090_vm3, %v9730_v60  ;;  %v12048_v51 = vld [vmem:[%s16915_s5 + $0x188] sm:$0xff]  ;;  %v12055_v60 = vld [vmem:[%s16915_s5 + $0x1a0] sm:$0xff] }
 0x51a   : > { %14289 = vmatprep.subr.bf16.mxu0 %v14288_v61  ;;  %v14332_v54 = vpack.c.bf16 %v12048_v51, %v12047_v36  ;;  %v11044_v36 = vld [vmem:[%s16917_s7 + $0xa8] sm:$0xff] }
 0x51c   : > { %13950 = vmatmul.mubr.msk.f32.gmra.mrb[82].mxu0 %vm9090_vm3, %v9732_v49  ;;  %v10414_v49 = vld [vmem:[#allocation5 + $0x2b] ss:$2 sm:$0xff] }
 0x51d   : > { %14291 = vmatpush3.bf16.msra.mxu0 %v14288_v61  ;;  %13960 = vmatprep.mubr.msk.f32.mxu0 %vm9090_vm3, %v9840_v18  ;;  %v12050_v61 = vld [vmem:[%s16915_s5 + $0x198] sm:$0xff]  ;;  %v12057_v18 = vld [vmem:[%s16915_s5 + $0x1b0] sm:$0xff] }
 0x51e   : > { %14293 = vmatprep.subr.bf16.mxu0 %v14292_v62  ;;  %v14336_v23 = vpack.c.bf16 %v12050_v61, %v12049_v59  ;;  %v11048_v59 = vld [vmem:[%s16917_s7 + $0xc8] sm:$0xff] }
 0x51f   : > { %v11052_v61 = vld [vmem:[%s16917_s7 + $0xe8] sm:$0xff] }
 0x520   : > { %13961 = vmatmul.mubr.msk.f32.vlgmr.msra.gmra.mrb[80].mxu0 %vm9090_vm3, %v9842_v63  ;;  %v10524_v63 = vld [vmem:[#allocation5 + $0xc] ss:$2 sm:$0xff] }
 0x521   : > { %14295 = vmatpush3.bf16.msra.mxu0 %v14292_v62  ;;  %13963 = vmatprep.mubr.msk.f32.mxu0 %vm9090_vm3, %v9844_v7  ;;  %v12056_v62 = vld [vmem:[%s16915_s5 + $0x1a8] sm:$0xff]  ;;  %v12063_v7 = vld [vmem:[%s16915_s5 + $0x1c0] sm:$0xff] }
 0x522   : > { %14297 = vmatprep.subr.bf16.mxu0 %v14296_v48  ;;  %v14340_v0 = vpack.c.bf16 %v12056_v62, %v12055_v60  ;;  %v11051_v60 = vld [vmem:[%s16917_s7 + $0xe0] sm:$0xff]  ;;  %v11026_v62 = vld [vmem:[%s16917_s7 + $0x18] sm:$0xff] }
 0x524   : > { %13964 = vmatmul.mubr.msk.f32.gmra.mrb[82].mxu0 %vm9090_vm3, %v9846_v28  ;;  %v10528_v28 = vld [vmem:[#allocation5 + $0x2c] ss:$2 sm:$0xff] }
 0x525   : > { %14299 = vmatpush3.bf16.msra.mxu0 %v14296_v48  ;;  %13974 = vmatprep.mubr.msk.f32.mxu0 %vm9090_vm3, %v9954_v31  ;;  %v12058_v48 = vld [vmem:[%s16915_s5 + $0x1b8] sm:$0xff]  ;;  %v12065_v31 = vld [vmem:[%s16915_s5 + $0x1d0] sm:$0xff] }
 0x526   : > { %14301 = vmatprep.subr.bf16.mxu0 %v14300_v34  ;;  %v14344_v1 = vpack.c.bf16 %v12058_v48, %v12057_v18  ;;  %v10979_v18 = vld [vmem:[%s16916_s6] sm:$0x7] }
 0x527   : > { %v10983_v48 = vrot.slane %v10979_v18, %v15282_v21 }
 0x528   : > { %13975 = vmatmul.mubr.msk.f32.vlgmr.msra.gmra.mrb[80].mxu0 %vm9090_vm3, %v9956_v10  ;;  %v10638_v10 = vld [vmem:[#allocation5 + $0xd] ss:$2 sm:$0xff] }
 0x529   : > { %14303 = vmatpush3.bf16.msra.mxu0 %v14300_v34  ;;  %13977 = vmatprep.mubr.msk.f32.mxu0 %vm9090_vm3, %v9958_v50  ;;  %v12064_v34 = vld [vmem:[%s16915_s5 + $0x1c8] sm:$0xff]  ;;  %v12071_v50 = vld [vmem:[%s16915_s5 + $0x1e0] sm:$0xff] }
 0x52a   : > { %14305 = vmatprep.subr.bf16.mxu0 %v14304_v4  ;;  %v14348_v9 = vpack.c.bf16 %v12064_v34, %v12063_v7 }
 0x52c   : > { %13978 = vmatmul.mubr.msk.f32.gmra.mrb[82].mxu0 %vm9090_vm3, %v9960_v52  ;;  %v10642_v52 = vld [vmem:[#allocation5 + $0x2d] ss:$2 sm:$0xff] }
 0x52d   : > { %14307 = vmatpush3.bf16.msra.mxu0 %v14304_v4  ;;  %13988 = vmatprep.mubr.msk.f32.mxu0 %vm9090_vm3, %v10068_v15  ;;  %v12066_v4 = vld [vmem:[%s16915_s5 + $0x1d8] sm:$0xff]  ;;  %v12073_v15 = vld [vmem:[%s16915_s5 + $0x1f0] sm:$0xff] }
 0x52e   : > { %14309 = vmatprep.subr.bf16.mxu0 %v14308_v13  ;;  %v14352_v11 = vpack.c.bf16 %v12066_v4, %v12065_v31 }
 0x530   : > { %13989 = vmatmul.mubr.msk.f32.vlgmr.msra.gmra.mrb[80].mxu0 %vm9090_vm3, %v10070_v32  ;;  %v10752_v32 = vld [vmem:[#allocation5 + $0xe] ss:$2 sm:$0xff] }
 0x531   : > { %14311 = vmatpush3.bf16.msra.mxu0 %v14308_v13  ;;  %13991 = vmatprep.mubr.msk.f32.mxu0 %vm9090_vm3, %v10072_v27  ;;  %v12072_v13 = vld [vmem:[%s16915_s5 + $0x1e8] sm:$0xff] }
 0x532   : > { %14313 = vmatprep.subr.bf16.mxu0 %v14312_v16  ;;  %v14356_v5 = vpack.c.bf16 %v12072_v13, %v12071_v50  ;;  %v10756_v27 = vld [vmem:[#allocation5 + $0x2e] ss:$2 sm:$0xff] }
 0x534   : > { %13992 = vmatmul.mubr.msk.f32.gmra.mrb[82].mxu0 %vm9090_vm3, %v10074_v39  ;;  %v10866_v39 = vld [vmem:[#allocation5 + $0xf] ss:$2 sm:$0xff] }
 0x535   : > { %14315 = vmatpush3.bf16.msra.mxu0 %v14312_v16  ;;  %14002 = vmatprep.mubr.msk.f32.mxu0 %vm9090_vm3, %v10182_v35  ;;  %v12074_v16 = vld [vmem:[%s16915_s5 + $0x1f8] sm:$0xff] }
 0x536   : > { %14317 = vmatprep.subr.bf16.mxu0 %v14316_v29  ;;  %v14360_v22 = vpack.c.bf16 %v12074_v16, %v12073_v15  ;;  %v10872_v35 = vld [vmem:[#allocation5 + $0x3f] ss:$2 sm:$0xff] }
 0x538   : > { %14003 = vmatmul.mubr.msk.f32.vlgmr.msra.gmra.mrb[80].mxu0 %vm9090_vm3, %v10184_v55  ;;  %v11028_v55 = vld [vmem:[%s16917_s7 + $0x28] sm:$0xff] }
 0x539   : > { %14319 = vmatpush3.bf16.msra.mxu0 %v14316_v29  ;;  %14005 = vmatprep.mubr.msk.f32.mxu0 %vm9090_vm3, %v10186_v40  ;;  %v10758_v29 = vld [vmem:[#allocation5 + $0x3e] ss:$2 sm:$0xff] }
 0x53a   : > { %14321 = vmatprep.subr.bf16.mxu0 %v14320_v43  ;;  %v11027_v40 = vld [vmem:[%s16917_s7 + $0x20] sm:$0xff] }
 0x53b   : > { %v14366_v42 = vpack.c.bf16 %v11027_v40, %v11023_v37 }
 0x53c   : > { %14006 = vmatmul.mubr.msk.f32.gmra.mrb[82].mxu0 %vm9090_vm3, %v10188_v57  ;;  %v11036_v57 = vld [vmem:[%s16917_s7 + $0x68] sm:$0xff] }
 0x53d   : > { %14323 = vmatpush3.bf16.msra.mxu0 %v14320_v43  ;;  %14016 = vmatprep.mubr.msk.f32.mxu0 %vm9090_vm3, %v10296_v46  ;;  %v11024_v43 = vld [vmem:[%s16917_s7 + $0x8] sm:$0xff]  ;;  %v11031_v46 = vld [vmem:[%s16917_s7 + $0x40] sm:$0xff] }
 0x53e   : > { %14325 = vmatprep.subr.bf16.mxu0 %v14324_v41  ;;  %v14364_v38 = vpack.c.bf16 %v11028_v55, %v11024_v43 }
 0x540   : > { %14017 = vmatmul.mubr.msk.f32.vlgmr.msra.gmra.mrb[80].mxu0 %vm9090_vm3, %v10298_v45  ;;  %v11040_v45 = vld [vmem:[%s16917_s7 + $0x88] sm:$0xff] }
 0x541   : > { %14327 = vmatpush3.bf16.msra.mxu0 %v14324_v41  ;;  %14019 = vmatprep.mubr.msk.f32.mxu0 %vm9090_vm3, %v10300_v53  ;;  %v11032_v41 = vld [vmem:[%s16917_s7 + $0x48] sm:$0xff]  ;;  %v14372_v53 = vpack.c.bf16 %v11044_v36, %v11040_v45 }
 0x542   : > { %14329 = vmatprep.subr.bf16.mxu0 %v14328_v47  ;;  %v14368_v44 = vpack.c.bf16 %v11036_v57, %v11032_v41  ;;  %v11025_v41 = vld [vmem:[%s16917_s7 + $0x10] sm:$0xff] }
 0x543   : > { %v11029_v57 = vld [vmem:[%s16917_s7 + $0x30] sm:$0xff] }
 0x544   : > { %14020 = vmatmul.mubr.msk.f32.gmra.mrb[82].mxu0 %vm9090_vm3, %v10302_v17  ;;  %v11043_v17 = vld [vmem:[%s16917_s7 + $0xa0] sm:$0xff] }
 0x545   : > { %14331 = vmatpush3.bf16.msra.mxu0 %v14328_v47  ;;  %14030 = vmatprep.mubr.msk.f32.mxu0 %vm9090_vm3, %v10410_v56  ;;  %v11035_v47 = vld [vmem:[%s16917_s7 + $0x60] sm:$0xff] }
 0x546   : > { %14333 = vmatprep.subr.bf16.mxu0 %v14332_v54  ;;  %v14370_v51 = vpack.c.bf16 %v11035_v47, %v11031_v46  ;;  %v14382_v47 = vpack.c.bf16 %v11029_v57, %v11025_v41 }
 0x548   : > { %14031 = vmatmul.mubr.msk.f32.vlgmr.msra.gmra.mrb[80].mxu0 %vm9090_vm3, %v10412_v58  ;;  %v11047_v58 = vld [vmem:[%s16917_s7 + $0xc0] sm:$0xff] }
 0x549   : > { %14335 = vmatpush3.bf16.msra.mxu0 %v14332_v54  ;;  %14033 = vmatprep.mubr.msk.f32.mxu0 %vm9090_vm3, %v10414_v49  ;;  %v11039_v54 = vld [vmem:[%s16917_s7 + $0x80] sm:$0xff]  ;;  %v11030_v49 = vld [vmem:[%s16917_s7 + $0x38] sm:$0xff] }
 0x54a   : > { %14337 = vmatprep.subr.bf16.mxu0 %v14336_v23  ;;  %v14374_v56 = vpack.c.bf16 %v11043_v17, %v11039_v54  ;;  %v11042_v54 = vld [vmem:[%s16917_s7 + $0x98] sm:$0xff] }
 0x54b   : > { %v11046_v17 = vld [vmem:[%s16917_s7 + $0xb8] sm:$0xff] }
 0x54c   : > { %14034 = vmatmul.mubr.msk.f32.gmra.mrb[82].mxu0 %vm9090_vm3, %v10416_v2  ;;  %v14380_v2 = vpack.c.bf16 %v11030_v49, %v11026_v62  ;;  %v11049_v49 = vld [vmem:[%s16917_s7 + $0xd0] sm:$0xff] }
 0x54d   : > { %14339 = vmatpush3.bf16.msra.mxu0 %v14336_v23  ;;  %14044 = vmatprep.mubr.msk.f32.mxu0 %vm9090_vm3, %v10524_v63  ;;  %v14376_v23 = vpack.c.bf16 %v11052_v61, %v11048_v59  ;;  %v14388_v61 = vpack.c.bf16 %v11046_v17, %v11042_v54 }
 0x54e   : > { %14341 = vmatprep.subr.bf16.mxu0 %v14340_v0 }
 0x550   : > { %14045 = vmatmul.mubr.msk.f32.vlgmr.msra.gmra.mrb[80].mxu0 %vm9090_vm3, %v10526_v6  ;;  %v10995_v6 = vrot.slane %v10979_v18, %v15291_v24 }
 0x551   : > { %14343 = vmatpush3.bf16.msra.mxu0 %v14340_v0  ;;  %14047 = vmatprep.mubr.msk.f32.mxu0 %vm9090_vm3, %v10528_v28  ;;  %v14378_v0 = vpack.c.bf16 %v11051_v60, %v11047_v58  ;;  %v11050_v58 = vld [vmem:[%s16917_s7 + $0xd8] sm:$0xff] }
 0x552   : > { %14345 = vmatprep.subr.bf16.mxu0 %v14344_v1  ;;  %v11054_v60 = vld [vmem:[%s16917_s7 + $0xf8] sm:$0xff] }
 0x553   : > { %v14392_v62 = vpack.c.bf16 %v11054_v60, %v11050_v58 }
 0x554   : > { %14048 = vmatmul.mubr.msk.f32.gmra.mrb[82].mxu0 %vm9090_vm3, %v10530_v8 }
 0x555   : > { %14347 = vmatpush3.bf16.msra.mxu0 %v14344_v1  ;;  %14058 = vmatprep.mubr.msk.f32.mxu0 %vm9090_vm3, %v10638_v10 }
 0x556   : > { %14349 = vmatprep.subr.bf16.mxu0 %v14348_v9 }
 0x558   : > { %14059 = vmatmul.mubr.msk.f32.vlgmr.msra.gmra.mrb[80].mxu0 %vm9090_vm3, %v10640_v12 }
 0x559   : > { %14351 = vmatpush3.bf16.msra.mxu0 %v14348_v9  ;;  %14061 = vmatprep.mubr.msk.f32.mxu0 %vm9090_vm3, %v10642_v52  ;;  %v11003_v9 = vrot.slane %v10979_v18, %v15294_v25  ;;  %v11055_v18 = vld [vmem:[%s16918_s8] sm:$0xf] }
 0x55a   : > { %14353 = vmatprep.subr.bf16.mxu0 %v14352_v11 }
 0x55c   : > { %14062 = vmatmul.mubr.msk.f32.gmra.mrb[82].mxu0 %vm9090_vm3, %v10644_v14 }
 0x55d   : > { %14355 = vmatpush3.bf16.msra.mxu0 %v14352_v11  ;;  %14072 = vmatprep.mubr.msk.f32.mxu0 %vm9090_vm3, %v10752_v32 }
 0x55e   : > { %14357 = vmatprep.subr.bf16.mxu0 %v14356_v5 }
 0x560   : > { %14073 = vmatmul.mubr.msk.f32.vlgmr.msra.gmra.mrb[80].mxu0 %vm9090_vm3, %v10754_v26 }
 0x561   : > { %14359 = vmatpush3.bf16.msra.mxu0 %v14356_v5  ;;  %14075 = vmatprep.mubr.msk.f32.mxu0 %vm9090_vm3, %v10756_v27 }
 0x562   : > { %14361 = vmatprep.subr.bf16.mxu0 %v14360_v22 }
 0x564   : > { %14076 = vmatmul.mubr.msk.f32.gmra.mrb[82].mxu0 %vm9090_vm3, %v10758_v29 }
 0x565   : > { %14363 = vmatpush3.bf16.msra.mxu0 %v14360_v22  ;;  %14086 = vmatprep.mubr.msk.f32.mxu0 %vm9090_vm3, %v10866_v39 }
 0x566   : > { %14365 = vmatprep.subr.bf16.mxu0 %v14364_v38 }
 0x568   : > { %14087 = vmatmul.mubr.msk.f32.vlgmr.msra.gmra.mrb[80].mxu0 %vm9090_vm3, %v10868_v30 }
 0x569   : > { %14089 = vmatprep.mubr.msk.f32.mxu0 %vm9090_vm3, %v10870_v33  ;;  %14367 = vmatpush1.bf16.msra.mxu0 %v14366_v42  ;;  %v11034_v42 = vld [vmem:[%s16917_s7 + $0x58] sm:$0xff] }
 0x56a   : > { %14369 = vmatprep.subr.bf16.mxu0 %v14368_v44  ;;  %v11038_v44 = vld [vmem:[%s16917_s7 + $0x78] sm:$0xff] }
 0x56b   : > { %v14384_v36 = vpack.c.bf16 %v11038_v44, %v11034_v42 }
 0x56c   : > { %14090 = vmatmul.mubr.msk.f32.gmra.mrb[82].mxu0 %vm9090_vm3, %v10872_v35 }
 0x56d   : > { %11144 = vmatprep.mubr.f32.mxu0 %v14972_v3  ;;  %14371 = vmatpush1.bf16.msra.mxu0 %v14370_v51  ;;  %v11033_v51 = vld [vmem:[%s16917_s7 + $0x50] sm:$0xff] }
 0x56e   : > { %14373 = vmatprep.subr.bf16.mxu0 %v14372_v53  ;;  %v11037_v53 = vld [vmem:[%s16917_s7 + $0x70] sm:$0xff] }
 0x56f   : > { %v14386_v59 = vpack.c.bf16 %v11037_v53, %v11033_v51 }
 0x571   : > { %14375 = vmatpush1.bf16.msra.mxu0 %v14374_v56  ;;  %v11041_v56 = vld [vmem:[%s16917_s7 + $0x90] sm:$0xff] }
 0x572   : > { %14377 = vmatprep.subr.bf16.mxu0 %v14376_v23  ;;  %v11045_v23 = vld [vmem:[%s16917_s7 + $0xb0] sm:$0xff] }
 0x575   : > { %14379 = vmatpush1.bf16.msra.mxu0 %v14378_v0  ;;  %v11053_v0 = vld [vmem:[%s16917_s7 + $0xf0] sm:$0xff] }
 0x576   : > { %14381 = vmatprep.subr.bf16.mxu0 %v14380_v2  ;;  %v14394_v2 = vpack.c.bf16 %v11053_v0, %v11049_v49 }
 0x63b   : > { %v14088_v63 = vpop.f32.mrb[80].mxu0 }
 0x63c   : > { %v10985_v1 = vadd.f32 %v14088_v63, %v10983_v48  ;;  %v10956_v7 = vpop.f32.mrb[81].mxu0  ;;  %v11064_v63 = vrot.slane %v11055_v18, %v15291_v24 }
 0x63d   : > { %v10984_v34 = vadd.f32 %v10983_v48, %v10956_v7 }
 0x63e   : > { %v10989_v28 = vmax.f32 %v10985_v1, 0.0 }
 0x63f   : > { %v10988_v8 = vmax.f32 %v10984_v34, 0.0  ;;  %v14091_v31 = vpop.f32.mrb[82].mxu0 }
 0x640   : > { %v10997_v4 = vmul.f32 %v10995_v6, %v10989_v28  ;;  %v10987_v10 = vadd.f32 %v14091_v31, %v10983_v48  ;;  %v10966_v11 = vpop.f32.mrb[83].mxu0  ;;  %v11071_v31 = vsub.s32 3, %v15279_v20 }
 0x641   : > { %v10996_v12 = vmul.f32 %v10995_v6, %v10988_v8  ;;  %v10986_v50 = vadd.f32 %v10983_v48, %v10966_v11  ;;  %v11060_v48 = vrot.slane %v11055_v18, %v15282_v21 }
 0x642   : > { %v11005_v13 = vadd.f32 %v11003_v9, %v10997_v4  ;;  %v10991_v52 = vmax.f32 %v10987_v10, 0.0  ;;  %v11068_v4 = vrot.slane %v11055_v18, %v15294_v25  ;;  %v11072_v11 = vrot.slane %v11055_v18, %v11071_v31 }
 0x643   : > { %v11004_v5 = vadd.f32 %v11003_v9, %v10996_v12  ;;  %v10990_v14 = vmax.f32 %v10986_v50, 0.0 }
 0x644   : > { %v11009_v15 = vsel %vm408_vm0, %v11005_v13, 0.0  ;;  %v10999_v16 = vmul.f32 %v10995_v6, %v10991_v52 }
 0x645   : > { %v11008_v32 = vsel %vm408_vm0, %v11004_v5, 0.0  ;;  %v10998_v22 = vmul.f32 %v10995_v6, %v10990_v14 }
 0x646   : > { %v11010_v26 = vadd.f32 %v11009_v15, %v11008_v32  ;;  %v11007_v27 = vadd.f32 %v11003_v9, %v10999_v16 }
 0x647   : > { %v11006_v29 = vadd.f32 %v11003_v9, %v10998_v22  ;;  %v14973_v9 = vmov 1966171168  }
 0x648   : > { %v11013_v33 = vsel %vm408_vm0, %v11007_v27, 0.0  ;;  %v11229_v8 = vunpack.c.l.s4 %v14973_v9 }
 0x649   : > { %v11011_v39 = vsel %vm408_vm0, %v11006_v29, 0.0 }
 0x64a   : > { %v11012_v30 = vadd.f32 %v11011_v39, %v11010_v26  ;;  %v11230_v10 = vunpack.c.0.s8 %v11229_v8 }
 0x64c   : > { %v11014_v35 = vadd.f32 %v11013_v33, %v11012_v30  ;;  %v11233_v21 = vsub.s32 %v11230_v10, %v15279_v20 }
 0x64e   : > { %v11015_v43 = vrot.slane %v11014_v35, 4 }
 0x650   : > { %v11016_v55 = vadd.f32 %v11015_v43, %v11014_v35 }
 0x652   : > { %v11017_v37 = vrot.slane %v11016_v55, 2 }
 0x654   : > { %v11018_v38 = vadd.f32 %v11017_v37, %v11016_v55 }
 0x656   : > { %v11019_v40 = vrot.slane %v11018_v38, 1 }
 0x658   : > { %v11020_v46 = vadd.f32 %v11019_v40, %v11018_v38 }
 0x65a   : > { %v11022_v45 = vmul.f32 0.03125, %v11020_v46 }
 0x65c   : > { %12079 = vmatmul.mubr.msk.f32.vlgmr.msra.gmra.mrb[84].mxu0 %vm408_vm0, %v11022_v45 }
 0x65d   : > { %14383 = vmatpush1.bf16.msra.mxu0 %v14382_v47  ;;  %11215 = vmatprep.mubr.f32.mxu0 %v14972_v3  ;;  %v14390_v3 = vpack.c.bf16 %v11045_v23, %v11041_v56 }
 0x65e   : > { %14385 = vmatprep.subr.bf16.mxu0 %v14384_v36 }
 0x661   : > { %14387 = vmatpush1.bf16.msra.mxu0 %v14386_v59 }
 0x662   : > { %14389 = vmatprep.subr.bf16.mxu0 %v14388_v61 }
 0x665   : > { %14391 = vmatpush1.bf16.msra.mxu0 %v14390_v3 }
 0x666   : > { %14393 = vmatprep.subr.bf16.mxu0 %v14392_v62 }
 0x669   : > { %14395 = vmatpush1.bf16.msra.mxu0 %v14394_v2 }
 0x66c   : > { %12080 = vmatmul.mubr.msk.f32.vlgmr.msra.gmra.mrb[86].mxu0 %vm408_vm0, %v11022_v45 }
 0x72f   : > { %v11146_v1 = vpop.f32.mrb[84].mxu0 }
 0x730   : > { %v11147_v6 = vadd.f32 %v11146_v1, %v11060_v48  ;;  %v11148_v7 = vpop.f32.mrb[85].mxu0 }
 0x731   : > { %v11149_v34 = vadd.f32 %v11148_v7, %v11064_v63 }
 0x733   : > { %v11226_v28 = vcombine.low %v11147_v6, %v11149_v34 }
 0x735   : > { %v11234_v5 = vrot.slane %v11226_v28, %v11233_v21 }
 0x73f   : > { %v11217_v12 = vpop.f32.mrb[86].mxu0 }
 0x740   : > { %v11218_v50 = vadd.f32 %v11217_v12, %v11068_v4  ;;  %v11219_v13 = vpop.f32.mrb[87].mxu0 }
 0x741   : > { %v11220_v24 = vadd.f32 %v11219_v13, %v11072_v11 }
 0x743   : > { %v11227_v52 = vcombine.low %v11218_v50, %v11220_v24 }
 0x745   : > { %v11241_v14 = vrot.slane %v11227_v52, %v11233_v21 }
 0x747   : > { %v11242_v15 = vcombine.low %v11234_v5, %v11241_v14 }
 0x749   : > { %v11249_v25 = vrot.slane %v11242_v15, %v11233_v21 }
 0x74b   : > { %11255 = vst.msk [vmem:[%s330_s20] sm:$0xf] %vm11253_vm5, %v11249_v25 }
 0x74c PF: > { %s19_s30 = sadd.s32 1, %s14970_s30  }
 0x74d   : > { %p16_p4 = scmp.ge.s32.totalorder %s19_s30, 4  }
 0x74f   :  { %18 = sbr.rel (!%p16_p4) target bundleno = 1 (0x1), region = 544 }

</bundles_post_ra>
